<compile_context>
chip_gen: v6e
topology: v6e:2x2x1
jax: 0.10.0
libtpu: 0.0.40
codegen_flags: <defaults>
</compile_context>

<pallas_src>
import functools

import jax
import jax.numpy as jnp
from jax.experimental import pallas as pl
from jax.experimental.pallas import tpu as pltpu

LATENT_DIM = 100
H1, H2, H3, H4 = 128, 256, 512, 1024
OUT_DIM = 28 * 28          # 784
OUT_PAD = 896              # 7 * 128 -> lane-dense padded output width
BN_EPS = 1e-5
NEG_SLOPE = 0.2

# Static lane offsets into the packed (1, SLAB_DIM) small-parameter slab.
# All offsets are multiples of 128, so in-kernel slices are lane-aligned.
_B1_OFF = 0
_B2_OFF = _B1_OFF + H1          # 128
_G2_OFF = _B2_OFF + H2          # 384
_BE2_OFF = _G2_OFF + H2         # 640
_B3_OFF = _BE2_OFF + H2         # 896
_G3_OFF = _B3_OFF + H3          # 1408
_BE3_OFF = _G3_OFF + H3         # 1920
_B4_OFF = _BE3_OFF + H3         # 2432
_G4_OFF = _B4_OFF + H4          # 3456
_BE4_OFF = _G4_OFF + H4         # 4480
_B5_OFF = _BE4_OFF + H4         # 5504
SLAB_DIM = _B5_OFF + OUT_PAD    # 6400


def _leaky_relu(x):
    return jnp.where(x > 0, x, NEG_SLOPE * x)


def _batchnorm_train(x, gamma, beta):
    # PyTorch BatchNorm1d (training): biased variance over the batch dim.
    mean = jnp.mean(x, axis=0, keepdims=True)
    var = jnp.mean((x - mean) * (x - mean), axis=0, keepdims=True)
    return (x - mean) * jax.lax.rsqrt(var + BN_EPS) * gamma + beta


def _mxu(a_f32, w_bf16):
    # bf16 x bf16 matmul with f32 accumulation on the MXU.
    return jnp.dot(a_f32.astype(jnp.bfloat16), w_bf16,
                   preferred_element_type=jnp.float32)


def generator_kernel(z_ref, w1_ref, w2_ref, w3_ref, w4_hbm, w5_hbm, slab_ref,
                     out_ref, w4_vmem, w5_vmem, dma_sem):
    # Start the two large weight DMAs immediately; they overlap with the
    # layer-1..3 matmuls and the small-parameter reads.
    cp4 = pltpu.make_async_copy(w4_hbm, w4_vmem, dma_sem.at[0])
    cp5 = pltpu.make_async_copy(w5_hbm, w5_vmem, dma_sem.at[1])
    cp4.start()
    cp5.start()

    # Static, lane-aligned views into the packed small-parameter slab (f32).
    b1 = slab_ref[:, _B1_OFF:_B1_OFF + H1]
    b2 = slab_ref[:, _B2_OFF:_B2_OFF + H2]
    g2 = slab_ref[:, _G2_OFF:_G2_OFF + H2]
    be2 = slab_ref[:, _BE2_OFF:_BE2_OFF + H2]
    b3 = slab_ref[:, _B3_OFF:_B3_OFF + H3]
    g3 = slab_ref[:, _G3_OFF:_G3_OFF + H3]
    be3 = slab_ref[:, _BE3_OFF:_BE3_OFF + H3]
    b4 = slab_ref[:, _B4_OFF:_B4_OFF + H4]
    g4 = slab_ref[:, _G4_OFF:_G4_OFF + H4]
    be4 = slab_ref[:, _BE4_OFF:_BE4_OFF + H4]
    b5 = slab_ref[:, _B5_OFF:_B5_OFF + OUT_PAD]

    x = z_ref[...]

    # Layer 1: Linear(100 -> 128) + LeakyReLU
    h = _leaky_relu(_mxu(x, w1_ref[...]) + b1)

    # Layer 2: Linear(128 -> 256) + BatchNorm1d + LeakyReLU
    h = _leaky_relu(_batchnorm_train(_mxu(h, w2_ref[...]) + b2, g2, be2))

    # Layer 3: Linear(256 -> 512) + BatchNorm1d + LeakyReLU
    h = _leaky_relu(_batchnorm_train(_mxu(h, w3_ref[...]) + b3, g3, be3))

    # Layer 4: Linear(512 -> 1024) + BatchNorm1d + LeakyReLU
    cp4.wait()
    h = _leaky_relu(_batchnorm_train(_mxu(h, w4_vmem[...]) + b4, g4, be4))

    # Layer 5: Linear(1024 -> 896[padded 784]) + Tanh (padded cols are zero)
    cp5.wait()
    out_ref[...] = jnp.tanh(_mxu(h, w5_vmem[...]) + b5)


@jax.jit
def generator_forward(z, kparams):
    """z: (B, LATENT_DIM) f32, kparams from pack_params() -> (B, 1, 28, 28) f32."""
    B = z.shape[0]
    w1, w2, w3, w4, w5p, slab = kparams

    vmem = pl.BlockSpec(memory_space=pltpu.MemorySpace.VMEM)
    hbm = pl.BlockSpec(memory_space=pl.ANY)

    weight_elems = LATENT_DIM * H1 + H1 * H2 + H2 * H3 + H3 * H4 + H4 * OUT_PAD
    cost = pl.CostEstimate(
        flops=2 * B * weight_elems,
        transcendentals=B * OUT_PAD + (H2 + H3 + H4),
        bytes_accessed=2 * weight_elems            # bf16 weights
        + 4 * SLAB_DIM + 4 * B * LATENT_DIM + 4 * B * OUT_PAD,
    )

    out = pl.pallas_call(
        generator_kernel,
        out_shape=jax.ShapeDtypeStruct((B, OUT_PAD), jnp.float32),
        in_specs=[vmem, vmem, vmem, vmem, hbm, hbm, vmem],
        out_specs=vmem,
        scratch_shapes=[
            pltpu.VMEM((H3, H4), jnp.bfloat16),        # landing buffer for w4
            pltpu.VMEM((H4, OUT_PAD), jnp.bfloat16),   # landing buffer for w5
            pltpu.SemaphoreType.DMA((2,)),
        ],
        compiler_params=pltpu.CompilerParams(
            vmem_limit_bytes=32 << 20,                 # fits v7x 64 MiB physical VMEM
        ),
        cost_estimate=cost,
    )(z, w1, w2, w3, w4, w5p, slab)

    return out[:, :OUT_DIM].reshape(B, 1, 28, 28)


def init_params(key):
    """Deterministic init; Linear weights stored (in, out) for x @ W, cast to bf16."""
    ks = jax.random.split(key, 10)

    def linear(kw, kb, fan_in, fan_out):
        # PyTorch-style uniform(-1/sqrt(fan_in), 1/sqrt(fan_in))
        bound = 1.0 / jnp.sqrt(fan_in)
        w = jax.random.uniform(kw, (fan_in, fan_out), jnp.float32, -bound, bound)
        b = jax.random.uniform(kb, (1, fan_out), jnp.float32, -bound, bound)
        return w.astype(jnp.bfloat16), b

    w1, b1 = linear(ks[0], ks[1], LATENT_DIM, H1)
    w2, b2 = linear(ks[2], ks[3], H1, H2)
    w3, b3 = linear(ks[4], ks[5], H2, H3)
    w4, b4 = linear(ks[6], ks[7], H3, H4)
    w5, b5 = linear(ks[8], ks[9], H4, OUT_DIM)

    return dict(
        w1=w1, b1=b1,
        w2=w2, b2=b2, g2=jnp.ones((1, H2), jnp.float32), be2=jnp.zeros((1, H2), jnp.float32),
        w3=w3, b3=b3, g3=jnp.ones((1, H3), jnp.float32), be3=jnp.zeros((1, H3), jnp.float32),
        w4=w4, b4=b4, g4=jnp.ones((1, H4), jnp.float32), be4=jnp.zeros((1, H4), jnp.float32),
        w5=w5, b5=b5,
    )


def pack_params(p):
    """Pack params into the kernel layout: bf16 weights (w5 lane-padded) + one f32 slab."""
    slab = jnp.concatenate(
        [p["b1"], p["b2"], p["g2"], p["be2"],
         p["b3"], p["g3"], p["be3"],
         p["b4"], p["g4"], p["be4"],
         jnp.pad(p["b5"], ((0, 0), (0, OUT_PAD - OUT_DIM)))],
        axis=1).astype(jnp.float32)
    assert slab.shape == (1, SLAB_DIM), slab.shape
    w5p = jnp.pad(p["w5"], ((0, 0), (0, OUT_PAD - OUT_DIM)))  # zero cols -> tanh(0)=0, sliced off
    return (p["w1"], p["w2"], p["w3"], p["w4"], w5p, slab)


def generator_reference(z, p):
    """Pure-JAX reference with identical numerics (bf16 weights, f32 accumulation)."""
    h = _leaky_relu(_mxu(z, p["w1"]) + p["b1"])
    h = _leaky_relu(_batchnorm_train(_mxu(h, p["w2"]) + p["b2"], p["g2"], p["be2"]))
    h = _leaky_relu(_batchnorm_train(_mxu(h, p["w3"]) + p["b3"], p["g3"], p["be3"]))
    h = _leaky_relu(_batchnorm_train(_mxu(h, p["w4"]) + p["b4"], p["g4"], p["be4"]))
    h = jnp.tanh(_mxu(h, p["w5"]) + p["b5"])
    return h.reshape(z.shape[0], 1, 28, 28)


if __name__ == "__main__":
    key = jax.random.PRNGKey(0)
    k_params, k_z = jax.random.split(key)

    params = init_params(k_params)
    kparams = pack_params(params)

    B = 8  # small batch; >1 required for meaningful BatchNorm batch statistics
    z = jax.random.normal(k_z, (B, LATENT_DIM), dtype=jnp.float32)

    img = generator_forward(z, kparams)
    img = jax.block_until_ready(img)

    assert img.shape == (B, 1, 28, 28), img.shape
    ref = generator_reference(z, params)
    assert jnp.allclose(img, ref, atol=1e-3, rtol=1e-3), "mismatch vs JAX reference"

    print("KERNEL_OK")
</pallas_src>

<mosaic_0001>
module attributes {stable_mosaic.version = 11 : i64} {
  func.func @generator_kernel(%arg0: memref<8x100xf32, #tpu.memory_space<vmem>>, %arg1: memref<100x128xbf16, #tpu.memory_space<vmem>>, %arg2: memref<128x256xbf16, #tpu.memory_space<vmem>>, %arg3: memref<256x512xbf16, #tpu.memory_space<vmem>>, %arg4: memref<512x1024xbf16, #tpu.memory_space<any>>, %arg5: memref<1024x896xbf16, #tpu.memory_space<any>>, %arg6: memref<1x6400xf32, #tpu.memory_space<vmem>>, %arg7: memref<8x896xf32, #tpu.memory_space<vmem>>, %arg8: memref<512x1024xbf16, #tpu.memory_space<vmem>>, %arg9: memref<1024x896xbf16, #tpu.memory_space<vmem>>, %arg10: memref<2x!tpu.dma_semaphore, #tpu.memory_space<semaphore_mem>>) attributes {dimension_semantics = [], scalar_prefetch = 0 : i64, scratch_operands = 3 : i64, tpu.core_type = #tpu.core_type<tc>} {
    %c0_i32 = arith.constant 0 : i32
    %0 = tpu.memref_slice %arg10[%c0_i32] : memref<2x!tpu.dma_semaphore, #tpu.memory_space<semaphore_mem>> -> memref<1x!tpu.dma_semaphore, #tpu.memory_space<semaphore_mem>>
    %1 = tpu.memref_squeeze %0 : memref<1x!tpu.dma_semaphore, #tpu.memory_space<semaphore_mem>> -> memref<!tpu.dma_semaphore, #tpu.memory_space<semaphore_mem>>
    tpu.enqueue_dma source(%arg4 : memref<512x1024xbf16, #tpu.memory_space<any>>) target(%arg8 : memref<512x1024xbf16, #tpu.memory_space<vmem>>) target_semaphore(%1 : memref<!tpu.dma_semaphore, #tpu.memory_space<semaphore_mem>>)
    %c1_i32 = arith.constant 1 : i32
    %2 = tpu.memref_slice %arg10[%c1_i32] : memref<2x!tpu.dma_semaphore, #tpu.memory_space<semaphore_mem>> -> memref<1x!tpu.dma_semaphore, #tpu.memory_space<semaphore_mem>>
    %3 = tpu.memref_squeeze %2 : memref<1x!tpu.dma_semaphore, #tpu.memory_space<semaphore_mem>> -> memref<!tpu.dma_semaphore, #tpu.memory_space<semaphore_mem>>
    tpu.enqueue_dma source(%arg5 : memref<1024x896xbf16, #tpu.memory_space<any>>) target(%arg9 : memref<1024x896xbf16, #tpu.memory_space<vmem>>) target_semaphore(%3 : memref<!tpu.dma_semaphore, #tpu.memory_space<semaphore_mem>>)
    %c0 = arith.constant 0 : index
    %c0_0 = arith.constant 0 : index
    %4 = vector.load %arg6[%c0, %c0_0] : memref<1x6400xf32, #tpu.memory_space<vmem>>, vector<1x128xf32>
    %c0_1 = arith.constant 0 : index
    %c128 = arith.constant 128 : index
    %5 = vector.load %arg6[%c0_1, %c128] : memref<1x6400xf32, #tpu.memory_space<vmem>>, vector<1x256xf32>
    %c0_2 = arith.constant 0 : index
    %c384 = arith.constant 384 : index
    %6 = vector.load %arg6[%c0_2, %c384] : memref<1x6400xf32, #tpu.memory_space<vmem>>, vector<1x256xf32>
    %c0_3 = arith.constant 0 : index
    %c640 = arith.constant 640 : index
    %7 = vector.load %arg6[%c0_3, %c640] : memref<1x6400xf32, #tpu.memory_space<vmem>>, vector<1x256xf32>
    %c0_4 = arith.constant 0 : index
    %c896 = arith.constant 896 : index
    %8 = vector.load %arg6[%c0_4, %c896] : memref<1x6400xf32, #tpu.memory_space<vmem>>, vector<1x512xf32>
    %c0_5 = arith.constant 0 : index
    %c1408 = arith.constant 1408 : index
    %9 = vector.load %arg6[%c0_5, %c1408] : memref<1x6400xf32, #tpu.memory_space<vmem>>, vector<1x512xf32>
    %c0_6 = arith.constant 0 : index
    %c1920 = arith.constant 1920 : index
    %10 = vector.load %arg6[%c0_6, %c1920] : memref<1x6400xf32, #tpu.memory_space<vmem>>, vector<1x512xf32>
    %c0_7 = arith.constant 0 : index
    %c2432 = arith.constant 2432 : index
    %11 = vector.load %arg6[%c0_7, %c2432] : memref<1x6400xf32, #tpu.memory_space<vmem>>, vector<1x1024xf32>
    %c0_8 = arith.constant 0 : index
    %c3456 = arith.constant 3456 : index
    %12 = vector.load %arg6[%c0_8, %c3456] : memref<1x6400xf32, #tpu.memory_space<vmem>>, vector<1x1024xf32>
    %c0_9 = arith.constant 0 : index
    %c4480 = arith.constant 4480 : index
    %13 = vector.load %arg6[%c0_9, %c4480] : memref<1x6400xf32, #tpu.memory_space<vmem>>, vector<1x1024xf32>
    %c0_10 = arith.constant 0 : index
    %c5504 = arith.constant 5504 : index
    %14 = vector.load %arg6[%c0_10, %c5504] : memref<1x6400xf32, #tpu.memory_space<vmem>>, vector<1x896xf32>
    %c0_11 = arith.constant 0 : index
    %c0_12 = arith.constant 0 : index
    %15 = vector.load %arg0[%c0_11, %c0_12] : memref<8x100xf32, #tpu.memory_space<vmem>>, vector<8x100xf32>
    %c0_13 = arith.constant 0 : index
    %c0_14 = arith.constant 0 : index
    %16 = vector.load %arg1[%c0_13, %c0_14] : memref<100x128xbf16, #tpu.memory_space<vmem>>, vector<100x128xbf16>
    %17 = arith.truncf %15 : vector<8x100xf32> to vector<8x100xbf16>
    %cst = arith.constant dense<0.000000e+00> : vector<8x128xf32>
    %18 = tpu.matmul %17, %16, %cst {dimension_numbers = #tpu.dot_dimension_numbers<[1], [0], [0], [1], [0, 0, 1, 1], [], []>} : vector<8x100xbf16>, vector<100x128xbf16>, vector<8x128xf32> -> vector<8x128xf32>
    %19 = vector.broadcast %4 : vector<1x128xf32> to vector<8x128xf32>
    %20 = arith.addf %18, %19 : vector<8x128xf32>
    %cst_15 = arith.constant 0.000000e+00 : f32
    %21 = vector.broadcast %cst_15 : f32 to vector<8x128xf32>
    %22 = arith.cmpf ogt, %20, %21 : vector<8x128xf32>
    %cst_16 = arith.constant 2.000000e-01 : f32
    %23 = vector.broadcast %cst_16 : f32 to vector<8x128xf32>
    %24 = arith.mulf %23, %20 : vector<8x128xf32>
    %25 = arith.select %22, %20, %24 : vector<8x128xi1>, vector<8x128xf32>
    %c0_17 = arith.constant 0 : index
    %c0_18 = arith.constant 0 : index
    %26 = vector.load %arg2[%c0_17, %c0_18] : memref<128x256xbf16, #tpu.memory_space<vmem>>, vector<128x256xbf16>
    %27 = arith.truncf %25 : vector<8x128xf32> to vector<8x128xbf16>
    %cst_19 = arith.constant dense<0.000000e+00> : vector<8x256xf32>
    %28 = tpu.matmul %27, %26, %cst_19 {dimension_numbers = #tpu.dot_dimension_numbers<[1], [0], [0], [1], [0, 0, 1, 1], [], []>} : vector<8x128xbf16>, vector<128x256xbf16>, vector<8x256xf32> -> vector<8x256xf32>
    %29 = vector.broadcast %5 : vector<1x256xf32> to vector<8x256xf32>
    %30 = arith.addf %28, %29 : vector<8x256xf32>
    %cst_20 = arith.constant dense<0.000000e+00> : vector<256xf32>
    %31 = vector.multi_reduction <add>, %30, %cst_20 [0] : vector<8x256xf32> to vector<256xf32>
    %32 = vector.shape_cast %31 : vector<256xf32> to vector<1x256xf32>
    %cst_21 = arith.constant 8.000000e+00 : f32
    %33 = vector.broadcast %cst_21 : f32 to vector<1x256xf32>
    %34 = arith.divf %32, %33 : vector<1x256xf32>
    %35 = vector.broadcast %34 : vector<1x256xf32> to vector<8x256xf32>
    %36 = arith.subf %30, %35 : vector<8x256xf32>
    %37 = vector.broadcast %34 : vector<1x256xf32> to vector<8x256xf32>
    %38 = arith.subf %30, %37 : vector<8x256xf32>
    %39 = arith.mulf %36, %38 : vector<8x256xf32>
    %cst_22 = arith.constant dense<0.000000e+00> : vector<256xf32>
    %40 = vector.multi_reduction <add>, %39, %cst_22 [0] : vector<8x256xf32> to vector<256xf32>
    %41 = vector.shape_cast %40 : vector<256xf32> to vector<1x256xf32>
    %cst_23 = arith.constant 8.000000e+00 : f32
    %42 = vector.broadcast %cst_23 : f32 to vector<1x256xf32>
    %43 = arith.divf %41, %42 : vector<1x256xf32>
    %44 = vector.broadcast %34 : vector<1x256xf32> to vector<8x256xf32>
    %45 = arith.subf %30, %44 : vector<8x256xf32>
    %cst_24 = arith.constant 9.99999974E-6 : f32
    %46 = vector.broadcast %cst_24 : f32 to vector<1x256xf32>
    %47 = arith.addf %43, %46 : vector<1x256xf32>
    %48 = math.rsqrt %47 : vector<1x256xf32>
    %49 = vector.broadcast %48 : vector<1x256xf32> to vector<8x256xf32>
    %50 = arith.mulf %45, %49 : vector<8x256xf32>
    %51 = vector.broadcast %6 : vector<1x256xf32> to vector<8x256xf32>
    %52 = arith.mulf %50, %51 : vector<8x256xf32>
    %53 = vector.broadcast %7 : vector<1x256xf32> to vector<8x256xf32>
    %54 = arith.addf %52, %53 : vector<8x256xf32>
    %cst_25 = arith.constant 0.000000e+00 : f32
    %55 = vector.broadcast %cst_25 : f32 to vector<8x256xf32>
    %56 = arith.cmpf ogt, %54, %55 : vector<8x256xf32>
    %cst_26 = arith.constant 2.000000e-01 : f32
    %57 = vector.broadcast %cst_26 : f32 to vector<8x256xf32>
    %58 = arith.mulf %57, %54 : vector<8x256xf32>
    %59 = arith.select %56, %54, %58 : vector<8x256xi1>, vector<8x256xf32>
    %c0_27 = arith.constant 0 : index
    %c0_28 = arith.constant 0 : index
    %60 = vector.load %arg3[%c0_27, %c0_28] : memref<256x512xbf16, #tpu.memory_space<vmem>>, vector<256x512xbf16>
    %61 = arith.truncf %59 : vector<8x256xf32> to vector<8x256xbf16>
    %cst_29 = arith.constant dense<0.000000e+00> : vector<8x512xf32>
    %62 = tpu.matmul %61, %60, %cst_29 {dimension_numbers = #tpu.dot_dimension_numbers<[1], [0], [0], [1], [0, 0, 1, 1], [], []>} : vector<8x256xbf16>, vector<256x512xbf16>, vector<8x512xf32> -> vector<8x512xf32>
    %63 = vector.broadcast %8 : vector<1x512xf32> to vector<8x512xf32>
    %64 = arith.addf %62, %63 : vector<8x512xf32>
    %cst_30 = arith.constant dense<0.000000e+00> : vector<512xf32>
    %65 = vector.multi_reduction <add>, %64, %cst_30 [0] : vector<8x512xf32> to vector<512xf32>
    %66 = vector.shape_cast %65 : vector<512xf32> to vector<1x512xf32>
    %cst_31 = arith.constant 8.000000e+00 : f32
    %67 = vector.broadcast %cst_31 : f32 to vector<1x512xf32>
    %68 = arith.divf %66, %67 : vector<1x512xf32>
    %69 = vector.broadcast %68 : vector<1x512xf32> to vector<8x512xf32>
    %70 = arith.subf %64, %69 : vector<8x512xf32>
    %71 = vector.broadcast %68 : vector<1x512xf32> to vector<8x512xf32>
    %72 = arith.subf %64, %71 : vector<8x512xf32>
    %73 = arith.mulf %70, %72 : vector<8x512xf32>
    %cst_32 = arith.constant dense<0.000000e+00> : vector<512xf32>
    %74 = vector.multi_reduction <add>, %73, %cst_32 [0] : vector<8x512xf32> to vector<512xf32>
    %75 = vector.shape_cast %74 : vector<512xf32> to vector<1x512xf32>
    %cst_33 = arith.constant 8.000000e+00 : f32
    %76 = vector.broadcast %cst_33 : f32 to vector<1x512xf32>
    %77 = arith.divf %75, %76 : vector<1x512xf32>
    %78 = vector.broadcast %68 : vector<1x512xf32> to vector<8x512xf32>
    %79 = arith.subf %64, %78 : vector<8x512xf32>
    %cst_34 = arith.constant 9.99999974E-6 : f32
    %80 = vector.broadcast %cst_34 : f32 to vector<1x512xf32>
    %81 = arith.addf %77, %80 : vector<1x512xf32>
    %82 = math.rsqrt %81 : vector<1x512xf32>
    %83 = vector.broadcast %82 : vector<1x512xf32> to vector<8x512xf32>
    %84 = arith.mulf %79, %83 : vector<8x512xf32>
    %85 = vector.broadcast %9 : vector<1x512xf32> to vector<8x512xf32>
    %86 = arith.mulf %84, %85 : vector<8x512xf32>
    %87 = vector.broadcast %10 : vector<1x512xf32> to vector<8x512xf32>
    %88 = arith.addf %86, %87 : vector<8x512xf32>
    %cst_35 = arith.constant 0.000000e+00 : f32
    %89 = vector.broadcast %cst_35 : f32 to vector<8x512xf32>
    %90 = arith.cmpf ogt, %88, %89 : vector<8x512xf32>
    %cst_36 = arith.constant 2.000000e-01 : f32
    %91 = vector.broadcast %cst_36 : f32 to vector<8x512xf32>
    %92 = arith.mulf %91, %88 : vector<8x512xf32>
    %93 = arith.select %90, %88, %92 : vector<8x512xi1>, vector<8x512xf32>
    %c0_i32_37 = arith.constant 0 : i32
    %94 = tpu.memref_slice %arg10[%c0_i32_37] : memref<2x!tpu.dma_semaphore, #tpu.memory_space<semaphore_mem>> -> memref<1x!tpu.dma_semaphore, #tpu.memory_space<semaphore_mem>>
    %95 = tpu.memref_squeeze %94 : memref<1x!tpu.dma_semaphore, #tpu.memory_space<semaphore_mem>> -> memref<!tpu.dma_semaphore, #tpu.memory_space<semaphore_mem>>
    tpu.wait_dma2 semaphore(%95 : memref<!tpu.dma_semaphore, #tpu.memory_space<semaphore_mem>>) src(%arg4 : memref<512x1024xbf16, #tpu.memory_space<any>>) dst(%arg8 : memref<512x1024xbf16, #tpu.memory_space<vmem>>)
    %c0_38 = arith.constant 0 : index
    %c0_39 = arith.constant 0 : index
    %96 = vector.load %arg8[%c0_38, %c0_39] : memref<512x1024xbf16, #tpu.memory_space<vmem>>, vector<512x1024xbf16>
    %97 = arith.truncf %93 : vector<8x512xf32> to vector<8x512xbf16>
    %cst_40 = arith.constant dense<0.000000e+00> : vector<8x1024xf32>
    %98 = tpu.matmul %97, %96, %cst_40 {dimension_numbers = #tpu.dot_dimension_numbers<[1], [0], [0], [1], [0, 0, 1, 1], [], []>} : vector<8x512xbf16>, vector<512x1024xbf16>, vector<8x1024xf32> -> vector<8x1024xf32>
    %99 = vector.broadcast %11 : vector<1x1024xf32> to vector<8x1024xf32>
    %100 = arith.addf %98, %99 : vector<8x1024xf32>
    %cst_41 = arith.constant dense<0.000000e+00> : vector<1024xf32>
    %101 = vector.multi_reduction <add>, %100, %cst_41 [0] : vector<8x1024xf32> to vector<1024xf32>
    %102 = vector.shape_cast %101 : vector<1024xf32> to vector<1x1024xf32>
    %cst_42 = arith.constant 8.000000e+00 : f32
    %103 = vector.broadcast %cst_42 : f32 to vector<1x1024xf32>
    %104 = arith.divf %102, %103 : vector<1x1024xf32>
    %105 = vector.broadcast %104 : vector<1x1024xf32> to vector<8x1024xf32>
    %106 = arith.subf %100, %105 : vector<8x1024xf32>
    %107 = vector.broadcast %104 : vector<1x1024xf32> to vector<8x1024xf32>
    %108 = arith.subf %100, %107 : vector<8x1024xf32>
    %109 = arith.mulf %106, %108 : vector<8x1024xf32>
    %cst_43 = arith.constant dense<0.000000e+00> : vector<1024xf32>
    %110 = vector.multi_reduction <add>, %109, %cst_43 [0] : vector<8x1024xf32> to vector<1024xf32>
    %111 = vector.shape_cast %110 : vector<1024xf32> to vector<1x1024xf32>
    %cst_44 = arith.constant 8.000000e+00 : f32
    %112 = vector.broadcast %cst_44 : f32 to vector<1x1024xf32>
    %113 = arith.divf %111, %112 : vector<1x1024xf32>
    %114 = vector.broadcast %104 : vector<1x1024xf32> to vector<8x1024xf32>
    %115 = arith.subf %100, %114 : vector<8x1024xf32>
    %cst_45 = arith.constant 9.99999974E-6 : f32
    %116 = vector.broadcast %cst_45 : f32 to vector<1x1024xf32>
    %117 = arith.addf %113, %116 : vector<1x1024xf32>
    %118 = math.rsqrt %117 : vector<1x1024xf32>
    %119 = vector.broadcast %118 : vector<1x1024xf32> to vector<8x1024xf32>
    %120 = arith.mulf %115, %119 : vector<8x1024xf32>
    %121 = vector.broadcast %12 : vector<1x1024xf32> to vector<8x1024xf32>
    %122 = arith.mulf %120, %121 : vector<8x1024xf32>
    %123 = vector.broadcast %13 : vector<1x1024xf32> to vector<8x1024xf32>
    %124 = arith.addf %122, %123 : vector<8x1024xf32>
    %cst_46 = arith.constant 0.000000e+00 : f32
    %125 = vector.broadcast %cst_46 : f32 to vector<8x1024xf32>
    %126 = arith.cmpf ogt, %124, %125 : vector<8x1024xf32>
    %cst_47 = arith.constant 2.000000e-01 : f32
    %127 = vector.broadcast %cst_47 : f32 to vector<8x1024xf32>
    %128 = arith.mulf %127, %124 : vector<8x1024xf32>
    %129 = arith.select %126, %124, %128 : vector<8x1024xi1>, vector<8x1024xf32>
    %c1_i32_48 = arith.constant 1 : i32
    %130 = tpu.memref_slice %arg10[%c1_i32_48] : memref<2x!tpu.dma_semaphore, #tpu.memory_space<semaphore_mem>> -> memref<1x!tpu.dma_semaphore, #tpu.memory_space<semaphore_mem>>
    %131 = tpu.memref_squeeze %130 : memref<1x!tpu.dma_semaphore, #tpu.memory_space<semaphore_mem>> -> memref<!tpu.dma_semaphore, #tpu.memory_space<semaphore_mem>>
    tpu.wait_dma2 semaphore(%131 : memref<!tpu.dma_semaphore, #tpu.memory_space<semaphore_mem>>) src(%arg5 : memref<1024x896xbf16, #tpu.memory_space<any>>) dst(%arg9 : memref<1024x896xbf16, #tpu.memory_space<vmem>>)
    %c0_49 = arith.constant 0 : index
    %c0_50 = arith.constant 0 : index
    %132 = vector.load %arg9[%c0_49, %c0_50] : memref<1024x896xbf16, #tpu.memory_space<vmem>>, vector<1024x896xbf16>
    %133 = arith.truncf %129 : vector<8x1024xf32> to vector<8x1024xbf16>
    %cst_51 = arith.constant dense<0.000000e+00> : vector<8x896xf32>
    %134 = tpu.matmul %133, %132, %cst_51 {dimension_numbers = #tpu.dot_dimension_numbers<[1], [0], [0], [1], [0, 0, 1, 1], [], []>} : vector<8x1024xbf16>, vector<1024x896xbf16>, vector<8x896xf32> -> vector<8x896xf32>
    %135 = vector.broadcast %14 : vector<1x896xf32> to vector<8x896xf32>
    %136 = arith.addf %134, %135 : vector<8x896xf32>
    %137 = math.tanh %136 : vector<8x896xf32>
    %c0_52 = arith.constant 0 : index
    %c0_53 = arith.constant 0 : index
    %138 = vector.load %arg7[%c0_52, %c0_53] : memref<8x896xf32, #tpu.memory_space<vmem>>, vector<8x896xf32>
    tpu.vector_store %arg7[%c0_52, %c0_53], %137 {strides = array<i32>} : memref<8x896xf32, #tpu.memory_space<vmem>>, vector<8x896xf32>,
    return
  }
}

</mosaic_0001>

<bundles_post_ra>
// kernel: generator_forward.1
= control target key start
LH: loop header
LB: loop body
LE: loop exit
PB: predicated region body
PF: predicated region fallthrough
CT: control target
= control target key end

     0   :  { %12 = vsyncpa [#allocation6], 0  ;;  %s9048_s0 = inlined_call_operand.hbm [shape: f32[8,100], index: 0, kind: input, shape index: {}]   ;;  %s9049_s1 = inlined_call_operand.hbm [shape: bf16[100,128], index: 1, kind: input, shape index: {}]   ;;  %s9050_s2 = inlined_call_operand.hbm [shape: bf16[128,256], index: 2, kind: input, shape index: {}]   ;;  %s9051_s3 = inlined_call_operand.hbm [shape: bf16[256,512], index: 3, kind: input, shape index: {}]   ;;  %s9052_s4 = inlined_call_operand.hbm [shape: bf16[512,1024], index: 4, kind: input, shape index: {}]   ;;  %s9053_s5 = inlined_call_operand.hbm [shape: bf16[1024,896], index: 5, kind: input, shape index: {}]   ;;  %s9054_s6 = inlined_call_operand.hbm [shape: f32[1,6400], index: 6, kind: input, shape index: {}]   ;;  %s9055_s7 = inlined_call_operand.vmem [shape: f32[8,896], index: 7, kind: output, shape index: {}]  }
   0x1   :  { %13 = vsyncpa [#allocation8], 0 }
   0x2   :  { %14 = vsyncpa [#allocation11], 0  ;;  %s8700_s24 = smov [#allocation7]  }
   0x3   :  { %s30_s25 = sshll.u32 %s8700_s24, 4  ;;  %s31_s25 = int_to_ptr.vmem [resolvable:$true] %s30_s25 }
   0x4   :  { %s8558_s26 = scalar_lea.vmem %s31_s25, 832  ;;  %p8563_p1 = scmp.lt.s32.totalorder %s31_s25, %s31_s25 }
   0x5   :  { %p8559_p0 = scmp.ne.s32.totalorder %s31_s25, %s8558_s26  ;;  %p8564_p2 = scmp.lt.s32.totalorder %s8558_s26, %s8558_s26 }
   0x7   :  { %p8565_p3 = por %p8564_p2, %p8563_p1 }
   0x9   :  { %p8566_p4 = pnand %p8565_p3, %p8559_p0 }
   0xb   :  { %8569 = shalt.err (!%p8566_p4)
}
   0xc   :  { %s8701_s27 = smov 64   ;;  %s8702_s28 = smov 4  }
   0xd   :  { %36 = dma.hbm_to_vmem [thread:$0]  %s9049_s1, 832, %s31_s25, [#allocation8], %s8701_s27, %s8701_s27, %s8702_s28  }
   0xe   :  { %s8703_s8 = smov [#allocation10]  }
   0xf   :  { %s54_s9 = sshll.u32 %s8703_s8, 4  ;;  %s55_s9 = int_to_ptr.vmem [resolvable:$true] %s54_s9 }
  0x10   :  { %s8578_s10 = scalar_lea.vmem %s55_s9, 8192  ;;  %p8583_p6 = scmp.lt.s32.totalorder %s55_s9, %s55_s9 }
  0x11   :  { %p8579_p5 = scmp.ne.s32.totalorder %s55_s9, %s8578_s10  ;;  %p8584_p7 = scmp.lt.s32.totalorder %s8578_s10, %s8578_s10 }
  0x13   :  { %p8585_p8 = por %p8584_p7, %p8583_p6 }
  0x15   :  { %p8586_p9 = pnand %p8585_p8, %p8579_p5 }
  0x17   :  { %8589 = shalt.err (!%p8586_p9)
}
  0x18   :  { %s8704_s11 = smov 256   ;;  %s8705_s12 = smov 16  }
  0x19   :  { %60 = dma.hbm_to_vmem [thread:$0]  %s9051_s3, 8192, %s55_s9, [#allocation11], %s8704_s11, %s8704_s11, %s8705_s12  }
  0x1a   :  { %s8706_s15 = smov [#allocation5]   ;;  %s8707_s17 = smov [#allocation9]  }
  0x1b   :  { %s21_s16 = sshll.u32 %s8706_s15, 4  ;;  %s42_s1 = sshll.u32 %s8707_s17, 4  ;;  %s22_s16 = int_to_ptr.vmem [resolvable:$true] %s21_s16  ;;  %s43_s1 = int_to_ptr.vmem [resolvable:$true] %s42_s1 }
  0x1c   :  { %s8598_s18 = scalar_lea.vmem %s22_s16, 128  ;;  %p8603_p11 = scmp.lt.s32.totalorder %s22_s16, %s22_s16 }
  0x1d   :  { %p8599_p10 = scmp.ne.s32.totalorder %s22_s16, %s8598_s18  ;;  %p8604_p12 = scmp.lt.s32.totalorder %s8598_s18, %s8598_s18 }
  0x1f   :  { %p8605_p13 = por %p8604_p12, %p8603_p11 }
  0x21   :  { %p8606_p0 = pnand %p8605_p13, %p8599_p10 }
  0x23   :  { %8609 = shalt.err (!%p8606_p0)
}
  0x24   :  { %24 = dma.hbm_to_vmem [thread:$0]  %s9048_s0, 128, %s22_s16, [#allocation6]  }
  0x25   :  { %s8618_s21 = scalar_lea.vmem %s43_s1, 2048  ;;  %p8623_p2 = scmp.lt.s32.totalorder %s43_s1, %s43_s1 }
  0x26   :  { %p8619_p1 = scmp.ne.s32.totalorder %s43_s1, %s8618_s21  ;;  %p8624_p3 = scmp.lt.s32.totalorder %s8618_s21, %s8618_s21 }
  0x28   :  { %p8625_p4 = por %p8624_p3, %p8623_p2 }
  0x2a   :  { %p8626_p5 = pnand %p8625_p4, %p8619_p1 }
  0x2c   :  { %8629 = shalt.err (!%p8626_p5)
}
  0x2d   :  { %s8708_s3 = smov 128   ;;  %s8709_s22 = smov 8  }
  0x2e   :  { %48 = dma.hbm_to_vmem [thread:$0]  %s9050_s2, 2048, %s43_s1, [#allocation8], %s8708_s3, %s8708_s3, %s8709_s22  }
  0x2f   :  { %s8710_s25 = smov [#allocation12]  }
  0x30   :  { %s67_s26 = sshll.u32 %s8710_s25, 4  ;;  %s68_s26 = int_to_ptr.vmem [resolvable:$true] %s67_s26 }
  0x31   :  { %s8638_s27 = scalar_lea.vmem %s68_s26, 800  ;;  %p8643_p7 = scmp.lt.s32.totalorder %s68_s26, %s68_s26 }
  0x32   :  { %p8639_p6 = scmp.ne.s32.totalorder %s68_s26, %s8638_s27  ;;  %p8644_p8 = scmp.lt.s32.totalorder %s8638_s27, %s8638_s27 }
  0x34   :  { %p8645_p9 = por %p8644_p8, %p8643_p7 }
  0x36   :  { %p8646_p10 = pnand %p8645_p9, %p8639_p6 }
  0x38   :  { %8649 = shalt.err (!%p8646_p10)
}
  0x39   :  { %70 = dma.hbm_to_vmem [thread:$0]  %s9054_s6, 800, %s68_s26, [#allocation11]  }
  0x3a   :  { %8690 = dma.done.wait [#allocation6], 128  }
  0x3b   :  { %8691 = vsyncadd [#allocation6], 4294967168 }
  0x3c   :  { %8692 = dma.done.wait [#allocation8], 2880  }
  0x3d   :  { %8693 = vsyncadd [#allocation8], 4294964416 }
  0x3e   :  { %8694 = dma.done.wait [#allocation11], 8992  }
  0x3f   :  { %8695 = vsyncadd [#allocation11], 4294958304  ;;  %v8711_v0 = vmov 0.0   ;;  %vm8712_vm0 = vmmov 0   ;;  %v8771_v1 = vld [vmem:[#allocation12 + $0x13] sm:$0xff]  ;;  %v8773_v2 = vld [vmem:[#allocation12 + $0x1b] sm:$0xff] }
  0x40   :  { %7707 = vmatprep.subr.bf16.mxu0 %v8711_v0  ;;  %7721 = vmatprep.mubr.msk.bf16.mxu0 %vm8712_vm0, %v8711_v0  ;;  %v8775_v3 = vld [vmem:[#allocation12 + $0x23] sm:$0xff]  ;;  %vm185_vm1 = vcmask 1041408   ;;  %v8777_v4 = vld [vmem:[#allocation12 + $0x2b] sm:$0xff]  ;;  %v7741_v5 = vld [vmem:[#allocation7 + $0x30] ss:$0 sps:$4 sm:$0x33]  }
  0x41   :  { %v187_v6 = vsel %vm185_vm1, %v7741_v5, 0  ;;  %v7742_v7 = vld [vmem:[#allocation7 + $0x28] sm:$0xff]   ;;  %v7743_v8 = vld [vmem:[#allocation7 + $0x20] sm:$0xff]   ;;  %v7744_v12 = vld [vmem:[#allocation7 + $0x18] sm:$0xff]   ;;  %vm181_vm2 = vcmask 818176   ;;  %v8713_v31 = vmov 0  }
  0x42   :  { %7708 = vmatpush3.bf16.msra.mxu0 %v187_v6  ;;  %v7748_v9 = vld [vmem:[#allocation9 + $0x74] ss:$8 sps:$4 sm:$0xff]   ;;  %v7750_v10 = vld [vmem:[#allocation9 + $0x70] ss:$8 sps:$4 sm:$0xff]   ;;  %v7751_v11 = vld [vmem:[#allocation9 + $0x64] ss:$8 sps:$4 sm:$0xff]   ;;  %372 = vmatprep.mubr.bf16.mxu1 %v8713_v31 }
  0x43   :  { %7709 = vmatprep.subr.bf16.mxu0 %v8711_v0  ;;  %340 = vmatprep.subr.bf16.mxu1 %v7748_v9  ;;  %v7753_v13 = vld [vmem:[#allocation9 + $0x60] ss:$8 sps:$4 sm:$0xff]   ;;  %v7754_v14 = vld [vmem:[#allocation9 + $0x54] ss:$8 sps:$4 sm:$0xff]   ;;  %v7756_v16 = vld [vmem:[#allocation9 + $0x50] ss:$8 sps:$4 sm:$0xff]  }
  0x44   :  { %341 = vmatpush1.bf16.msra.mxu1 %v7750_v10  ;;  %v7745_v15 = vld [vmem:[#allocation7 + $0x10] sm:$0xff]   ;;  %v7757_v17 = vld [vmem:[#allocation9 + $0x44] ss:$8 sps:$4 sm:$0xff]   ;;  %v7746_v18 = vld [vmem:[#allocation7 + $0x8] sm:$0xff]   ;;  %s8714_s2 = smov [#allocation2]   ;;  %s8715_s29 = smov [#allocation3]  }
  0x45   :  { %342 = vmatprep.subr.bf16.mxu1 %v7751_v11  ;;  %v7759_v19 = vld [vmem:[#allocation9 + $0x40] ss:$8 sps:$4 sm:$0xff]   ;;  %v7760_v20 = vld [vmem:[#allocation9 + $0x34] ss:$8 sps:$4 sm:$0xff]   ;;  %v7747_v21 = vld [vmem:[#allocation7] sm:$0xff]   ;;  %s94_s6 = sshll.u32 %s8714_s2, 4  ;;  %s95_s6 = int_to_ptr.vmem [resolvable:$true] %s94_s6 }
  0x46   :  { %7710 = vmatpush3.bf16.msra.mxu0 %v7742_v7  ;;  %v121_v22 = vld [vmem:[#allocation5] sm:$0xff]  ;;  %v7762_v23 = vld [vmem:[#allocation9 + $0x30] ss:$8 sps:$4 sm:$0xff]   ;;  %v7766_v27 = vld [vmem:[#allocation9 + $0x14] ss:$8 sps:$4 sm:$0xff]   ;;  %s106_s30 = sshll.u32 %s8715_s29, 4  ;;  %p8663_p12 = scmp.lt.s32.totalorder %s95_s6, %s95_s6  ;;  %s107_s30 = int_to_ptr.vmem [resolvable:$true] %s106_s30 }
  0x47   :  { %7711 = vmatprep.subr.bf16.mxu0 %v8711_v0  ;;  %v7763_v24 = vld [vmem:[#allocation9 + $0x24] ss:$8 sps:$4 sm:$0xff]   ;;  %v7765_v25 = vld [vmem:[#allocation9 + $0x20] ss:$8 sps:$4 sm:$0xff]   ;;  %v135_v26 = vpack.c.bf16 %v121_v22, %v121_v22  ;;  %v7768_v28 = vld [vmem:[#allocation9 + $0x10] ss:$8 sps:$4 sm:$0xff]  }
  0x48   :  { %343 = vmatpush1.bf16.msra.mxu1 %v7753_v13  ;;  %v7769_v29 = vld [vmem:[#allocation9 + $0x4] ss:$8 sps:$4 sm:$0xff]   ;;  %v7771_v30 = vld [vmem:[#allocation9] ss:$8 sps:$4 sm:$0xff]   ;;  %s8658_s8 = scalar_lea.vmem %s95_s6, 32768 }
  0x49   :  { %344 = vmatprep.subr.bf16.mxu1 %v7754_v14  ;;  %v6816_v32 = vld [vmem:[#allocation12] ss:$0 sm:$0xff]  ;;  %v7774_v41 = vld [vmem:[#allocation10 + $0xe4] ss:$16 sps:$4 sm:$0xff]   ;;  %v7777_v42 = vld [vmem:[#allocation10 + $0xec] ss:$16 sps:$4 sm:$0xff]   ;;  %p8659_p11 = scmp.ne.s32.totalorder %s95_s6, %s8658_s8  ;;  %p8664_p13 = scmp.lt.s32.totalorder %s8658_s8, %s8658_s8 }
  0x4a   :  { %7712 = vmatpush3.bf16.msra.mxu0 %v7743_v8  ;;  %v7772_v43 = vld [vmem:[#allocation10 + $0xe0] ss:$16 sps:$4 sm:$0xff]   ;;  %v7775_v44 = vld [vmem:[#allocation10 + $0xe8] ss:$16 sps:$4 sm:$0xff]   ;;  %v7780_v45 = vld [vmem:[#allocation10 + $0xc4] ss:$16 sps:$4 sm:$0xff]  }
  0x4b   :  { %7713 = vmatprep.subr.bf16.mxu0 %v8711_v0  ;;  %v7783_v46 = vld [vmem:[#allocation10 + $0xcc] ss:$16 sps:$4 sm:$0xff]   ;;  %v7778_v47 = vld [vmem:[#allocation10 + $0xc0] ss:$16 sps:$4 sm:$0xff]   ;;  %v7781_v48 = vld [vmem:[#allocation10 + $0xc8] ss:$16 sps:$4 sm:$0xff]   ;;  %p8665_p0 = por %p8664_p13, %p8663_p12 }
  0x4c   :  { %345 = vmatpush1.bf16.msra.mxu1 %v7756_v16  ;;  %v7786_v49 = vld [vmem:[#allocation10 + $0xa4] ss:$16 sps:$4 sm:$0xff]   ;;  %v7789_v50 = vld [vmem:[#allocation10 + $0xac] ss:$16 sps:$4 sm:$0xff]   ;;  %v7784_v51 = vld [vmem:[#allocation10 + $0xa0] ss:$16 sps:$4 sm:$0xff]  }
  0x4d   :  { %346 = vmatprep.subr.bf16.mxu1 %v7757_v17  ;;  %v7787_v52 = vld [vmem:[#allocation10 + $0xa8] ss:$16 sps:$4 sm:$0xff]   ;;  %v7792_v53 = vld [vmem:[#allocation10 + $0x84] ss:$16 sps:$4 sm:$0xff]   ;;  %v7795_v54 = vld [vmem:[#allocation10 + $0x8c] ss:$16 sps:$4 sm:$0xff]   ;;  %p8666_p1 = pnand %p8665_p0, %p8659_p11 }
  0x4e   :  { %7714 = vmatpush3.bf16.msra.mxu0 %v7744_v12  ;;  %v7790_v55 = vld [vmem:[#allocation10 + $0x80] ss:$16 sps:$4 sm:$0xff]   ;;  %v7793_v56 = vld [vmem:[#allocation10 + $0x88] ss:$16 sps:$4 sm:$0xff]   ;;  %v7798_v57 = vld [vmem:[#allocation10 + $0x64] ss:$16 sps:$4 sm:$0xff]  }
  0x4f   :  { %7715 = vmatprep.subr.bf16.mxu0 %v8711_v0  ;;  %v7801_v58 = vld [vmem:[#allocation10 + $0x6c] ss:$16 sps:$4 sm:$0xff]   ;;  %v7796_v59 = vld [vmem:[#allocation10 + $0x60] ss:$16 sps:$4 sm:$0xff]   ;;  %v7799_v60 = vld [vmem:[#allocation10 + $0x68] ss:$16 sps:$4 sm:$0xff]  }
  0x50   :  { %347 = vmatpush1.bf16.msra.mxu1 %v7759_v19  ;;  %v7804_v61 = vld [vmem:[#allocation10 + $0x44] ss:$16 sps:$4 sm:$0xff]   ;;  %v7807_v62 = vld [vmem:[#allocation10 + $0x4c] ss:$16 sps:$4 sm:$0xff]   ;;  %v7802_v63 = vld [vmem:[#allocation10 + $0x40] ss:$16 sps:$4 sm:$0xff]  }
  0x51   :  { %348 = vmatprep.subr.bf16.mxu1 %v7760_v20  ;;  %v7810_v5 = vld [vmem:[#allocation10 + $0x24] ss:$16 sps:$4 sm:$0xff]   ;;  %v7813_v6 = vld [vmem:[#allocation10 + $0x2c] ss:$16 sps:$4 sm:$0xff]   ;;  %v7808_v7 = vld [vmem:[#allocation10 + $0x20] ss:$16 sps:$4 sm:$0xff]  }
  0x52   :  { %7716 = vmatpush3.bf16.msra.mxu0 %v7745_v15  ;;  %v7811_v8 = vld [vmem:[#allocation10 + $0x28] ss:$16 sps:$4 sm:$0xff]   ;;  %v7816_v9 = vld [vmem:[#allocation10 + $0x4] ss:$16 sps:$4 sm:$0xff]   ;;  %v7819_v10 = vld [vmem:[#allocation10 + $0xc] ss:$16 sps:$4 sm:$0xff]  }
  0x53   :  { %7717 = vmatprep.subr.bf16.mxu0 %v8711_v0  ;;  %v7814_v11 = vld [vmem:[#allocation10] ss:$16 sps:$4 sm:$0xff]   ;;  %v7817_v12 = vld [vmem:[#allocation10 + $0x8] ss:$16 sps:$4 sm:$0xff]   ;;  %v7822_v13 = vld [vmem:[#allocation10 + $0x1e4] ss:$16 sps:$4 sm:$0xff]  }
  0x54   :  { %349 = vmatpush1.bf16.msra.mxu1 %v7762_v23  ;;  %v7825_v14 = vld [vmem:[#allocation10 + $0x1ec] ss:$16 sps:$4 sm:$0xff]   ;;  %v7820_v15 = vld [vmem:[#allocation10 + $0x1e0] ss:$16 sps:$4 sm:$0xff]   ;;  %v7823_v16 = vld [vmem:[#allocation10 + $0x1e8] ss:$16 sps:$4 sm:$0xff]  }
  0x55   :  { %350 = vmatprep.subr.bf16.mxu1 %v7763_v24  ;;  %v7828_v17 = vld [vmem:[#allocation10 + $0x1c4] ss:$16 sps:$4 sm:$0xff]   ;;  %v7826_v19 = vld [vmem:[#allocation10 + $0x1c0] ss:$16 sps:$4 sm:$0xff]   ;;  %v7829_v20 = vld [vmem:[#allocation10 + $0x1c8] ss:$16 sps:$4 sm:$0xff]  }
  0x56   :  { %7718 = vmatpush3.bf16.msra.mxu0 %v7746_v18  ;;  %v7831_v18 = vld [vmem:[#allocation10 + $0x1cc] ss:$16 sps:$4 sm:$0xff]   ;;  %v7832_v23 = vld [vmem:[#allocation10 + $0x1a0] ss:$16 sps:$4 sm:$0xff]   ;;  %v7835_v24 = vld [vmem:[#allocation10 + $0x1a8] ss:$16 sps:$4 sm:$0xff]  }
  0x57   :  { %7719 = vmatprep.subr.bf16.mxu0 %v8711_v0  ;;  %v7805_v0 = vld [vmem:[#allocation10 + $0x48] ss:$16 sps:$4 sm:$0xff]   ;;  %v7837_v22 = vld [vmem:[#allocation10 + $0x1ac] ss:$16 sps:$4 sm:$0xff]   ;;  %v7844_v31 = vld [vmem:[#allocation10 + $0x160] ss:$16 sps:$4 sm:$0xff]  }
  0x58   :  { %351 = vmatpush1.bf16.msra.mxu1 %v7765_v25  ;;  %v7840_v25 = vld [vmem:[#allocation10 + $0x184] ss:$16 sps:$4 sm:$0xff]  }
  0x59   :  { %352 = vmatprep.subr.bf16.mxu1 %v7766_v27  ;;  %v7838_v27 = vld [vmem:[#allocation10 + $0x180] ss:$16 sps:$4 sm:$0xff]  }
  0x5a   :  { %7720 = vmatpush3.bf16.msra.mxu0 %v7747_v21  ;;  %v7834_v21 = vld [vmem:[#allocation10 + $0x1a4] ss:$16 sps:$4 sm:$0xff]  }
  0x5b   :  { %859 = vmatprep.subr.bf16.mxu0 %v7774_v41  ;;  %v7864_v41 = vld [vmem:[#allocation10 + $0x104] ss:$16 sps:$4 sm:$0xff]  }
  0x5c   :  { %353 = vmatpush1.bf16.msra.mxu1 %v7768_v28  ;;  %v7841_v28 = vld [vmem:[#allocation10 + $0x188] ss:$16 sps:$4 sm:$0xff]  }
  0x5d   :  { %7722 = vmatmul.mubr.msk.bf16.vlgmr.msra.gmra.mxu0 %vm181_vm2, %v135_v26  ;;  %354 = vmatprep.subr.bf16.mxu1 %v7769_v29  ;;  %v7843_v26 = vld [vmem:[#allocation10 + $0x18c] ss:$16 sps:$4 sm:$0xff]   ;;  %v7846_v29 = vld [vmem:[#allocation10 + $0x164] ss:$16 sps:$4 sm:$0xff]  }
  0x5e   :  { %860 = vmatpush1.bf16.msra.mxu0 %v7772_v43  ;;  %v7862_v43 = vld [vmem:[#allocation10 + $0x100] ss:$16 sps:$4 sm:$0xff]  }
  0x5f   :  { %861 = vmatprep.subr.bf16.mxu0 %v7780_v45  ;;  %v250_v45 = vlaneseq }
  0x60   :  { %355 = vmatpush1.bf16.msra.mxu1 %v7771_v30  ;;  %v7849_v30 = vld [vmem:[#allocation10 + $0x16c] ss:$16 sps:$4 sm:$0xff]  }
  0x61   :  { %900 = vmatprep.subr.bf16.mxu1 %v7777_v42  ;;  %v7867_v42 = vld [vmem:[#allocation10 + $0x10c] ss:$16 sps:$4 sm:$0xff]  }
  0x62   :  { %862 = vmatpush1.bf16.msra.mxu0 %v7778_v47 }
  0x63   :  { %863 = vmatprep.subr.bf16.mxu0 %v7786_v49 }
  0x66   :  { %864 = vmatpush1.bf16.msra.mxu0 %v7784_v51 }
  0x67   :  { %865 = vmatprep.subr.bf16.mxu0 %v7792_v53 }
  0x6a   :  { %866 = vmatpush1.bf16.msra.mxu0 %v7790_v55 }
  0x6b   :  { %867 = vmatprep.subr.bf16.mxu0 %v7798_v57 }
  0x6e   :  { %868 = vmatpush1.bf16.msra.mxu0 %v7796_v59 }
  0x6f   :  { %869 = vmatprep.subr.bf16.mxu0 %v7804_v61 }
  0x72   :  { %870 = vmatpush1.bf16.msra.mxu0 %v7802_v63 }
  0x73   :  { %871 = vmatprep.subr.bf16.mxu0 %v7810_v5 }
  0x76   :  { %872 = vmatpush1.bf16.msra.mxu0 %v7808_v7 }
  0x77   :  { %873 = vmatprep.subr.bf16.mxu0 %v7816_v9 }
  0x7a   :  { %874 = vmatpush1.bf16.msra.mxu0 %v7814_v11 }
  0x7b   :  { %875 = vmatprep.subr.bf16.mxu0 %v7822_v13 }
  0x7e   :  { %876 = vmatpush2.bf16.msra.mxu0 %v7820_v15 }
  0x7f   :  { %877 = vmatprep.subr.bf16.mxu0 %v7828_v17 }
  0x82   :  { %878 = vmatpush2.bf16.msra.mxu0 %v7826_v19 }
  0x83   :  { %879 = vmatprep.subr.bf16.mxu0 %v7834_v21 }
  0x86   :  { %880 = vmatpush2.bf16.msra.mxu0 %v7832_v23 }
  0x87   :  { %881 = vmatprep.subr.bf16.mxu0 %v7840_v25 }
  0x8a   :  { %882 = vmatpush2.bf16.msra.mxu0 %v7838_v27 }
  0x8b   :  { %883 = vmatprep.subr.bf16.mxu0 %v7846_v29 }
  0x8e   :  { %884 = vmatpush2.bf16.msra.mxu0 %v7844_v31 }
 0x11d   :  { %v223_v33 = vpop.f32.mrf.mxu0 }
 0x11e   :  { %v224_v34 = vadd.f32 %v6816_v32, %v223_v33  ;;  %v7847_v32 = vld [vmem:[#allocation10 + $0x168] ss:$16 sps:$4 sm:$0xff]   ;;  %v7852_v33 = vld [vmem:[#allocation10 + $0x144] ss:$16 sps:$4 sm:$0xff]  }
 0x11f   :  { %v7723_v35 = vpop.f32.mrf.mxu0  ;;  %885 = vmatprep.subr.bf16.mxu0 %v7852_v33  ;;  %v113_v33 = vld [vmem:[#allocation12 + $0x5] sm:$0x3] }
 0x120   :  { %vm229_vm3 = vcmp.gt.f32.partialorder %v224_v34, 0.0  ;;  %v230_v36 = vmul.f32 0.2, %v224_v34  ;;  %v7850_v35 = vld [vmem:[#allocation10 + $0x140] ss:$16 sps:$4 sm:$0xff]  }
 0x121   :  { %v226_v37 = vpop.f32.mrf.mxu0  ;;  %886 = vmatpush2.bf16.msra.mxu0 %v7850_v35 }
 0x122   :  { %v231_v38 = vsel %vm229_vm3, %v224_v34, %v230_v36  ;;  %v7855_v34 = vld [vmem:[#allocation10 + $0x14c] ss:$16 sps:$4 sm:$0xff]   ;;  %v7853_v36 = vld [vmem:[#allocation10 + $0x148] ss:$16 sps:$4 sm:$0xff]   ;;  %v7856_v37 = vld [vmem:[#allocation10 + $0x120] ss:$16 sps:$4 sm:$0xff]  }
 0x123   :  { %v7724_v39 = vpop.f32.mrf.mxu0  ;;  %v248_v40 = vpack.c.bf16 %v231_v38, %v231_v38  ;;  %v7858_v38 = vld [vmem:[#allocation10 + $0x124] ss:$16 sps:$4 sm:$0xff]  }
 0x124   :  { %v7859_v39 = vld [vmem:[#allocation10 + $0x128] ss:$16 sps:$4 sm:$0xff]   ;;  %887 = vmatprep.subr.bf16.mxu0 %v7858_v38 }
 0x125   :  { %373 = vmatmul.mubr.bf16.vlgmr.msra.gmra.mxu1 %v248_v40  ;;  %v7861_v40 = vld [vmem:[#allocation10 + $0x12c] ss:$16 sps:$4 sm:$0xff]   ;;  %888 = vmatpush2.bf16.msra.mxu0 %v7856_v37 }
 0x126   :  { %901 = vmatpush1.bf16.msra.mxu1 %v7775_v44  ;;  %889 = vmatprep.subr.bf16.mxu0 %v7864_v41  ;;  %v7865_v44 = vld [vmem:[#allocation10 + $0x108] ss:$16 sps:$4 sm:$0xff]  }
 0x127   :  { %902 = vmatprep.subr.bf16.mxu1 %v7783_v46  ;;  %v8779_v46 = vshrl.u32 %v250_v45, 7 }
 0x129   :  { %890 = vmatpush2.bf16.msra.mxu0 %v7862_v43  ;;  %v8782_v47 = vsub.s32 0, %v8779_v46  ;;  %v8785_v49 = vsub.s32 1, %v8779_v46 }
 0x12a   :  { %903 = vmatpush1.bf16.msra.mxu1 %v7781_v48  ;;  %v111_v48 = vld [vmem:[#allocation12 + $0x1] sm:$0x3] }
 0x12b   :  { %904 = vmatprep.subr.bf16.mxu1 %v7789_v50  ;;  %v253_v50 = vrot.slane %v111_v48, %v8782_v47  ;;  %v257_v51 = vrot.slane %v111_v48, %v8785_v49  ;;  %v437_v37 = vrot.slane %v113_v33, %v8782_v47 }
 0x12e   :  { %905 = vmatpush1.bf16.msra.mxu1 %v7787_v52 }
 0x12f   :  { %906 = vmatprep.subr.bf16.mxu1 %v7795_v54 }
 0x132   :  { %907 = vmatpush1.bf16.msra.mxu1 %v7793_v56 }
 0x133   :  { %908 = vmatprep.subr.bf16.mxu1 %v7801_v58 }
 0x136   :  { %909 = vmatpush1.bf16.msra.mxu1 %v7799_v60 }
 0x137   :  { %910 = vmatprep.subr.bf16.mxu1 %v7807_v62 }
 0x13a   :  { %911 = vmatpush1.bf16.msra.mxu1 %v7805_v0 }
 0x13b   :  { %912 = vmatprep.subr.bf16.mxu1 %v7813_v6 }
 0x13e   :  { %913 = vmatpush1.bf16.msra.mxu1 %v7811_v8 }
 0x13f   :  { %914 = vmatprep.subr.bf16.mxu1 %v7819_v10 }
 0x142   :  { %915 = vmatpush1.bf16.msra.mxu1 %v7817_v12 }
 0x143   :  { %916 = vmatprep.subr.bf16.mxu1 %v7825_v14 }
 0x146   :  { %917 = vmatpush2.bf16.msra.mxu1 %v7823_v16 }
 0x147   :  { %918 = vmatprep.subr.bf16.mxu1 %v7831_v18 }
 0x14a   :  { %919 = vmatpush2.bf16.msra.mxu1 %v7829_v20 }
 0x14b   :  { %920 = vmatprep.subr.bf16.mxu1 %v7837_v22 }
 0x14e   :  { %921 = vmatpush2.bf16.msra.mxu1 %v7835_v24 }
 0x14f   :  { %922 = vmatprep.subr.bf16.mxu1 %v7843_v26 }
 0x152   :  { %923 = vmatpush2.bf16.msra.mxu1 %v7841_v28 }
 0x153   :  { %924 = vmatprep.subr.bf16.mxu1 %v7849_v30 }
 0x156   :  { %925 = vmatpush2.bf16.msra.mxu1 %v7847_v32  ;;  %v112_v32 = vld [vmem:[#allocation12 + $0x3] sm:$0x3] }
 0x157   :  { %926 = vmatprep.subr.bf16.mxu1 %v7855_v34  ;;  %v424_v34 = vrot.slane %v112_v32, %v8782_v47  ;;  %v428_v38 = vrot.slane %v112_v32, %v8785_v49 }
 0x15a   :  { %927 = vmatpush2.bf16.msra.mxu1 %v7853_v36 }
 0x15b   :  { %928 = vmatprep.subr.bf16.mxu1 %v7861_v40 }
 0x15e   :  { %929 = vmatpush2.bf16.msra.mxu1 %v7859_v39 }
 0x15f   :  { %930 = vmatprep.subr.bf16.mxu1 %v7867_v42  ;;  %v441_v42 = vrot.slane %v113_v33, %v8785_v49 }
 0x162   :  { %931 = vmatpush2.bf16.msra.mxu1 %v7865_v44 }
 0x1e5   :  { %v374_v52 = vpop.f32.mrf.mxu1 }
 0x1e6   :  { %v375_v53 = vadd.f32 %v374_v52, %v253_v50 }
 0x1e7   :  { %v376_v54 = vpop.f32.mrf.mxu1 }
 0x1e8   :  { %v381_v55 = vrot.slane %v375_v53, 4  ;;  %v377_v56 = vadd.f32 %v376_v54, %v257_v51 }
 0x1e9   :  { %v378_v57 = vpop.f32.mrf.mxu1 }
 0x1ea   :  { %v382_v58 = vadd.f32 %v381_v55, %v375_v53  ;;  %v387_v59 = vrot.slane %v377_v56, 4 }
 0x1eb   :  { %v379_v60 = vpop.f32.mrf.mxu1 }
 0x1ec   :  { %v383_v61 = vrot.slane %v382_v58, 2  ;;  %v388_v62 = vadd.f32 %v387_v59, %v377_v56 }
 0x1ee   :  { %v384_v63 = vadd.f32 %v383_v61, %v382_v58  ;;  %v389_v0 = vrot.slane %v388_v62, 2 }
 0x1f0   :  { %v385_v5 = vrot.slane %v384_v63, 1  ;;  %v390_v6 = vadd.f32 %v389_v0, %v388_v62 }
 0x1f2   :  { %v386_v7 = vadd.f32 %v385_v5, %v384_v63  ;;  %v391_v8 = vrot.slane %v390_v6, 1 }
 0x1f4   :  { %v394_v9 = vmul.f32 0.125, %v386_v7  ;;  %v392_v10 = vadd.f32 %v391_v8, %v390_v6 }
 0x1f6   :  { %v396_v11 = vsub.f32 %v375_v53, %v394_v9  ;;  %v395_v12 = vmul.f32 0.125, %v392_v10 }
 0x1f8   :  { %v398_v13 = vmul.f32 %v396_v11, %v396_v11  ;;  %v397_v14 = vsub.f32 %v377_v56, %v395_v12 }
 0x1fa   :  { %v400_v15 = vrot.slane %v398_v13, 4  ;;  %v399_v16 = vmul.f32 %v397_v14, %v397_v14 }
 0x1fc   :  { %v401_v17 = vadd.f32 %v400_v15, %v398_v13  ;;  %v406_v18 = vrot.slane %v399_v16, 4 }
 0x1fe   :  { %v402_v19 = vrot.slane %v401_v17, 2  ;;  %v407_v20 = vadd.f32 %v406_v18, %v399_v16 }
 0x200   :  { %v403_v21 = vadd.f32 %v402_v19, %v401_v17  ;;  %v408_v22 = vrot.slane %v407_v20, 2 }
 0x202   :  { %v404_v23 = vrot.slane %v403_v21, 1  ;;  %v409_v24 = vadd.f32 %v408_v22, %v407_v20 }
 0x204   :  { %v405_v25 = vadd.f32 %v404_v23, %v403_v21  ;;  %v410_v26 = vrot.slane %v409_v24, 1 }
 0x206   :  { %v412_v27 = vmul.f32 0.125, %v405_v25  ;;  %v411_v28 = vadd.f32 %v410_v26, %v409_v24 }
 0x208   :  { %v414_v29 = vadd.f32 1e-05, %v412_v27  ;;  %v413_v30 = vmul.f32 0.125, %v411_v28 }
 0x20a   :  { %7868 = vrsqrt.f32 %v414_v29  ;;  %v415_v31 = vadd.f32 1e-05, %v413_v30 }
 0x20c   :  { %7870 = vrsqrt.f32 %v415_v31 }
 0x217   :  { %v7869_v35 = vpop.eup %7868 }
 0x218   :  { %v418_v36 = vmul.f32 %v7869_v35, %v396_v11 }
 0x219   :  { %v7871_v39 = vpop.eup %7870 }
 0x21a   :  { %v431_v40 = vmul.f32 %v424_v34, %v418_v36  ;;  %v419_v41 = vmul.f32 %v7871_v39, %v397_v14 }
 0x21c   :  { %v444_v43 = vadd.f32 %v437_v37, %v431_v40  ;;  %v432_v44 = vmul.f32 %v428_v38, %v419_v41 }
 0x21e   :  { %v445_v45 = vadd.f32 %v441_v42, %v432_v44  ;;  %vm446_vm4 = vcmp.gt.f32.partialorder %v444_v43, 0.0  ;;  %v448_v48 = vmul.f32 0.2, %v444_v43 }
 0x220   :  { %vm447_vm5 = vcmp.gt.f32.partialorder %v445_v45, 0.0  ;;  %v449_v50 = vmul.f32 0.2, %v445_v45  ;;  %v450_v51 = vsel %vm446_vm4, %v444_v43, %v448_v48 }
 0x221   :  { %v516_v54 = vpack.c.bf16 %v450_v51, %v450_v51 }
 0x222   :  { %v451_v52 = vsel %vm447_vm5, %v445_v45, %v449_v50 }
 0x223   :  { %v517_v53 = vpack.c.bf16 %v451_v52, %v451_v52 }
 0x225   :  { %891 = vmatprep.mubr.bf16.mxu0 %v517_v53  ;;  %932 = vmatprep.mubr.bf16.mxu1 %v517_v53 }
 0x226   :  { %892 = vmatmul.mubr.bf16.vlgmr.msra.gmra.mxu0 %v516_v54  ;;  %933 = vmatmul.mubr.bf16.vlgmr.msra.gmra.mxu1 %v516_v54 }
 0x227   :  { %8669 = shalt.err (!%p8666_p1)  }
 0x228   :  { %97 = dma.hbm_to_vmem [thread:$0]  %s9052_s4, 32768, %s95_s6, [#allocation4] }
 0x229   :  { %s8678_s11 = scalar_lea.vmem %s107_s30, 57344  ;;  %p8683_p3 = scmp.lt.s32.totalorder %s107_s30, %s107_s30 }
 0x22a   :  { %p8679_p2 = scmp.ne.s32.totalorder %s107_s30, %s8678_s11  ;;  %p8684_p4 = scmp.lt.s32.totalorder %s8678_s11, %s8678_s11 }
 0x22c   :  { %p8685_p5 = por %p8684_p4, %p8683_p3 }
 0x22e   :  { %p8686_p6 = pnand %p8685_p5, %p8679_p2 }
 0x230   :  { %8689 = shalt.err (!%p8686_p6)  }
 0x231   :  { %109 = dma.hbm_to_vmem [thread:$0]  %s9053_s5, 57344, %s107_s30, [#allocation4 + $0x1]  ;;  %v8800_v55 = vsub.s32 2, %v8779_v46  ;;  %v114_v56 = vld [vmem:[#allocation12 + $0x7] sm:$0xf]  ;;  %v8803_v57 = vsub.s32 3, %v8779_v46 }
 0x232   :  { %v522_v58 = vrot.slane %v114_v56, %v8782_v47  ;;  %v526_v60 = vrot.slane %v114_v56, %v8785_v49 }
 0x233   :  { %v530_v59 = vrot.slane %v114_v56, %v8800_v55  ;;  %v534_v61 = vrot.slane %v114_v56, %v8803_v57 }
 0x2e6   :  { %v893_v62 = vpop.f32.mrf.mxu0  ;;  %v934_v63 = vpop.f32.mrf.mxu1 }
 0x2e7   :  { %v894_v0 = vadd.f32 %v893_v62, %v522_v58  ;;  %v935_v5 = vadd.f32 %v934_v63, %v530_v59 }
 0x2e8   :  { %v895_v6 = vpop.f32.mrf.mxu0  ;;  %v936_v7 = vpop.f32.mrf.mxu1 }
 0x2e9   :  { %v941_v8 = vrot.slane %v894_v0, 4  ;;  %v953_v9 = vrot.slane %v935_v5, 4  ;;  %v896_v10 = vadd.f32 %v895_v6, %v526_v60  ;;  %v937_v11 = vadd.f32 %v936_v7, %v534_v61 }
 0x2ea   :  { %v897_v12 = vpop.f32.mrf.mxu0  ;;  %v938_v13 = vpop.f32.mrf.mxu1 }
 0x2eb   :  { %v942_v14 = vadd.f32 %v941_v8, %v894_v0  ;;  %v954_v15 = vadd.f32 %v953_v9, %v935_v5  ;;  %v947_v16 = vrot.slane %v896_v10, 4  ;;  %v959_v17 = vrot.slane %v937_v11, 4 }
 0x2ec   :  { %v898_v18 = vpop.f32.mrf.mxu0  ;;  %v939_v19 = vpop.f32.mrf.mxu1 }
 0x2ed   :  { %v943_v20 = vrot.slane %v942_v14, 2  ;;  %v955_v21 = vrot.slane %v954_v15, 2  ;;  %v948_v22 = vadd.f32 %v947_v16, %v896_v10  ;;  %v960_v23 = vadd.f32 %v959_v17, %v937_v11 }
 0x2ef   :  { %v944_v24 = vadd.f32 %v943_v20, %v942_v14  ;;  %v956_v25 = vadd.f32 %v955_v21, %v954_v15  ;;  %v949_v26 = vrot.slane %v948_v22, 2  ;;  %v961_v27 = vrot.slane %v960_v23, 2 }
 0x2f1   :  { %v945_v28 = vrot.slane %v944_v24, 1  ;;  %v957_v29 = vrot.slane %v956_v25, 1  ;;  %v950_v30 = vadd.f32 %v949_v26, %v948_v22  ;;  %v962_v31 = vadd.f32 %v961_v27, %v960_v23  ;;  %v115_v27 = vld [vmem:[#allocation12 + $0xb] sm:$0xf] }
 0x2f3   :  { %v946_v32 = vadd.f32 %v945_v28, %v944_v24  ;;  %v958_v33 = vadd.f32 %v957_v29, %v956_v25  ;;  %v951_v34 = vrot.slane %v950_v30, 1  ;;  %v963_v35 = vrot.slane %v962_v31, 1  ;;  %v116_v28 = vld [vmem:[#allocation12 + $0xf] sm:$0xf] }
 0x2f4   :  { %v1021_v29 = vrot.slane %v115_v27, %v8782_v47 }
 0x2f5   :  { %v965_v36 = vmul.f32 0.125, %v946_v32  ;;  %v967_v37 = vmul.f32 0.125, %v958_v33  ;;  %v952_v38 = vadd.f32 %v951_v34, %v950_v30  ;;  %v964_v39 = vadd.f32 %v963_v35, %v962_v31 }
 0x2f6   :  { %v1029_v31 = vrot.slane %v115_v27, %v8800_v55  ;;  %v1046_v34 = vrot.slane %v116_v28, %v8782_v47  ;;  %v1025_v35 = vrot.slane %v115_v27, %v8785_v49 }
 0x2f7   :  { %v969_v40 = vsub.f32 %v894_v0, %v965_v36  ;;  %v971_v41 = vsub.f32 %v935_v5, %v967_v37  ;;  %v966_v42 = vmul.f32 0.125, %v952_v38  ;;  %v968_v43 = vmul.f32 0.125, %v964_v39 }
 0x2f8   :  { %v1054_v38 = vrot.slane %v116_v28, %v8800_v55  ;;  %v1033_v39 = vrot.slane %v115_v27, %v8803_v57 }
 0x2f9   :  { %v973_v44 = vmul.f32 %v969_v40, %v969_v40  ;;  %v975_v45 = vmul.f32 %v971_v41, %v971_v41  ;;  %v970_v48 = vsub.f32 %v896_v10, %v966_v42  ;;  %v972_v50 = vsub.f32 %v937_v11, %v968_v43 }
 0x2fb   :  { %v977_v51 = vrot.slane %v973_v44, 4  ;;  %v989_v52 = vrot.slane %v975_v45, 4  ;;  %v974_v53 = vmul.f32 %v970_v48, %v970_v48  ;;  %v976_v54 = vmul.f32 %v972_v50, %v972_v50 }
 0x2fd   :  { %v978_v56 = vadd.f32 %v977_v51, %v973_v44  ;;  %v990_v58 = vadd.f32 %v989_v52, %v975_v45  ;;  %v983_v59 = vrot.slane %v974_v53, 4  ;;  %v995_v60 = vrot.slane %v976_v54, 4 }
 0x2fe   :  { %v1050_v45 = vrot.slane %v116_v28, %v8785_v49 }
 0x2ff   :  { %v979_v61 = vrot.slane %v978_v56, 2  ;;  %v991_v62 = vrot.slane %v990_v58, 2  ;;  %v984_v63 = vadd.f32 %v983_v59, %v974_v53  ;;  %v996_v6 = vadd.f32 %v995_v60, %v976_v54 }
 0x300   :  { %v1058_v53 = vrot.slane %v116_v28, %v8803_v57 }
 0x301   :  { %v980_v0 = vadd.f32 %v979_v61, %v978_v56  ;;  %v992_v5 = vadd.f32 %v991_v62, %v990_v58  ;;  %v985_v7 = vrot.slane %v984_v63, 2  ;;  %v997_v8 = vrot.slane %v996_v6, 2 }
 0x303   :  { %v981_v9 = vrot.slane %v980_v0, 1  ;;  %v993_v12 = vrot.slane %v992_v5, 1  ;;  %v986_v10 = vadd.f32 %v985_v7, %v984_v63  ;;  %v998_v11 = vadd.f32 %v997_v8, %v996_v6 }
 0x305   :  { %v982_v13 = vadd.f32 %v981_v9, %v980_v0  ;;  %v994_v14 = vadd.f32 %v993_v12, %v992_v5  ;;  %v987_v15 = vrot.slane %v986_v10, 1  ;;  %v999_v16 = vrot.slane %v998_v11, 1 }
 0x307   :  { %v1001_v17 = vmul.f32 0.125, %v982_v13  ;;  %v1003_v18 = vmul.f32 0.125, %v994_v14  ;;  %v988_v19 = vadd.f32 %v987_v15, %v986_v10  ;;  %v1000_v20 = vadd.f32 %v999_v16, %v998_v11 }
 0x309   :  { %v1005_v21 = vadd.f32 1e-05, %v1001_v17  ;;  %v1007_v22 = vadd.f32 1e-05, %v1003_v18  ;;  %v1002_v23 = vmul.f32 0.125, %v988_v19  ;;  %v1004_v24 = vmul.f32 0.125, %v1000_v20 }
 0x30b   :  { %7872 = vrsqrt.f32 %v1005_v21  ;;  %v1006_v25 = vadd.f32 1e-05, %v1002_v23  ;;  %v1008_v26 = vadd.f32 1e-05, %v1004_v24 }
 0x30c   :  { %7874 = vrsqrt.f32 %v1007_v22 }
 0x30d   :  { %7876 = vrsqrt.f32 %v1006_v25 }
 0x30e   :  { %7878 = vrsqrt.f32 %v1008_v26 }
 0x318   :  { %v7873_v30 = vpop.eup %7872 }
 0x319   :  { %v7875_v32 = vpop.eup %7874  ;;  %v1013_v33 = vmul.f32 %v7873_v30, %v969_v40 }
 0x31a   :  { %v7877_v36 = vpop.eup %7876  ;;  %v1015_v37 = vmul.f32 %v7875_v32, %v971_v41 }
 0x31b   :  { %v7879_v42 = vpop.eup %7878  ;;  %v1038_v43 = vmul.f32 %v1021_v29, %v1013_v33  ;;  %v1014_v44 = vmul.f32 %v7877_v36, %v970_v48 }
 0x31c   :  { %v1040_v51 = vmul.f32 %v1029_v31, %v1015_v37  ;;  %v1016_v52 = vmul.f32 %v7879_v42, %v972_v50 }
 0x31d   :  { %v1063_v40 = vadd.f32 %v1046_v34, %v1038_v43  ;;  %v1039_v54 = vmul.f32 %v1025_v35, %v1014_v44 }
 0x31e   :  { %v1065_v56 = vadd.f32 %v1054_v38, %v1040_v51  ;;  %v1041_v58 = vmul.f32 %v1033_v39, %v1016_v52 }
 0x31f   :  { %vm1067_vm6 = vcmp.gt.f32.partialorder %v1063_v40, 0.0  ;;  %v1071_v59 = vmul.f32 0.2, %v1063_v40  ;;  %v1064_v41 = vadd.f32 %v1050_v45, %v1039_v54 }
 0x320   :  { %vm1069_vm7 = vcmp.gt.f32.partialorder %v1065_v56, 0.0  ;;  %v1073_v60 = vmul.f32 0.2, %v1065_v56  ;;  %v1066_v61 = vadd.f32 %v1058_v53, %v1041_v58 }
 0x321   :  { %v8817_v62 = vsel %vm1067_vm6, %v1063_v40, %v1071_v59  ;;  %vm1068_vm8 = vcmp.gt.f32.partialorder %v1064_v41, 0.0  ;;  %v1072_v48 = vmul.f32 0.2, %v1064_v41 }
 0x322   :  { %v8819_v63 = vsel %vm1069_vm7, %v1065_v56, %v1073_v60  ;;  %vm1070_vm9 = vcmp.gt.f32.partialorder %v1066_v61, 0.0  ;;  %v1074_v50 = vmul.f32 0.2, %v1066_v61 }
 0x323   :  { %v1076_v6 = vsel %vm1068_vm8, %v1064_v41, %v1072_v48 }
 0x324   :  { %v1078_v0 = vsel %vm1070_vm9, %v1066_v61, %v1074_v50 }
 0x325   :  { %8696 = dma.done.wait [#allocation4], 32768 }
 0x326   :  { %8697 = vsyncadd [#allocation4], 4294934528  ;;  %v8821_v5 = vpack.c.bf16 %v1076_v6, %v1076_v6  ;;  %v8823_v7 = vpack.c.bf16 %v1078_v0, %v1078_v0  ;;  %v1139_v8 = vld [vmem:[#allocation2 + $0x1c0] sm:$0xff] }
 0x327   :  { %v1143_v9 = vld [vmem:[#allocation2 + $0x1e0] sm:$0xff] }
 0x328   :  { %2696 = vmatprep.mubr.bf16.mxu0 %v8821_v5  ;;  %2737 = vmatprep.mubr.bf16.mxu1 %v8823_v7  ;;  %v1267_v12 = vld [vmem:[#allocation2 + $0x5c0] sm:$0xff]  ;;  %v6962_v10 = vcombine.high %v1139_v8, %v1143_v9  ;;  %v6961_v13 = vcombine.low %v1139_v8, %v1143_v9 }
 0x329   :  { %v1271_v11 = vld [vmem:[#allocation2 + $0x5e0] sm:$0xff] }
 0x32a   :  { %v1131_v14 = vld [vmem:[#allocation2 + $0x180] sm:$0xff]  ;;  %v7090_v16 = vcombine.high %v1267_v12, %v1271_v11  ;;  %v7089_v17 = vcombine.low %v1267_v12, %v1271_v11  ;;  %2664 = vmatprep.subr.bf16.mxu0 %v6962_v10 }
 0x32b   :  { %v1135_v15 = vld [vmem:[#allocation2 + $0x1a0] sm:$0xff]  ;;  %2665 = vmatpush1.bf16.msra.mxu0 %v6961_v13 }
 0x32c   :  { %v6954_v18 = vcombine.high %v1131_v14, %v1135_v15  ;;  %v1259_v19 = vld [vmem:[#allocation2 + $0x580] sm:$0xff]  ;;  %2705 = vmatprep.subr.bf16.mxu1 %v7090_v16  ;;  %v6953_v26 = vcombine.low %v1131_v14, %v1135_v15 }
 0x32d   :  { %v1263_v20 = vld [vmem:[#allocation2 + $0x5a0] sm:$0xff]  ;;  %2706 = vmatpush1.bf16.msra.mxu1 %v7089_v17 }
 0x32e   :  { %v1123_v21 = vld [vmem:[#allocation2 + $0x140] sm:$0xff]  ;;  %v7082_v22 = vcombine.high %v1259_v19, %v1263_v20  ;;  %2666 = vmatprep.subr.bf16.mxu0 %v6954_v18  ;;  %v7081_v27 = vcombine.low %v1259_v19, %v1263_v20 }
 0x32f   :  { %v1127_v23 = vld [vmem:[#allocation2 + $0x160] sm:$0xff]  ;;  %2667 = vmatpush1.bf16.msra.mxu0 %v6953_v26 }
 0x330   :  { %v1251_v24 = vld [vmem:[#allocation2 + $0x540] sm:$0xff]  ;;  %v6946_v28 = vcombine.high %v1123_v21, %v1127_v23  ;;  %2707 = vmatprep.subr.bf16.mxu1 %v7082_v22  ;;  %v6945_v34 = vcombine.low %v1123_v21, %v1127_v23 }
 0x331   :  { %v1255_v25 = vld [vmem:[#allocation2 + $0x560] sm:$0xff]  ;;  %2708 = vmatpush1.bf16.msra.mxu1 %v7081_v27 }
 0x332   :  { %v7074_v29 = vcombine.high %v1251_v24, %v1255_v25  ;;  %v1115_v30 = vld [vmem:[#allocation2 + $0x100] sm:$0xff]  ;;  %2668 = vmatprep.subr.bf16.mxu0 %v6946_v28  ;;  %v7073_v35 = vcombine.low %v1251_v24, %v1255_v25 }
 0x333   :  { %v1119_v31 = vld [vmem:[#allocation2 + $0x120] sm:$0xff]  ;;  %2669 = vmatpush1.bf16.msra.mxu0 %v6945_v34 }
 0x334   :  { %v1243_v32 = vld [vmem:[#allocation2 + $0x500] sm:$0xff]  ;;  %v6938_v36 = vcombine.high %v1115_v30, %v1119_v31  ;;  %2709 = vmatprep.subr.bf16.mxu1 %v7074_v29  ;;  %v6937_v44 = vcombine.low %v1115_v30, %v1119_v31 }
 0x335   :  { %v1247_v33 = vld [vmem:[#allocation2 + $0x520] sm:$0xff]  ;;  %2710 = vmatpush1.bf16.msra.mxu1 %v7073_v35 }
 0x336   :  { %v7066_v37 = vcombine.high %v1243_v32, %v1247_v33  ;;  %v1107_v38 = vld [vmem:[#allocation2 + $0xc0] sm:$0xff]  ;;  %2670 = vmatprep.subr.bf16.mxu0 %v6938_v36  ;;  %v7065_v45 = vcombine.low %v1243_v32, %v1247_v33 }
 0x337   :  { %v1111_v39 = vld [vmem:[#allocation2 + $0xe0] sm:$0xff]  ;;  %2671 = vmatpush1.bf16.msra.mxu0 %v6937_v44 }
 0x338   :  { %v1235_v42 = vld [vmem:[#allocation2 + $0x4c0] sm:$0xff]  ;;  %v6930_v51 = vcombine.high %v1107_v38, %v1111_v39  ;;  %2711 = vmatprep.subr.bf16.mxu1 %v7066_v37  ;;  %v6929_v58 = vcombine.low %v1107_v38, %v1111_v39 }
 0x339   :  { %v1239_v43 = vld [vmem:[#allocation2 + $0x4e0] sm:$0xff]  ;;  %2712 = vmatpush1.bf16.msra.mxu1 %v7065_v45 }
 0x33a   :  { %v7058_v52 = vcombine.high %v1235_v42, %v1239_v43  ;;  %v1099_v53 = vld [vmem:[#allocation2 + $0x80] sm:$0xff]  ;;  %2672 = vmatprep.subr.bf16.mxu0 %v6930_v51  ;;  %v7057_v59 = vcombine.low %v1235_v42, %v1239_v43 }
 0x33b   :  { %v1103_v40 = vld [vmem:[#allocation2 + $0xa0] sm:$0xff]  ;;  %2673 = vmatpush1.bf16.msra.mxu0 %v6929_v58 }
 0x33c   :  { %v1227_v54 = vld [vmem:[#allocation2 + $0x480] sm:$0xff]  ;;  %v6922_v41 = vcombine.high %v1099_v53, %v1103_v40  ;;  %2713 = vmatprep.subr.bf16.mxu1 %v7058_v52  ;;  %v6921_v0 = vcombine.low %v1099_v53, %v1103_v40 }
 0x33d   :  { %v1231_v56 = vld [vmem:[#allocation2 + $0x4a0] sm:$0xff]  ;;  %2714 = vmatpush1.bf16.msra.mxu1 %v7057_v59 }
 0x33e   :  { %v7050_v60 = vcombine.high %v1227_v54, %v1231_v56  ;;  %v1091_v61 = vld [vmem:[#allocation2 + $0x40] sm:$0xff]  ;;  %2674 = vmatprep.subr.bf16.mxu0 %v6922_v41  ;;  %v7049_v8 = vcombine.low %v1227_v54, %v1231_v56 }
 0x33f   :  { %v1095_v48 = vld [vmem:[#allocation2 + $0x60] sm:$0xff]  ;;  %2675 = vmatpush1.bf16.msra.mxu0 %v6921_v0 }
 0x340   :  { %v1219_v50 = vld [vmem:[#allocation2 + $0x440] sm:$0xff]  ;;  %v6914_v9 = vcombine.high %v1091_v61, %v1095_v48  ;;  %2715 = vmatprep.subr.bf16.mxu1 %v7050_v60  ;;  %v6913_v15 = vcombine.low %v1091_v61, %v1095_v48 }
 0x341   :  { %v1223_v6 = vld [vmem:[#allocation2 + $0x460] sm:$0xff]  ;;  %2716 = vmatpush1.bf16.msra.mxu1 %v7049_v8 }
 0x342   :  { %v7042_v12 = vcombine.high %v1219_v50, %v1223_v6  ;;  %v1083_v10 = vld [vmem:[#allocation2] sm:$0xff]  ;;  %2676 = vmatprep.subr.bf16.mxu0 %v6914_v9  ;;  %v7041_v16 = vcombine.low %v1219_v50, %v1223_v6 }
 0x343   :  { %v1087_v11 = vld [vmem:[#allocation2 + $0x20] sm:$0xff]  ;;  %2677 = vmatpush1.bf16.msra.mxu0 %v6913_v15 }
 0x344   :  { %v1211_v13 = vld [vmem:[#allocation2 + $0x400] sm:$0xff]  ;;  %v6906_v17 = vcombine.high %v1083_v10, %v1087_v11  ;;  %2717 = vmatprep.subr.bf16.mxu1 %v7042_v12  ;;  %v6905_v23 = vcombine.low %v1083_v10, %v1087_v11 }
 0x345   :  { %v1215_v14 = vld [vmem:[#allocation2 + $0x420] sm:$0xff]  ;;  %2718 = vmatpush1.bf16.msra.mxu1 %v7041_v16 }
 0x346   :  { %v7034_v18 = vcombine.high %v1211_v13, %v1215_v14  ;;  %v1203_v19 = vld [vmem:[#allocation2 + $0x3c0] sm:$0xff]  ;;  %2678 = vmatprep.subr.bf16.mxu0 %v6906_v17  ;;  %v7033_v24 = vcombine.low %v1211_v13, %v1215_v14 }
 0x347   :  { %v1207_v20 = vld [vmem:[#allocation2 + $0x3e0] sm:$0xff]  ;;  %2679 = vmatpush1.bf16.msra.mxu0 %v6905_v23 }
 0x348   :  { %v1331_v21 = vld [vmem:[#allocation2 + $0x7c0] sm:$0xff]  ;;  %v7026_v25 = vcombine.high %v1203_v19, %v1207_v20  ;;  %2719 = vmatprep.subr.bf16.mxu1 %v7034_v18  ;;  %v7025_v31 = vcombine.low %v1203_v19, %v1207_v20 }
 0x349   :  { %v1335_v22 = vld [vmem:[#allocation2 + $0x7e0] sm:$0xff]  ;;  %2720 = vmatpush1.bf16.msra.mxu1 %v7033_v24 }
 0x34a   :  { %v7154_v26 = vcombine.high %v1331_v21, %v1335_v22  ;;  %v1195_v27 = vld [vmem:[#allocation2 + $0x380] sm:$0xff]  ;;  %2680 = vmatprep.subr.bf16.mxu0 %v7026_v25  ;;  %v7153_v32 = vcombine.low %v1331_v21, %v1335_v22 }
 0x34b   :  { %v1199_v28 = vld [vmem:[#allocation2 + $0x3a0] sm:$0xff]  ;;  %2681 = vmatpush2.bf16.msra.mxu0 %v7025_v31 }
 0x34c   :  { %v1323_v29 = vld [vmem:[#allocation2 + $0x780] sm:$0xff]  ;;  %v7018_v33 = vcombine.high %v1195_v27, %v1199_v28  ;;  %2721 = vmatprep.subr.bf16.mxu1 %v7154_v26  ;;  %v7017_v39 = vcombine.low %v1195_v27, %v1199_v28 }
 0x34d   :  { %v1327_v30 = vld [vmem:[#allocation2 + $0x7a0] sm:$0xff]  ;;  %2722 = vmatpush2.bf16.msra.mxu1 %v7153_v32  ;;  %v1140_v32 = vld [vmem:[#allocation2 + $0x1c8] sm:$0xff] }
 0x34e   :  { %v7146_v34 = vcombine.high %v1323_v29, %v1327_v30  ;;  %v1187_v35 = vld [vmem:[#allocation2 + $0x340] sm:$0xff]  ;;  %2682 = vmatprep.subr.bf16.mxu0 %v7018_v33  ;;  %v7145_v42 = vcombine.low %v1323_v29, %v1327_v30  ;;  %v1144_v33 = vld [vmem:[#allocation2 + $0x1e8] sm:$0xff] }
 0x34f   :  { %v1191_v36 = vld [vmem:[#allocation2 + $0x360] sm:$0xff]  ;;  %2683 = vmatpush2.bf16.msra.mxu0 %v7017_v39 }
 0x350   :  { %v1315_v37 = vld [vmem:[#allocation2 + $0x740] sm:$0xff]  ;;  %v7010_v43 = vcombine.high %v1187_v35, %v1191_v36  ;;  %2723 = vmatprep.subr.bf16.mxu1 %v7146_v34  ;;  %v7009_v40 = vcombine.low %v1187_v35, %v1191_v36  ;;  %v1268_v34 = vld [vmem:[#allocation2 + $0x5c8] sm:$0xff] }
 0x351   :  { %v1319_v38 = vld [vmem:[#allocation2 + $0x760] sm:$0xff]  ;;  %2724 = vmatpush2.bf16.msra.mxu1 %v7145_v42  ;;  %v1272_v35 = vld [vmem:[#allocation2 + $0x5e8] sm:$0xff] }
 0x352   :  { %v7138_v44 = vcombine.high %v1315_v37, %v1319_v38  ;;  %v1179_v45 = vld [vmem:[#allocation2 + $0x300] sm:$0xff]  ;;  %2684 = vmatprep.subr.bf16.mxu0 %v7010_v43  ;;  %v7137_v54 = vcombine.low %v1315_v37, %v1319_v38  ;;  %v6964_v38 = vcombine.high %v1140_v32, %v1144_v33  ;;  %v7092_v39 = vcombine.high %v1268_v34, %v1272_v35  ;;  %v1132_v42 = vld [vmem:[#allocation2 + $0x188] sm:$0xff] }
 0x353   :  { %v1183_v51 = vld [vmem:[#allocation2 + $0x320] sm:$0xff]  ;;  %2685 = vmatpush2.bf16.msra.mxu0 %v7009_v40  ;;  %v1136_v43 = vld [vmem:[#allocation2 + $0x1a8] sm:$0xff]  ;;  %v7091_v40 = vcombine.low %v1268_v34, %v1272_v35 }
 0x354   :  { %v1307_v52 = vld [vmem:[#allocation2 + $0x700] sm:$0xff]  ;;  %v7002_v56 = vcombine.high %v1179_v45, %v1183_v51  ;;  %2725 = vmatprep.subr.bf16.mxu1 %v7138_v44  ;;  %v7001_v48 = vcombine.low %v1179_v45, %v1183_v51  ;;  %v8829_v44 = vpack.c.bf16 %v8817_v62, %v8817_v62  ;;  %v1260_v45 = vld [vmem:[#allocation2 + $0x588] sm:$0xff] }
 0x355   :  { %v1311_v53 = vld [vmem:[#allocation2 + $0x720] sm:$0xff]  ;;  %2726 = vmatpush2.bf16.msra.mxu1 %v7137_v54  ;;  %v1264_v51 = vld [vmem:[#allocation2 + $0x5a8] sm:$0xff]  ;;  %v6956_v54 = vcombine.high %v1132_v42, %v1136_v43 }
 0x356   :  { %v7130_v58 = vcombine.high %v1307_v52, %v1311_v53  ;;  %v1171_v59 = vld [vmem:[#allocation2 + $0x2c0] sm:$0xff]  ;;  %2686 = vmatprep.subr.bf16.mxu0 %v7002_v56  ;;  %v7129_v50 = vcombine.low %v1307_v52, %v1311_v53  ;;  %v8833_v52 = vpack.c.bf16 %v8819_v63, %v8819_v63  ;;  %v6963_v53 = vcombine.low %v1140_v32, %v1144_v33  ;;  %v1252_v62 = vld [vmem:[#allocation2 + $0x548] sm:$0xff] }
 0x357   :  { %v1175_v41 = vld [vmem:[#allocation2 + $0x2e0] sm:$0xff]  ;;  %2687 = vmatpush2.bf16.msra.mxu0 %v7001_v48  ;;  %v7084_v56 = vcombine.high %v1260_v45, %v1264_v51  ;;  %v7083_v63 = vcombine.low %v1260_v45, %v1264_v51  ;;  %v1224_v32 = vld [vmem:[#allocation2 + $0x468] sm:$0xff] }
 0x358   :  { %v1299_v60 = vld [vmem:[#allocation2 + $0x6c0] sm:$0xff]  ;;  %v6994_v6 = vcombine.high %v1171_v59, %v1175_v41  ;;  %2727 = vmatprep.subr.bf16.mxu1 %v7130_v58  ;;  %v6993_v11 = vcombine.low %v1171_v59, %v1175_v41  ;;  %v1124_v58 = vld [vmem:[#allocation2 + $0x148] sm:$0xff] }
 0x359   :  { %v1303_v61 = vld [vmem:[#allocation2 + $0x6e0] sm:$0xff]  ;;  %2728 = vmatpush2.bf16.msra.mxu1 %v7129_v50  ;;  %v1128_v59 = vld [vmem:[#allocation2 + $0x168] sm:$0xff] }
 0x35a   :  { %v7122_v0 = vcombine.high %v1299_v60, %v1303_v61  ;;  %v1163_v8 = vld [vmem:[#allocation2 + $0x280] sm:$0xff]  ;;  %2688 = vmatprep.subr.bf16.mxu0 %v6994_v6  ;;  %v7121_v13 = vcombine.low %v1299_v60, %v1303_v61  ;;  %v1256_v41 = vld [vmem:[#allocation2 + $0x568] sm:$0xff]  ;;  %v6955_v60 = vcombine.low %v1132_v42, %v1136_v43  ;;  %v6948_v61 = vcombine.high %v1124_v58, %v1128_v59 }
 0x35b   :  { %v1167_v9 = vld [vmem:[#allocation2 + $0x2a0] sm:$0xff]  ;;  %2689 = vmatpush2.bf16.msra.mxu0 %v6993_v11  ;;  %v7076_v48 = vcombine.high %v1252_v62, %v1256_v41  ;;  %v1116_v50 = vld [vmem:[#allocation2 + $0x108] sm:$0xff] }
 0x35c   :  { %v1291_v12 = vld [vmem:[#allocation2 + $0x680] sm:$0xff]  ;;  %v6986_v14 = vcombine.high %v1163_v8, %v1167_v9  ;;  %2729 = vmatprep.subr.bf16.mxu1 %v7122_v0  ;;  %v6985_v20 = vcombine.low %v1163_v8, %v1167_v9  ;;  %v1120_v6 = vld [vmem:[#allocation2 + $0x128] sm:$0xff]  ;;  %v6947_v9 = vcombine.low %v1124_v58, %v1128_v59 }
 0x35d   :  { %v1295_v10 = vld [vmem:[#allocation2 + $0x6a0] sm:$0xff]  ;;  %2730 = vmatpush2.bf16.msra.mxu1 %v7121_v13  ;;  %v1244_v0 = vld [vmem:[#allocation2 + $0x508] sm:$0xff] }
 0x35e   :  { %v7114_v15 = vcombine.high %v1291_v12, %v1295_v10  ;;  %v1155_v16 = vld [vmem:[#allocation2 + $0x240] sm:$0xff]  ;;  %2690 = vmatprep.subr.bf16.mxu0 %v6986_v14  ;;  %v7113_v21 = vcombine.low %v1291_v12, %v1295_v10  ;;  %v1248_v8 = vld [vmem:[#allocation2 + $0x528] sm:$0xff]  ;;  %v7075_v12 = vcombine.low %v1252_v62, %v1256_v41  ;;  %v6940_v10 = vcombine.high %v1116_v50, %v1120_v6 }
 0x35f   :  { %v1159_v17 = vld [vmem:[#allocation2 + $0x260] sm:$0xff]  ;;  %2691 = vmatpush2.bf16.msra.mxu0 %v6985_v20  ;;  %v7068_v11 = vcombine.high %v1244_v0, %v1248_v8  ;;  %v1108_v13 = vld [vmem:[#allocation2 + $0xc8] sm:$0xff] }
 0x360   :  { %v1283_v18 = vld [vmem:[#allocation2 + $0x640] sm:$0xff]  ;;  %v6978_v22 = vcombine.high %v1155_v16, %v1159_v17  ;;  %2731 = vmatprep.subr.bf16.mxu1 %v7114_v15  ;;  %v6977_v28 = vcombine.low %v1155_v16, %v1159_v17  ;;  %v1112_v14 = vld [vmem:[#allocation2 + $0xe8] sm:$0xff]  ;;  %v6939_v17 = vcombine.low %v1116_v50, %v1120_v6 }
 0x361   :  { %v1287_v19 = vld [vmem:[#allocation2 + $0x660] sm:$0xff]  ;;  %2732 = vmatpush2.bf16.msra.mxu1 %v7113_v21  ;;  %v1236_v15 = vld [vmem:[#allocation2 + $0x4c8] sm:$0xff] }
 0x362   :  { %v7106_v23 = vcombine.high %v1283_v18, %v1287_v19  ;;  %v1147_v24 = vld [vmem:[#allocation2 + $0x200] sm:$0xff]  ;;  %2692 = vmatprep.subr.bf16.mxu0 %v6978_v22  ;;  %v7105_v29 = vcombine.low %v1283_v18, %v1287_v19  ;;  %v1240_v16 = vld [vmem:[#allocation2 + $0x4e8] sm:$0xff]  ;;  %v7067_v18 = vcombine.low %v1244_v0, %v1248_v8  ;;  %v6932_v19 = vcombine.high %v1108_v13, %v1112_v14 }
 0x363   :  { %v1151_v25 = vld [vmem:[#allocation2 + $0x220] sm:$0xff]  ;;  %2693 = vmatpush2.bf16.msra.mxu0 %v6977_v28  ;;  %v7060_v20 = vcombine.high %v1236_v15, %v1240_v16  ;;  %v1100_v21 = vld [vmem:[#allocation2 + $0x88] sm:$0xff] }
 0x364   :  { %v1275_v26 = vld [vmem:[#allocation2 + $0x600] sm:$0xff]  ;;  %v6970_v30 = vcombine.high %v1147_v24, %v1151_v25  ;;  %2733 = vmatprep.subr.bf16.mxu1 %v7106_v23  ;;  %v6969_v36 = vcombine.low %v1147_v24, %v1151_v25  ;;  %v1104_v22 = vld [vmem:[#allocation2 + $0xa8] sm:$0xff]  ;;  %v6931_v25 = vcombine.low %v1108_v13, %v1112_v14 }
 0x365   :  { %v1279_v27 = vld [vmem:[#allocation2 + $0x620] sm:$0xff]  ;;  %2734 = vmatpush2.bf16.msra.mxu1 %v7105_v29  ;;  %v1228_v23 = vld [vmem:[#allocation2 + $0x488] sm:$0xff]  ;;  %v6923_v33 = vcombine.low %v1100_v21, %v1104_v22 }
 0x366   :  { %v7098_v31 = vcombine.high %v1275_v26, %v1279_v27  ;;  %2694 = vmatprep.subr.bf16.mxu0 %v6970_v30  ;;  %v7097_v37 = vcombine.low %v1275_v26, %v1279_v27  ;;  %v1232_v24 = vld [vmem:[#allocation2 + $0x4a8] sm:$0xff]  ;;  %v7059_v26 = vcombine.low %v1236_v15, %v1240_v16  ;;  %v6924_v27 = vcombine.high %v1100_v21, %v1104_v22 }
 0x367   :  { %2695 = vmatpush2.bf16.msra.mxu0 %v6969_v36  ;;  %v7052_v28 = vcombine.high %v1228_v23, %v1232_v24  ;;  %v1092_v29 = vld [vmem:[#allocation2 + $0x48] sm:$0xff]  ;;  %v7051_v34 = vcombine.low %v1228_v23, %v1232_v24 }
 0x368   :  { %2735 = vmatprep.subr.bf16.mxu1 %v7098_v31  ;;  %2746 = vmatprep.subr.bf16.mxu0 %v6964_v38  ;;  %v1096_v30 = vld [vmem:[#allocation2 + $0x68] sm:$0xff] }
 0x369   :  { %2736 = vmatpush2.bf16.msra.mxu1 %v7097_v37  ;;  %v1220_v31 = vld [vmem:[#allocation2 + $0x448] sm:$0xff]  ;;  %v6916_v35 = vcombine.high %v1092_v29, %v1096_v30  ;;  %v6915_v43 = vcombine.low %v1092_v29, %v1096_v30 }
 0x36a   :  { %2787 = vmatprep.subr.bf16.mxu1 %v7092_v39  ;;  %2697 = vmatmul.mubr.bf16.vlgmr.msra.gmra.mxu0 %v8829_v44  ;;  %v7044_v36 = vcombine.high %v1220_v31, %v1224_v32  ;;  %v1084_v37 = vld [vmem:[#allocation2 + $0x8] sm:$0xff]  ;;  %v7043_v45 = vcombine.low %v1220_v31, %v1224_v32 }
 0x36b   :  { %2747 = vmatpush1.bf16.msra.mxu0 %v6963_v53  ;;  %2778 = vmatprep.mubr.bf16.mxu0 %v8821_v5  ;;  %v1088_v38 = vld [vmem:[#allocation2 + $0x28] sm:$0xff] }
 0x36c   :  { %2738 = vmatmul.mubr.bf16.vlgmr.msra.gmra.mxu1 %v8833_v52  ;;  %2748 = vmatprep.subr.bf16.mxu0 %v6956_v54  ;;  %v1212_v39 = vld [vmem:[#allocation2 + $0x408] sm:$0xff]  ;;  %v6908_v51 = vcombine.high %v1084_v37, %v1088_v38  ;;  %v6907_v59 = vcombine.low %v1084_v37, %v1088_v38 }
 0x36d   :  { %2788 = vmatpush1.bf16.msra.mxu1 %v7091_v40  ;;  %2819 = vmatprep.mubr.bf16.mxu1 %v8823_v7  ;;  %v1216_v42 = vld [vmem:[#allocation2 + $0x428] sm:$0xff] }
 0x36e   :  { %2789 = vmatprep.subr.bf16.mxu1 %v7084_v56  ;;  %v7036_v53 = vcombine.high %v1212_v39, %v1216_v42  ;;  %v1204_v40 = vld [vmem:[#allocation2 + $0x3c8] sm:$0xff]  ;;  %v7035_v62 = vcombine.low %v1212_v39, %v1216_v42 }
 0x36f   :  { %2749 = vmatpush1.bf16.msra.mxu0 %v6955_v60  ;;  %v1208_v54 = vld [vmem:[#allocation2 + $0x3e8] sm:$0xff] }
 0x370   :  { %2750 = vmatprep.subr.bf16.mxu0 %v6948_v61  ;;  %v1332_v56 = vld [vmem:[#allocation2 + $0x7c8] sm:$0xff]  ;;  %v7028_v41 = vcombine.high %v1204_v40, %v1208_v54  ;;  %v7027_v6 = vcombine.low %v1204_v40, %v1208_v54 }
 0x371   :  { %2790 = vmatpush1.bf16.msra.mxu1 %v7083_v63  ;;  %v1336_v58 = vld [vmem:[#allocation2 + $0x7e8] sm:$0xff] }
 0x372   :  { %2791 = vmatprep.subr.bf16.mxu1 %v7076_v48  ;;  %v7156_v60 = vcombine.high %v1332_v56, %v1336_v58  ;;  %v1196_v63 = vld [vmem:[#allocation2 + $0x388] sm:$0xff]  ;;  %v7155_v0 = vcombine.low %v1332_v56, %v1336_v58 }
 0x373   :  { %2751 = vmatpush1.bf16.msra.mxu0 %v6947_v9  ;;  %v1200_v61 = vld [vmem:[#allocation2 + $0x3a8] sm:$0xff] }
 0x374   :  { %2752 = vmatprep.subr.bf16.mxu0 %v6940_v10  ;;  %v1324_v48 = vld [vmem:[#allocation2 + $0x788] sm:$0xff]  ;;  %v7020_v8 = vcombine.high %v1196_v63, %v1200_v61  ;;  %v7019_v14 = vcombine.low %v1196_v63, %v1200_v61 }
 0x375   :  { %2792 = vmatpush1.bf16.msra.mxu1 %v7075_v12  ;;  %v1328_v50 = vld [vmem:[#allocation2 + $0x7a8] sm:$0xff] }
 0x376   :  { %2793 = vmatprep.subr.bf16.mxu1 %v7068_v11  ;;  %v7148_v9 = vcombine.high %v1324_v48, %v1328_v50  ;;  %v1188_v12 = vld [vmem:[#allocation2 + $0x348] sm:$0xff]  ;;  %v7147_v15 = vcombine.low %v1324_v48, %v1328_v50 }
 0x377   :  { %2753 = vmatpush1.bf16.msra.mxu0 %v6939_v17  ;;  %v1192_v10 = vld [vmem:[#allocation2 + $0x368] sm:$0xff] }
 0x378   :  { %2754 = vmatprep.subr.bf16.mxu0 %v6932_v19  ;;  %v1316_v11 = vld [vmem:[#allocation2 + $0x748] sm:$0xff]  ;;  %v7012_v16 = vcombine.high %v1188_v12, %v1192_v10  ;;  %v7011_v22 = vcombine.low %v1188_v12, %v1192_v10  ;;  %v1273_v12 = vld [vmem:[#allocation2 + $0x5f0] sm:$0xff] }
 0x379   :  { %2794 = vmatpush1.bf16.msra.mxu1 %v7067_v18  ;;  %v1320_v13 = vld [vmem:[#allocation2 + $0x768] sm:$0xff] }
 0x37a   :  { %2795 = vmatprep.subr.bf16.mxu1 %v7060_v20  ;;  %v7140_v17 = vcombine.high %v1316_v11, %v1320_v13  ;;  %v1180_v18 = vld [vmem:[#allocation2 + $0x308] sm:$0xff]  ;;  %v7139_v23 = vcombine.low %v1316_v11, %v1320_v13 }
 0x37b   :  { %2755 = vmatpush1.bf16.msra.mxu0 %v6931_v25  ;;  %v1184_v19 = vld [vmem:[#allocation2 + $0x328] sm:$0xff] }
 0x37c   :  { %2756 = vmatprep.subr.bf16.mxu0 %v6924_v27  ;;  %v1308_v20 = vld [vmem:[#allocation2 + $0x708] sm:$0xff]  ;;  %v7004_v24 = vcombine.high %v1180_v18, %v1184_v19  ;;  %v7003_v30 = vcombine.low %v1180_v18, %v1184_v19  ;;  %v1265_v18 = vld [vmem:[#allocation2 + $0x5b0] sm:$0xff] }
 0x37d   :  { %2796 = vmatpush1.bf16.msra.mxu1 %v7059_v26  ;;  %v1312_v21 = vld [vmem:[#allocation2 + $0x728] sm:$0xff] }
 0x37e   :  { %2797 = vmatprep.subr.bf16.mxu1 %v7052_v28  ;;  %v7132_v25 = vcombine.high %v1308_v20, %v1312_v21  ;;  %v1172_v26 = vld [vmem:[#allocation2 + $0x2c8] sm:$0xff]  ;;  %v7131_v31 = vcombine.low %v1308_v20, %v1312_v21 }
 0x37f   :  { %2757 = vmatpush1.bf16.msra.mxu0 %v6923_v33  ;;  %v1176_v27 = vld [vmem:[#allocation2 + $0x2e8] sm:$0xff] }
 0x380   :  { %2758 = vmatprep.subr.bf16.mxu0 %v6916_v35  ;;  %v1300_v28 = vld [vmem:[#allocation2 + $0x6c8] sm:$0xff]  ;;  %v6996_v32 = vcombine.high %v1172_v26, %v1176_v27  ;;  %v6995_v38 = vcombine.low %v1172_v26, %v1176_v27  ;;  %v1257_v26 = vld [vmem:[#allocation2 + $0x570] sm:$0xff] }
 0x381   :  { %2798 = vmatpush1.bf16.msra.mxu1 %v7051_v34  ;;  %v1304_v29 = vld [vmem:[#allocation2 + $0x6e8] sm:$0xff] }
 0x382   :  { %2799 = vmatprep.subr.bf16.mxu1 %v7044_v36  ;;  %v7124_v33 = vcombine.high %v1300_v28, %v1304_v29  ;;  %v1164_v34 = vld [vmem:[#allocation2 + $0x288] sm:$0xff]  ;;  %v7123_v39 = vcombine.low %v1300_v28, %v1304_v29 }
 0x383   :  { %2759 = vmatpush1.bf16.msra.mxu0 %v6915_v43  ;;  %v1168_v35 = vld [vmem:[#allocation2 + $0x2a8] sm:$0xff] }
 0x384   :  { %2760 = vmatprep.subr.bf16.mxu0 %v6908_v51  ;;  %v1292_v36 = vld [vmem:[#allocation2 + $0x688] sm:$0xff]  ;;  %v6988_v42 = vcombine.high %v1164_v34, %v1168_v35  ;;  %v6987_v54 = vcombine.low %v1164_v34, %v1168_v35  ;;  %v1249_v34 = vld [vmem:[#allocation2 + $0x530] sm:$0xff] }
 0x385   :  { %2800 = vmatpush1.bf16.msra.mxu1 %v7043_v45  ;;  %v1296_v37 = vld [vmem:[#allocation2 + $0x6a8] sm:$0xff] }
 0x386   :  { %2801 = vmatprep.subr.bf16.mxu1 %v7036_v53  ;;  %v7116_v43 = vcombine.high %v1292_v36, %v1296_v37  ;;  %v1156_v45 = vld [vmem:[#allocation2 + $0x248] sm:$0xff]  ;;  %v7115_v56 = vcombine.low %v1292_v36, %v1296_v37 }
 0x387   :  { %2761 = vmatpush1.bf16.msra.mxu0 %v6907_v59  ;;  %v1160_v51 = vld [vmem:[#allocation2 + $0x268] sm:$0xff] }
 0x388   :  { %2762 = vmatprep.subr.bf16.mxu0 %v7028_v41  ;;  %v1284_v53 = vld [vmem:[#allocation2 + $0x648] sm:$0xff]  ;;  %v6980_v58 = vcombine.high %v1156_v45, %v1160_v51  ;;  %v6979_v61 = vcombine.low %v1156_v45, %v1160_v51  ;;  %v1241_v45 = vld [vmem:[#allocation2 + $0x4f0] sm:$0xff] }
 0x389   :  { %2802 = vmatpush1.bf16.msra.mxu1 %v7035_v62  ;;  %v1288_v40 = vld [vmem:[#allocation2 + $0x668] sm:$0xff] }
 0x38a   :  { %2803 = vmatprep.subr.bf16.mxu1 %v7156_v60  ;;  %v7108_v59 = vcombine.high %v1284_v53, %v1288_v40  ;;  %v1148_v62 = vld [vmem:[#allocation2 + $0x208] sm:$0xff]  ;;  %v7107_v48 = vcombine.low %v1284_v53, %v1288_v40 }
 0x38b   :  { %2763 = vmatpush2.bf16.msra.mxu0 %v7027_v6  ;;  %v1152_v41 = vld [vmem:[#allocation2 + $0x228] sm:$0xff] }
 0x38c   :  { %2764 = vmatprep.subr.bf16.mxu0 %v7020_v8  ;;  %v1276_v60 = vld [vmem:[#allocation2 + $0x608] sm:$0xff]  ;;  %v6972_v50 = vcombine.high %v1148_v62, %v1152_v41  ;;  %v1145_v8 = vld [vmem:[#allocation2 + $0x1f0] sm:$0xff]  ;;  %v6971_v10 = vcombine.low %v1148_v62, %v1152_v41 }
 0x38d   :  { %2804 = vmatpush2.bf16.msra.mxu1 %v7155_v0  ;;  %v1280_v63 = vld [vmem:[#allocation2 + $0x628] sm:$0xff]  ;;  %v1141_v0 = vld [vmem:[#allocation2 + $0x1d0] sm:$0xff] }
 0x38e   :  { %2805 = vmatprep.subr.bf16.mxu1 %v7148_v9  ;;  %v7100_v6 = vcombine.high %v1276_v60, %v1280_v63  ;;  %v1269_v9 = vld [vmem:[#allocation2 + $0x5d0] sm:$0xff]  ;;  %v7099_v11 = vcombine.low %v1276_v60, %v1280_v63  ;;  %v6966_v13 = vcombine.high %v1141_v0, %v1145_v8  ;;  %v6965_v19 = vcombine.low %v1141_v0, %v1145_v8 }
 0x38f   :  { %2765 = vmatpush2.bf16.msra.mxu0 %v7019_v14  ;;  %v7094_v14 = vcombine.high %v1269_v9, %v1273_v12  ;;  %v7093_v20 = vcombine.low %v1269_v9, %v1273_v12  ;;  %v1233_v62 = vld [vmem:[#allocation2 + $0x4b0] sm:$0xff] }
 0x390   :  { %2766 = vmatprep.subr.bf16.mxu0 %v7012_v16  ;;  %v1137_v16 = vld [vmem:[#allocation2 + $0x1b0] sm:$0xff] }
 0x391   :  { %2806 = vmatpush2.bf16.msra.mxu1 %v7147_v15  ;;  %v1133_v15 = vld [vmem:[#allocation2 + $0x190] sm:$0xff] }
 0x392   :  { %2807 = vmatprep.subr.bf16.mxu1 %v7140_v17  ;;  %v1261_v17 = vld [vmem:[#allocation2 + $0x590] sm:$0xff]  ;;  %v6958_v21 = vcombine.high %v1133_v15, %v1137_v16  ;;  %v6957_v27 = vcombine.low %v1133_v15, %v1137_v16 }
 0x393   :  { %2767 = vmatpush2.bf16.msra.mxu0 %v7011_v22  ;;  %v7086_v22 = vcombine.high %v1261_v17, %v1265_v18  ;;  %v7085_v28 = vcombine.low %v1261_v17, %v1265_v18  ;;  %v1225_v0 = vld [vmem:[#allocation2 + $0x470] sm:$0xff] }
 0x394   :  { %2768 = vmatprep.subr.bf16.mxu0 %v7004_v24  ;;  %v1129_v24 = vld [vmem:[#allocation2 + $0x170] sm:$0xff] }
 0x395   :  { %2808 = vmatpush2.bf16.msra.mxu1 %v7139_v23  ;;  %v1125_v23 = vld [vmem:[#allocation2 + $0x150] sm:$0xff] }
 0x396   :  { %2809 = vmatprep.subr.bf16.mxu1 %v7132_v25  ;;  %v1253_v25 = vld [vmem:[#allocation2 + $0x550] sm:$0xff]  ;;  %v6950_v29 = vcombine.high %v1125_v23, %v1129_v24  ;;  %v6949_v35 = vcombine.low %v1125_v23, %v1129_v24 }
 0x397   :  { %2769 = vmatpush2.bf16.msra.mxu0 %v7003_v30  ;;  %v7078_v30 = vcombine.high %v1253_v25, %v1257_v26  ;;  %v7077_v36 = vcombine.low %v1253_v25, %v1257_v26  ;;  %v1217_v15 = vld [vmem:[#allocation2 + $0x430] sm:$0xff] }
 0x398   :  { %2770 = vmatprep.subr.bf16.mxu0 %v6996_v32  ;;  %v1121_v32 = vld [vmem:[#allocation2 + $0x130] sm:$0xff] }
 0x399   :  { %2810 = vmatpush2.bf16.msra.mxu1 %v7131_v31  ;;  %v1117_v31 = vld [vmem:[#allocation2 + $0x110] sm:$0xff] }
 0x39a   :  { %2811 = vmatprep.subr.bf16.mxu1 %v7124_v33  ;;  %v1245_v33 = vld [vmem:[#allocation2 + $0x510] sm:$0xff]  ;;  %v6942_v37 = vcombine.high %v1117_v31, %v1121_v32  ;;  %v6941_v51 = vcombine.low %v1117_v31, %v1121_v32 }
 0x39b   :  { %2771 = vmatpush2.bf16.msra.mxu0 %v6995_v38  ;;  %v7070_v38 = vcombine.high %v1245_v33, %v1249_v34  ;;  %v7069_v53 = vcombine.low %v1245_v33, %v1249_v34  ;;  %v1337_v23 = vld [vmem:[#allocation2 + $0x7f0] sm:$0xff] }
 0x39c   :  { %2772 = vmatprep.subr.bf16.mxu0 %v6988_v42  ;;  %v1113_v42 = vld [vmem:[#allocation2 + $0xf0] sm:$0xff] }
 0x39d   :  { %2812 = vmatpush2.bf16.msra.mxu1 %v7123_v39  ;;  %v1109_v39 = vld [vmem:[#allocation2 + $0xd0] sm:$0xff] }
 0x39e   :  { %2813 = vmatprep.subr.bf16.mxu1 %v7116_v43  ;;  %v1237_v43 = vld [vmem:[#allocation2 + $0x4d0] sm:$0xff]  ;;  %v6934_v40 = vcombine.high %v1109_v39, %v1113_v42  ;;  %v6933_v41 = vcombine.low %v1109_v39, %v1113_v42 }
 0x39f   :  { %2773 = vmatpush2.bf16.msra.mxu0 %v6987_v54  ;;  %v7062_v54 = vcombine.high %v1237_v43, %v1241_v45  ;;  %v7061_v60 = vcombine.low %v1237_v43, %v1241_v45  ;;  %v1329_v31 = vld [vmem:[#allocation2 + $0x7b0] sm:$0xff] }
 0x3a0   :  { %2774 = vmatprep.subr.bf16.mxu0 %v6980_v58  ;;  %v1105_v58 = vld [vmem:[#allocation2 + $0xb0] sm:$0xff] }
 0x3a1   :  { %2814 = vmatpush2.bf16.msra.mxu1 %v7115_v56  ;;  %v1101_v56 = vld [vmem:[#allocation2 + $0x90] sm:$0xff] }
 0x3a2   :  { %2815 = vmatprep.subr.bf16.mxu1 %v7108_v59  ;;  %v1229_v59 = vld [vmem:[#allocation2 + $0x490] sm:$0xff]  ;;  %v6926_v63 = vcombine.high %v1101_v56, %v1105_v58  ;;  %v6925_v8 = vcombine.low %v1101_v56, %v1105_v58 }
 0x3a3   :  { %2775 = vmatpush2.bf16.msra.mxu0 %v6979_v61  ;;  %v7054_v61 = vcombine.high %v1229_v59, %v1233_v62  ;;  %v7053_v9 = vcombine.low %v1229_v59, %v1233_v62  ;;  %v1321_v39 = vld [vmem:[#allocation2 + $0x770] sm:$0xff] }
 0x3a4   :  { %2776 = vmatprep.subr.bf16.mxu0 %v6972_v50  ;;  %v1097_v50 = vld [vmem:[#allocation2 + $0x70] sm:$0xff] }
 0x3a5   :  { %2816 = vmatpush2.bf16.msra.mxu1 %v7107_v48  ;;  %v1093_v48 = vld [vmem:[#allocation2 + $0x50] sm:$0xff] }
 0x3a6   :  { %2817 = vmatprep.subr.bf16.mxu1 %v7100_v6  ;;  %v1221_v6 = vld [vmem:[#allocation2 + $0x450] sm:$0xff]  ;;  %v6918_v12 = vcombine.high %v1093_v48, %v1097_v50  ;;  %v6917_v16 = vcombine.low %v1093_v48, %v1097_v50 }
 0x3a7   :  { %2777 = vmatpush2.bf16.msra.mxu0 %v6971_v10  ;;  %v7046_v10 = vcombine.high %v1221_v6, %v1225_v0  ;;  %v7045_v17 = vcombine.low %v1221_v6, %v1225_v0  ;;  %v1313_v56 = vld [vmem:[#allocation2 + $0x730] sm:$0xff] }
 0x3a8   :  { %2828 = vmatprep.subr.bf16.mxu0 %v6966_v13  ;;  %v1089_v13 = vld [vmem:[#allocation2 + $0x30] sm:$0xff] }
 0x3a9   :  { %2818 = vmatpush2.bf16.msra.mxu1 %v7099_v11  ;;  %v1085_v11 = vld [vmem:[#allocation2 + $0x10] sm:$0xff] }
 0x3aa   :  { %2869 = vmatprep.subr.bf16.mxu1 %v7094_v14  ;;  %2779 = vmatmul.mubr.bf16.vlgmr.msra.gmra.mxu0 %v8829_v44  ;;  %v1213_v14 = vld [vmem:[#allocation2 + $0x410] sm:$0xff]  ;;  %v6910_v18 = vcombine.high %v1085_v11, %v1089_v13  ;;  %v6909_v24 = vcombine.low %v1085_v11, %v1089_v13 }
 0x3ab   :  { %2829 = vmatpush1.bf16.msra.mxu0 %v6965_v19  ;;  %2860 = vmatprep.mubr.bf16.mxu0 %v8821_v5  ;;  %v7038_v19 = vcombine.high %v1213_v14, %v1217_v15  ;;  %v7037_v25 = vcombine.low %v1213_v14, %v1217_v15  ;;  %v1305_v48 = vld [vmem:[#allocation2 + $0x6f0] sm:$0xff] }
 0x3ac   :  { %2820 = vmatmul.mubr.bf16.vlgmr.msra.gmra.mxu1 %v8833_v52  ;;  %2830 = vmatprep.subr.bf16.mxu0 %v6958_v21  ;;  %v1209_v21 = vld [vmem:[#allocation2 + $0x3f0] sm:$0xff] }
 0x3ad   :  { %2870 = vmatpush1.bf16.msra.mxu1 %v7093_v20  ;;  %2901 = vmatprep.mubr.bf16.mxu1 %v8823_v7  ;;  %v1205_v20 = vld [vmem:[#allocation2 + $0x3d0] sm:$0xff] }
 0x3ae   :  { %2871 = vmatprep.subr.bf16.mxu1 %v7086_v22  ;;  %v1333_v22 = vld [vmem:[#allocation2 + $0x7d0] sm:$0xff]  ;;  %v7030_v26 = vcombine.high %v1205_v20, %v1209_v21  ;;  %v7029_v32 = vcombine.low %v1205_v20, %v1209_v21 }
 0x3af   :  { %2831 = vmatpush1.bf16.msra.mxu0 %v6957_v27  ;;  %v7158_v27 = vcombine.high %v1333_v22, %v1337_v23  ;;  %v7157_v33 = vcombine.low %v1333_v22, %v1337_v23  ;;  %v1297_v11 = vld [vmem:[#allocation2 + $0x6b0] sm:$0xff] }
 0x3b0   :  { %2832 = vmatprep.subr.bf16.mxu0 %v6950_v29  ;;  %v1201_v29 = vld [vmem:[#allocation2 + $0x3b0] sm:$0xff] }
 0x3b1   :  { %2872 = vmatpush1.bf16.msra.mxu1 %v7085_v28  ;;  %v1197_v28 = vld [vmem:[#allocation2 + $0x390] sm:$0xff] }
 0x3b2   :  { %2873 = vmatprep.subr.bf16.mxu1 %v7078_v30  ;;  %v1325_v30 = vld [vmem:[#allocation2 + $0x790] sm:$0xff]  ;;  %v7022_v34 = vcombine.high %v1197_v28, %v1201_v29  ;;  %v7021_v42 = vcombine.low %v1197_v28, %v1201_v29 }
 0x3b3   :  { %2833 = vmatpush1.bf16.msra.mxu0 %v6949_v35  ;;  %v7150_v35 = vcombine.high %v1325_v30, %v1329_v31  ;;  %v7149_v43 = vcombine.low %v1325_v30, %v1329_v31  ;;  %v1289_v20 = vld [vmem:[#allocation2 + $0x670] sm:$0xff] }
 0x3b4   :  { %2834 = vmatprep.subr.bf16.mxu0 %v6942_v37  ;;  %v1193_v37 = vld [vmem:[#allocation2 + $0x370] sm:$0xff] }
 0x3b5   :  { %2874 = vmatpush1.bf16.msra.mxu1 %v7077_v36  ;;  %v1189_v36 = vld [vmem:[#allocation2 + $0x350] sm:$0xff] }
 0x3b6   :  { %2875 = vmatprep.subr.bf16.mxu1 %v7070_v38  ;;  %v1317_v38 = vld [vmem:[#allocation2 + $0x750] sm:$0xff]  ;;  %v7014_v45 = vcombine.high %v1189_v36, %v1193_v37  ;;  %v7013_v58 = vcombine.low %v1189_v36, %v1193_v37  ;;  %v1274_v36 = vld [vmem:[#allocation2 + $0x5f8] sm:$0xff] }
 0x3b7   :  { %2835 = vmatpush1.bf16.msra.mxu0 %v6941_v51  ;;  %v7142_v51 = vcombine.high %v1317_v38, %v1321_v39  ;;  %v7141_v59 = vcombine.low %v1317_v38, %v1321_v39  ;;  %v1281_v28 = vld [vmem:[#allocation2 + $0x630] sm:$0xff] }
 0x3b8   :  { %2836 = vmatprep.subr.bf16.mxu0 %v6934_v40  ;;  %v1185_v40 = vld [vmem:[#allocation2 + $0x330] sm:$0xff] }
 0x3b9   :  { %2876 = vmatpush1.bf16.msra.mxu1 %v7069_v53  ;;  %v1181_v53 = vld [vmem:[#allocation2 + $0x310] sm:$0xff] }
 0x3ba   :  { %2877 = vmatprep.subr.bf16.mxu1 %v7062_v54  ;;  %v1309_v54 = vld [vmem:[#allocation2 + $0x710] sm:$0xff]  ;;  %v7006_v62 = vcombine.high %v1181_v53, %v1185_v40  ;;  %v7005_v50 = vcombine.low %v1181_v53, %v1185_v40  ;;  %v1266_v53 = vld [vmem:[#allocation2 + $0x5b8] sm:$0xff] }
 0x3bb   :  { %2837 = vmatpush1.bf16.msra.mxu0 %v6933_v41  ;;  %v7134_v41 = vcombine.high %v1309_v54, %v1313_v56  ;;  %v7133_v6 = vcombine.low %v1309_v54, %v1313_v56 }
 0x3bc   :  { %2838 = vmatprep.subr.bf16.mxu0 %v6926_v63  ;;  %v1177_v63 = vld [vmem:[#allocation2 + $0x2f0] sm:$0xff] }
 0x3bd   :  { %2878 = vmatpush1.bf16.msra.mxu1 %v7061_v60  ;;  %v1173_v60 = vld [vmem:[#allocation2 + $0x2d0] sm:$0xff] }
 0x3be   :  { %2879 = vmatprep.subr.bf16.mxu1 %v7054_v61  ;;  %v1301_v61 = vld [vmem:[#allocation2 + $0x6d0] sm:$0xff]  ;;  %v6998_v0 = vcombine.high %v1173_v60, %v1177_v63  ;;  %v6997_v13 = vcombine.low %v1173_v60, %v1177_v63  ;;  %v1258_v60 = vld [vmem:[#allocation2 + $0x578] sm:$0xff] }
 0x3bf   :  { %2839 = vmatpush1.bf16.msra.mxu0 %v6925_v8  ;;  %v7126_v8 = vcombine.high %v1301_v61, %v1305_v48  ;;  %v7125_v14 = vcombine.low %v1301_v61, %v1305_v48 }
 0x3c0   :  { %2840 = vmatprep.subr.bf16.mxu0 %v6918_v12  ;;  %v1169_v12 = vld [vmem:[#allocation2 + $0x2b0] sm:$0xff] }
 0x3c1   :  { %2880 = vmatpush1.bf16.msra.mxu1 %v7053_v9  ;;  %v1165_v9 = vld [vmem:[#allocation2 + $0x290] sm:$0xff] }
 0x3c2   :  { %2881 = vmatprep.subr.bf16.mxu1 %v7046_v10  ;;  %v1293_v10 = vld [vmem:[#allocation2 + $0x690] sm:$0xff]  ;;  %v6990_v15 = vcombine.high %v1165_v9, %v1169_v12  ;;  %v6989_v21 = vcombine.low %v1165_v9, %v1169_v12  ;;  %v1250_v9 = vld [vmem:[#allocation2 + $0x538] sm:$0xff] }
 0x3c3   :  { %2841 = vmatpush1.bf16.msra.mxu0 %v6917_v16  ;;  %v7118_v16 = vcombine.high %v1293_v10, %v1297_v11  ;;  %v7117_v22 = vcombine.low %v1293_v10, %v1297_v11 }
 0x3c4   :  { %2842 = vmatprep.subr.bf16.mxu0 %v6910_v18  ;;  %v1161_v18 = vld [vmem:[#allocation2 + $0x270] sm:$0xff] }
 0x3c5   :  { %2882 = vmatpush1.bf16.msra.mxu1 %v7045_v17  ;;  %v1157_v17 = vld [vmem:[#allocation2 + $0x250] sm:$0xff] }
 0x3c6   :  { %2883 = vmatprep.subr.bf16.mxu1 %v7038_v19  ;;  %v1285_v19 = vld [vmem:[#allocation2 + $0x650] sm:$0xff]  ;;  %v6982_v23 = vcombine.high %v1157_v17, %v1161_v18  ;;  %v6981_v29 = vcombine.low %v1157_v17, %v1161_v18  ;;  %v1242_v17 = vld [vmem:[#allocation2 + $0x4f8] sm:$0xff] }
 0x3c7   :  { %2843 = vmatpush1.bf16.msra.mxu0 %v6909_v24  ;;  %v7110_v24 = vcombine.high %v1285_v19, %v1289_v20  ;;  %v7109_v30 = vcombine.low %v1285_v19, %v1289_v20  ;;  %v1102_v20 = vld [vmem:[#allocation2 + $0x98] sm:$0xff] }
 0x3c8   :  { %2844 = vmatprep.subr.bf16.mxu0 %v7030_v26  ;;  %v1153_v26 = vld [vmem:[#allocation2 + $0x230] sm:$0xff] }
 0x3c9   :  { %2884 = vmatpush1.bf16.msra.mxu1 %v7037_v25  ;;  %v1149_v25 = vld [vmem:[#allocation2 + $0x210] sm:$0xff] }
 0x3ca   :  { %2885 = vmatprep.subr.bf16.mxu1 %v7158_v27  ;;  %v1277_v27 = vld [vmem:[#allocation2 + $0x610] sm:$0xff]  ;;  %v6974_v31 = vcombine.high %v1149_v25, %v1153_v26  ;;  %v6973_v37 = vcombine.low %v1149_v25, %v1153_v26 }
 0x3cb   :  { %2845 = vmatpush2.bf16.msra.mxu0 %v7029_v32  ;;  %v7102_v32 = vcombine.high %v1277_v27, %v1281_v28  ;;  %v7101_v38 = vcombine.low %v1277_v27, %v1281_v28  ;;  %v1094_v28 = vld [vmem:[#allocation2 + $0x58] sm:$0xff] }
 0x3cc   :  { %2846 = vmatprep.subr.bf16.mxu0 %v7022_v34  ;;  %v1146_v34 = vld [vmem:[#allocation2 + $0x1f8] sm:$0xff] }
 0x3cd   :  { %2886 = vmatpush2.bf16.msra.mxu1 %v7157_v33  ;;  %v1142_v33 = vld [vmem:[#allocation2 + $0x1d8] sm:$0xff] }
 0x3ce   :  { %2887 = vmatprep.subr.bf16.mxu1 %v7150_v35  ;;  %v1270_v35 = vld [vmem:[#allocation2 + $0x5d8] sm:$0xff]  ;;  %v6968_v39 = vcombine.high %v1142_v33, %v1146_v34  ;;  %v6967_v40 = vcombine.low %v1142_v33, %v1146_v34 }
 0x3cf   :  { %2847 = vmatpush2.bf16.msra.mxu0 %v7021_v42  ;;  %v7096_v42 = vcombine.high %v1270_v35, %v1274_v36  ;;  %v7095_v54 = vcombine.low %v1270_v35, %v1274_v36  ;;  %v1086_v36 = vld [vmem:[#allocation2 + $0x18] sm:$0xff] }
 0x3d0   :  { %2848 = vmatprep.subr.bf16.mxu0 %v7014_v45  ;;  %v1138_v45 = vld [vmem:[#allocation2 + $0x1b8] sm:$0xff] }
 0x3d1   :  { %2888 = vmatpush2.bf16.msra.mxu1 %v7149_v43  ;;  %v1134_v43 = vld [vmem:[#allocation2 + $0x198] sm:$0xff] }
 0x3d2   :  { %2889 = vmatprep.subr.bf16.mxu1 %v7142_v51  ;;  %v1262_v51 = vld [vmem:[#allocation2 + $0x598] sm:$0xff]  ;;  %v6960_v56 = vcombine.high %v1134_v43, %v1138_v45  ;;  %v6959_v63 = vcombine.low %v1134_v43, %v1138_v45 }
 0x3d3   :  { %2849 = vmatpush2.bf16.msra.mxu0 %v7013_v58  ;;  %v7088_v58 = vcombine.high %v1262_v51, %v1266_v53  ;;  %v7087_v61 = vcombine.low %v1262_v51, %v1266_v53  ;;  %v1206_v53 = vld [vmem:[#allocation2 + $0x3d8] sm:$0xff] }
 0x3d4   :  { %2850 = vmatprep.subr.bf16.mxu0 %v7006_v62  ;;  %v1130_v62 = vld [vmem:[#allocation2 + $0x178] sm:$0xff] }
 0x3d5   :  { %2890 = vmatpush2.bf16.msra.mxu1 %v7141_v59  ;;  %v1126_v59 = vld [vmem:[#allocation2 + $0x158] sm:$0xff] }
 0x3d6   :  { %2891 = vmatprep.subr.bf16.mxu1 %v7134_v41  ;;  %v1254_v41 = vld [vmem:[#allocation2 + $0x558] sm:$0xff]  ;;  %v6952_v48 = vcombine.high %v1126_v59, %v1130_v62  ;;  %v6951_v12 = vcombine.low %v1126_v59, %v1130_v62 }
 0x3d7   :  { %2851 = vmatpush2.bf16.msra.mxu0 %v7005_v50  ;;  %v7080_v50 = vcombine.high %v1254_v41, %v1258_v60  ;;  %v7079_v10 = vcombine.low %v1254_v41, %v1258_v60  ;;  %v1198_v60 = vld [vmem:[#allocation2 + $0x398] sm:$0xff] }
 0x3d8   :  { %2852 = vmatprep.subr.bf16.mxu0 %v6998_v0  ;;  %v1122_v0 = vld [vmem:[#allocation2 + $0x138] sm:$0xff] }
 0x3d9   :  { %2892 = vmatpush2.bf16.msra.mxu1 %v7133_v6  ;;  %v1118_v6 = vld [vmem:[#allocation2 + $0x118] sm:$0xff] }
 0x3da   :  { %2893 = vmatprep.subr.bf16.mxu1 %v7126_v8  ;;  %v1246_v8 = vld [vmem:[#allocation2 + $0x518] sm:$0xff]  ;;  %v6944_v11 = vcombine.high %v1118_v6, %v1122_v0  ;;  %v6943_v18 = vcombine.low %v1118_v6, %v1122_v0 }
 0x3db   :  { %2853 = vmatpush2.bf16.msra.mxu0 %v6997_v13  ;;  %v7072_v13 = vcombine.high %v1246_v8, %v1250_v9 }
 0x3dc   :  { %2854 = vmatprep.subr.bf16.mxu0 %v6990_v15  ;;  %v1114_v15 = vld [vmem:[#allocation2 + $0xf8] sm:$0xff] }
 0x3dd   :  { %2894 = vmatpush2.bf16.msra.mxu1 %v7125_v14  ;;  %v1110_v14 = vld [vmem:[#allocation2 + $0xd8] sm:$0xff] }
 0x3de   :  { %2895 = vmatprep.subr.bf16.mxu1 %v7118_v16  ;;  %v1238_v16 = vld [vmem:[#allocation2 + $0x4d8] sm:$0xff]  ;;  %v6936_v19 = vcombine.high %v1110_v14, %v1114_v15 }
 0x3df   :  { %2855 = vmatpush2.bf16.msra.mxu0 %v6989_v21  ;;  %v1106_v21 = vld [vmem:[#allocation2 + $0xb8] sm:$0xff]  ;;  %v7063_v25 = vcombine.low %v1238_v16, %v1242_v17 }
 0x3e0   :  { %2856 = vmatprep.subr.bf16.mxu0 %v6982_v23  ;;  %v1234_v23 = vld [vmem:[#allocation2 + $0x4b8] sm:$0xff]  ;;  %v6928_v26 = vcombine.high %v1102_v20, %v1106_v21 }
 0x3e1   :  { %2896 = vmatpush2.bf16.msra.mxu1 %v7117_v22  ;;  %v1230_v22 = vld [vmem:[#allocation2 + $0x498] sm:$0xff] }
 0x3e2   :  { %2897 = vmatprep.subr.bf16.mxu1 %v7110_v24  ;;  %v6935_v24 = vcombine.low %v1110_v14, %v1114_v15  ;;  %v7056_v27 = vcombine.high %v1230_v22, %v1234_v23  ;;  %v7055_v33 = vcombine.low %v1230_v22, %v1234_v23  ;;  %v1174_v23 = vld [vmem:[#allocation2 + $0x2d8] sm:$0xff] }
 0x3e3   :  { %2857 = vmatpush2.bf16.msra.mxu0 %v6981_v29  ;;  %v1098_v29 = vld [vmem:[#allocation2 + $0x78] sm:$0xff] }
 0x3e4   :  { %2858 = vmatprep.subr.bf16.mxu0 %v6974_v31  ;;  %v1226_v31 = vld [vmem:[#allocation2 + $0x478] sm:$0xff]  ;;  %v6920_v34 = vcombine.high %v1094_v28, %v1098_v29 }
 0x3e5   :  { %2898 = vmatpush2.bf16.msra.mxu1 %v7109_v30  ;;  %v1222_v30 = vld [vmem:[#allocation2 + $0x458] sm:$0xff] }
 0x3e6   :  { %2899 = vmatprep.subr.bf16.mxu1 %v7102_v32  ;;  %v6927_v32 = vcombine.low %v1102_v20, %v1106_v21  ;;  %v7048_v35 = vcombine.high %v1222_v30, %v1226_v31  ;;  %v7047_v43 = vcombine.low %v1222_v30, %v1226_v31  ;;  %v1166_v31 = vld [vmem:[#allocation2 + $0x298] sm:$0xff] }
 0x3e7   :  { %2859 = vmatpush2.bf16.msra.mxu0 %v6973_v37  ;;  %v1090_v37 = vld [vmem:[#allocation2 + $0x38] sm:$0xff] }
 0x3e8   :  { %2910 = vmatprep.subr.bf16.mxu0 %v6968_v39  ;;  %v1218_v39 = vld [vmem:[#allocation2 + $0x438] sm:$0xff]  ;;  %v6912_v45 = vcombine.high %v1086_v36, %v1090_v37 }
 0x3e9   :  { %2900 = vmatpush2.bf16.msra.mxu1 %v7101_v38  ;;  %v1214_v38 = vld [vmem:[#allocation2 + $0x418] sm:$0xff] }
 0x3ea   :  { %2951 = vmatprep.subr.bf16.mxu1 %v7096_v42  ;;  %2861 = vmatmul.mubr.bf16.vlgmr.msra.gmra.mxu0 %v8829_v44  ;;  %v6919_v42 = vcombine.low %v1094_v28, %v1098_v29  ;;  %v7040_v51 = vcombine.high %v1214_v38, %v1218_v39  ;;  %v7039_v59 = vcombine.low %v1214_v38, %v1218_v39  ;;  %v1158_v39 = vld [vmem:[#allocation2 + $0x258] sm:$0xff] }
 0x3eb   :  { %2911 = vmatpush1.bf16.msra.mxu0 %v6967_v40  ;;  %2942 = vmatprep.mubr.bf16.mxu0 %v8821_v5  ;;  %v7071_v5 = vcombine.low %v1246_v8, %v1250_v9  ;;  %v1210_v40 = vld [vmem:[#allocation2 + $0x3f8] sm:$0xff] }
 0x3ec   :  { %2902 = vmatmul.mubr.bf16.vlgmr.msra.gmra.mxu1 %v8833_v52  ;;  %2912 = vmatprep.subr.bf16.mxu0 %v6960_v56  ;;  %v1338_v56 = vld [vmem:[#allocation2 + $0x7f8] sm:$0xff]  ;;  %v7032_v62 = vcombine.high %v1206_v53, %v1210_v40 }
 0x3ed   :  { %2952 = vmatpush1.bf16.msra.mxu1 %v7095_v54  ;;  %2983 = vmatprep.mubr.bf16.mxu1 %v8823_v7  ;;  %v7064_v7 = vcombine.high %v1238_v16, %v1242_v17  ;;  %v1334_v54 = vld [vmem:[#allocation2 + $0x7d8] sm:$0xff] }
 0x3ee   :  { %2953 = vmatprep.subr.bf16.mxu1 %v7088_v58  ;;  %v6911_v58 = vcombine.low %v1086_v36, %v1090_v37  ;;  %v7160_v41 = vcombine.high %v1334_v54, %v1338_v56  ;;  %v7159_v6 = vcombine.low %v1334_v54, %v1338_v56  ;;  %v1190_v9 = vld [vmem:[#allocation2 + $0x358] sm:$0xff] }
 0x3ef   :  { %2913 = vmatpush1.bf16.msra.mxu0 %v6959_v63  ;;  %v1202_v63 = vld [vmem:[#allocation2 + $0x3b8] sm:$0xff] }
 0x3f0   :  { %2914 = vmatprep.subr.bf16.mxu0 %v6952_v48  ;;  %v1330_v48 = vld [vmem:[#allocation2 + $0x7b8] sm:$0xff]  ;;  %v7024_v0 = vcombine.high %v1198_v60, %v1202_v63 }
 0x3f1   :  { %2954 = vmatpush1.bf16.msra.mxu1 %v7087_v61  ;;  %v1326_v61 = vld [vmem:[#allocation2 + $0x798] sm:$0xff] }
 0x3f2   :  { %2955 = vmatprep.subr.bf16.mxu1 %v7080_v50  ;;  %v7031_v50 = vcombine.low %v1206_v53, %v1210_v40  ;;  %v7152_v8 = vcombine.high %v1326_v61, %v1330_v48  ;;  %v7151_v14 = vcombine.low %v1326_v61, %v1330_v48  ;;  %v1182_v17 = vld [vmem:[#allocation2 + $0x318] sm:$0xff] }
 0x3f3   :  { %2915 = vmatpush1.bf16.msra.mxu0 %v6951_v12  ;;  %v1194_v12 = vld [vmem:[#allocation2 + $0x378] sm:$0xff] }
 0x3f4   :  { %2916 = vmatprep.subr.bf16.mxu0 %v6944_v11  ;;  %v1322_v11 = vld [vmem:[#allocation2 + $0x778] sm:$0xff]  ;;  %v7016_v15 = vcombine.high %v1190_v9, %v1194_v12 }
 0x3f5   :  { %2956 = vmatpush1.bf16.msra.mxu1 %v7079_v10  ;;  %v1318_v10 = vld [vmem:[#allocation2 + $0x758] sm:$0xff] }
 0x3f6   :  { %2957 = vmatprep.subr.bf16.mxu1 %v7072_v13  ;;  %v7023_v13 = vcombine.low %v1198_v60, %v1202_v63  ;;  %v7144_v16 = vcombine.high %v1318_v10, %v1322_v11  ;;  %v7143_v20 = vcombine.low %v1318_v10, %v1322_v11  ;;  %v1150_v56 = vld [vmem:[#allocation2 + $0x218] sm:$0xff] }
 0x3f7   :  { %2917 = vmatpush1.bf16.msra.mxu0 %v6943_v18  ;;  %v1186_v18 = vld [vmem:[#allocation2 + $0x338] sm:$0xff] }
 0x3f8   :  { %2918 = vmatprep.subr.bf16.mxu0 %v6936_v19  ;;  %v1314_v19 = vld [vmem:[#allocation2 + $0x738] sm:$0xff]  ;;  %v7008_v21 = vcombine.high %v1182_v17, %v1186_v18 }
 0x3f9   :  { %2958 = vmatpush1.bf16.msra.mxu1 %v7071_v5  ;;  %v1310_v5 = vld [vmem:[#allocation2 + $0x718] sm:$0xff] }
 0x3fa   :  { %2959 = vmatprep.subr.bf16.mxu1 %v7064_v7  ;;  %v7015_v7 = vcombine.low %v1190_v9, %v1194_v12  ;;  %v7136_v22 = vcombine.high %v1310_v5, %v1314_v19  ;;  %v7135_v28 = vcombine.low %v1310_v5, %v1314_v19 }
 0x3fb   :  { %2919 = vmatpush1.bf16.msra.mxu0 %v6935_v24  ;;  %v1178_v24 = vld [vmem:[#allocation2 + $0x2f8] sm:$0xff] }
 0x3fc   :  { %2920 = vmatprep.subr.bf16.mxu0 %v6928_v26  ;;  %v1306_v26 = vld [vmem:[#allocation2 + $0x6f8] sm:$0xff]  ;;  %v7000_v29 = vcombine.high %v1174_v23, %v1178_v24 }
 0x3fd   :  { %2960 = vmatpush1.bf16.msra.mxu1 %v7063_v25  ;;  %v1302_v25 = vld [vmem:[#allocation2 + $0x6d8] sm:$0xff] }
 0x3fe   :  { %2961 = vmatprep.subr.bf16.mxu1 %v7056_v27  ;;  %v7007_v27 = vcombine.low %v1182_v17, %v1186_v18  ;;  %v7128_v30 = vcombine.high %v1302_v25, %v1306_v26  ;;  %v7127_v36 = vcombine.low %v1302_v25, %v1306_v26 }
 0x3ff   :  { %2921 = vmatpush1.bf16.msra.mxu0 %v6927_v32  ;;  %v1170_v32 = vld [vmem:[#allocation2 + $0x2b8] sm:$0xff] }
 0x400   :  { %2922 = vmatprep.subr.bf16.mxu0 %v6920_v34  ;;  %v1298_v34 = vld [vmem:[#allocation2 + $0x6b8] sm:$0xff]  ;;  %v6992_v37 = vcombine.high %v1166_v31, %v1170_v32 }
 0x401   :  { %2962 = vmatpush1.bf16.msra.mxu1 %v7055_v33  ;;  %v1294_v33 = vld [vmem:[#allocation2 + $0x698] sm:$0xff] }
 0x402   :  { %2963 = vmatprep.subr.bf16.mxu1 %v7048_v35  ;;  %v6999_v35 = vcombine.low %v1174_v23, %v1178_v24  ;;  %v7120_v38 = vcombine.high %v1294_v33, %v1298_v34  ;;  %v7119_v53 = vcombine.low %v1294_v33, %v1298_v34 }
 0x403   :  { %2923 = vmatpush1.bf16.msra.mxu0 %v6919_v42  ;;  %v1162_v42 = vld [vmem:[#allocation2 + $0x278] sm:$0xff] }
 0x404   :  { %2924 = vmatprep.subr.bf16.mxu0 %v6912_v45  ;;  %v1290_v45 = vld [vmem:[#allocation2 + $0x678] sm:$0xff]  ;;  %v6984_v40 = vcombine.high %v1158_v39, %v1162_v42 }
 0x405   :  { %2964 = vmatpush1.bf16.msra.mxu1 %v7047_v43  ;;  %v1286_v43 = vld [vmem:[#allocation2 + $0x658] sm:$0xff] }
 0x406   :  { %2965 = vmatprep.subr.bf16.mxu1 %v7040_v51  ;;  %v6991_v51 = vcombine.low %v1166_v31, %v1170_v32  ;;  %v7112_v54 = vcombine.high %v1286_v43, %v1290_v45  ;;  %v7111_v60 = vcombine.low %v1286_v43, %v1290_v45 }
 0x407   :  { %2925 = vmatpush1.bf16.msra.mxu0 %v6911_v58  ;;  %v1154_v58 = vld [vmem:[#allocation2 + $0x238] sm:$0xff] }
 0x408   :  { %2926 = vmatprep.subr.bf16.mxu0 %v7032_v62  ;;  %v1282_v62 = vld [vmem:[#allocation2 + $0x638] sm:$0xff]  ;;  %v6976_v63 = vcombine.high %v1150_v56, %v1154_v58  ;;  %v6975_v48 = vcombine.low %v1150_v56, %v1154_v58 }
 0x409   :  { %2966 = vmatpush1.bf16.msra.mxu1 %v7039_v59  ;;  %v1278_v59 = vld [vmem:[#allocation2 + $0x618] sm:$0xff] }
 0x40a   :  { %2967 = vmatprep.subr.bf16.mxu1 %v7160_v41  ;;  %v6983_v41 = vcombine.low %v1158_v39, %v1162_v42  ;;  %v7104_v61 = vcombine.high %v1278_v59, %v1282_v62 }
 0x40b   :  { %2927 = vmatpush2.bf16.msra.mxu0 %v7031_v50  ;;  %v7103_v50 = vcombine.low %v1278_v59, %v1282_v62  ;;  %v3148_v62 = vrot.slane %v8773_v2, %v8782_v47 }
 0x40c   :  { %2928 = vmatprep.subr.bf16.mxu0 %v7024_v0  ;;  %v1351_v0 = vrot.slane %v8771_v1, %v8785_v49 }
 0x40d   :  { %2968 = vmatpush2.bf16.msra.mxu1 %v7159_v6  ;;  %v1347_v6 = vrot.slane %v8771_v1, %v8782_v47 }
 0x40e   :  { %2969 = vmatprep.subr.bf16.mxu1 %v7152_v8 }
 0x40f   :  { %2929 = vmatpush2.bf16.msra.mxu0 %v7023_v13 }
 0x410   :  { %2930 = vmatprep.subr.bf16.mxu0 %v7016_v15 }
 0x411   :  { %2970 = vmatpush2.bf16.msra.mxu1 %v7151_v14 }
 0x412   :  { %2971 = vmatprep.subr.bf16.mxu1 %v7144_v16 }
 0x413   :  { %2931 = vmatpush2.bf16.msra.mxu0 %v7015_v7 }
 0x414   :  { %2932 = vmatprep.subr.bf16.mxu0 %v7008_v21 }
 0x415   :  { %2972 = vmatpush2.bf16.msra.mxu1 %v7143_v20 }
 0x416   :  { %2973 = vmatprep.subr.bf16.mxu1 %v7136_v22 }
 0x417   :  { %2933 = vmatpush2.bf16.msra.mxu0 %v7007_v27 }
 0x418   :  { %2934 = vmatprep.subr.bf16.mxu0 %v7000_v29 }
 0x419   :  { %2974 = vmatpush2.bf16.msra.mxu1 %v7135_v28 }
 0x41a   :  { %2975 = vmatprep.subr.bf16.mxu1 %v7128_v30 }
 0x41b   :  { %2935 = vmatpush2.bf16.msra.mxu0 %v6999_v35 }
 0x41c   :  { %2936 = vmatprep.subr.bf16.mxu0 %v6992_v37 }
 0x41d   :  { %2976 = vmatpush2.bf16.msra.mxu1 %v7127_v36 }
 0x41e   :  { %2977 = vmatprep.subr.bf16.mxu1 %v7120_v38 }
 0x41f   :  { %2937 = vmatpush2.bf16.msra.mxu0 %v6991_v51 }
 0x420   :  { %2938 = vmatprep.subr.bf16.mxu0 %v6984_v40 }
 0x421   :  { %2978 = vmatpush2.bf16.msra.mxu1 %v7119_v53 }
 0x422   :  { %2979 = vmatprep.subr.bf16.mxu1 %v7112_v54 }
 0x423   :  { %2939 = vmatpush2.bf16.msra.mxu0 %v6983_v41 }
 0x424   :  { %2940 = vmatprep.subr.bf16.mxu0 %v6976_v63  ;;  %v3197_v63 = vrot.slane %v8775_v3, %v8782_v47 }
 0x425   :  { %2980 = vmatpush2.bf16.msra.mxu1 %v7111_v60 }
 0x426   :  { %2981 = vmatprep.subr.bf16.mxu1 %v7104_v61  ;;  %v3152_v61 = vrot.slane %v8773_v2, %v8785_v49 }
 0x427   :  { %2941 = vmatpush2.bf16.msra.mxu0 %v6975_v48 }
 0x429   :  { %2982 = vmatpush2.bf16.msra.mxu1 %v7103_v50 }
 0x42a   :  { %v2698_v8 = vpop.f32.mrf.mxu0  ;;  %2943 = vmatmul.mubr.bf16.vlgmr.msra.gmra.mxu0 %v8829_v44 }
 0x42b   :  { %v2699_v9 = vadd.f32 %v2698_v8, %v1347_v6 }
 0x42c   :  { %v2739_v12 = vpop.f32.mrf.mxu1  ;;  %2984 = vmatmul.mubr.bf16.vlgmr.msra.gmra.mxu1 %v8833_v52  ;;  %v2700_v10 = vpop.f32.mrf.mxu0 }
 0x42d   :  { %v2740_v11 = vadd.f32 %v2739_v12, %v2699_v9  ;;  %v2701_v13 = vadd.f32 %v2700_v10, %v1351_v0  ;;  %v3201_v0 = vrot.slane %v8775_v3, %v8785_v49 }
 0x42e   :  { %v2741_v14 = vpop.f32.mrf.mxu1  ;;  %v2702_v15 = vpop.f32.mrf.mxu0 }
 0x42f   :  { %v2992_v16 = vrot.slane %v2740_v11, 4  ;;  %v2742_v17 = vadd.f32 %v2741_v14, %v2701_v13  ;;  %v1355_v14 = vrot.slane %v8771_v1, %v8800_v55 }
 0x430   :  { %v2743_v18 = vpop.f32.mrf.mxu1  ;;  %v2703_v5 = vpop.f32.mrf.mxu0 }
 0x431   :  { %v2993_v19 = vadd.f32 %v2992_v16, %v2740_v11  ;;  %v2998_v7 = vrot.slane %v2742_v17, 4  ;;  %v1359_v16 = vrot.slane %v8771_v1, %v8803_v57 }
 0x432   :  { %v2744_v20 = vpop.f32.mrf.mxu1 }
 0x433   :  { %v2994_v21 = vrot.slane %v2993_v19, 2  ;;  %v2999_v22 = vadd.f32 %v2998_v7, %v2742_v17 }
 0x435   :  { %v2995_v23 = vadd.f32 %v2994_v21, %v2993_v19  ;;  %v3000_v44 = vrot.slane %v2999_v22, 2 }
 0x437   :  { %v2996_v24 = vrot.slane %v2995_v23, 1  ;;  %v3001_v25 = vadd.f32 %v3000_v44, %v2999_v22 }
 0x439   :  { %v2997_v26 = vadd.f32 %v2996_v24, %v2995_v23  ;;  %v3002_v52 = vrot.slane %v3001_v25, 1 }
 0x43b   :  { %v3040_v27 = vmul.f32 0.125, %v2997_v26  ;;  %v3003_v28 = vadd.f32 %v3002_v52, %v3001_v25 }
 0x43d   :  { %v3048_v29 = vsub.f32 %v2740_v11, %v3040_v27  ;;  %v3041_v30 = vmul.f32 0.125, %v3003_v28 }
 0x43f   :  { %v3056_v31 = vmul.f32 %v3048_v29, %v3048_v29  ;;  %v3049_v32 = vsub.f32 %v2742_v17, %v3041_v30 }
 0x441   :  { %v3064_v33 = vrot.slane %v3056_v31, 4  ;;  %v3057_v34 = vmul.f32 %v3049_v32, %v3049_v32 }
 0x443   :  { %v3065_v35 = vadd.f32 %v3064_v33, %v3056_v31  ;;  %v3070_v36 = vrot.slane %v3057_v34, 4 }
 0x445   :  { %v3066_v37 = vrot.slane %v3065_v35, 2  ;;  %v3071_v38 = vadd.f32 %v3070_v36, %v3057_v34 }
 0x447   :  { %v3067_v39 = vadd.f32 %v3066_v37, %v3065_v35  ;;  %v3072_v42 = vrot.slane %v3071_v38, 2 }
 0x449   :  { %v3068_v43 = vrot.slane %v3067_v39, 1  ;;  %v3073_v45 = vadd.f32 %v3072_v42, %v3071_v38 }
 0x44b   :  { %v3069_v51 = vadd.f32 %v3068_v43, %v3067_v39  ;;  %v3074_v53 = vrot.slane %v3073_v45, 1 }
 0x44d   :  { %v3112_v40 = vmul.f32 0.125, %v3069_v51  ;;  %v3075_v54 = vadd.f32 %v3074_v53, %v3073_v45 }
 0x44f   :  { %v3120_v56 = vadd.f32 1e-05, %v3112_v40  ;;  %v3113_v58 = vmul.f32 0.125, %v3075_v54 }
 0x451   :  { %7880 = vrsqrt.f32 %v3120_v56  ;;  %v3121_v59 = vadd.f32 1e-05, %v3113_v58 }
 0x453   :  { %7882 = vrsqrt.f32 %v3121_v59 }
 0x45e   :  { %v7881_v41 = vpop.eup %7880 }
 0x45f   :  { %v3136_v60 = vmul.f32 %v7881_v41, %v3048_v29 }
 0x460   :  { %v7883_v48 = vpop.eup %7882 }
 0x461   :  { %v3185_v50 = vmul.f32 %v3148_v62, %v3136_v60  ;;  %v3137_v6 = vmul.f32 %v7883_v48, %v3049_v32 }
 0x463   :  { %v3234_v8 = vadd.f32 %v3197_v63, %v3185_v50  ;;  %v3186_v9 = vmul.f32 %v3152_v61, %v3137_v6 }
 0x465   :  { %vm3242_vm10 = vcmp.gt.f32.partialorder %v3234_v8, 0.0  ;;  %v3250_v12 = vmul.f32 0.2, %v3234_v8  ;;  %v3235_v10 = vadd.f32 %v3201_v0, %v3186_v9 }
 0x467   :  { %v8861_v11 = vsel %vm3242_vm10, %v3234_v8, %v3250_v12  ;;  %vm3243_vm11 = vcmp.gt.f32.partialorder %v3235_v10, 0.0  ;;  %v3251_v13 = vmul.f32 0.2, %v3235_v10  ;;  %v3156_v8 = vrot.slane %v8773_v2, %v8800_v55 }
 0x469   :  { %v8865_v15 = vsel %vm3243_vm11, %v3235_v10, %v3251_v13  ;;  %v3205_v10 = vrot.slane %v8775_v3, %v8800_v55  ;;  %v3160_v13 = vrot.slane %v8773_v2, %v8803_v57 }
 0x46a   :  { %v2780_v17 = vpop.f32.mrf.mxu0 }
 0x46b   :  { %v2781_v18 = vadd.f32 %v2780_v17, %v1355_v14 }
 0x46c   :  { %v2821_v5 = vpop.f32.mrf.mxu1  ;;  %v2782_v19 = vpop.f32.mrf.mxu0 }
 0x46d   :  { %v2822_v7 = vadd.f32 %v2821_v5, %v2781_v18  ;;  %v2783_v20 = vadd.f32 %v2782_v19, %v1359_v16  ;;  %v3209_v18 = vrot.slane %v8775_v3, %v8803_v57 }
 0x46e   :  { %v2823_v21 = vpop.f32.mrf.mxu1  ;;  %v2784_v22 = vpop.f32.mrf.mxu0 }
 0x46f   :  { %v3004_v23 = vrot.slane %v2822_v7, 4  ;;  %v2824_v44 = vadd.f32 %v2823_v21, %v2783_v20  ;;  %v8881_v22 = vsub.s32 5, %v8779_v46 }
 0x470   :  { %v2825_v24 = vpop.f32.mrf.mxu1  ;;  %v2785_v25 = vpop.f32.mrf.mxu0 }
 0x471   :  { %v3005_v26 = vadd.f32 %v3004_v23, %v2822_v7  ;;  %v3010_v52 = vrot.slane %v2824_v44, 4 }
 0x472   :  { %v2826_v27 = vpop.f32.mrf.mxu1 }
 0x473   :  { %v3006_v28 = vrot.slane %v3005_v26, 2  ;;  %v3011_v29 = vadd.f32 %v3010_v52, %v2824_v44 }
 0x475   :  { %v3007_v30 = vadd.f32 %v3006_v28, %v3005_v26  ;;  %v3012_v31 = vrot.slane %v3011_v29, 2  ;;  %v1367_v26 = vrot.slane %v8771_v1, %v8881_v22 }
 0x477   :  { %v3008_v32 = vrot.slane %v3007_v30, 1  ;;  %v3013_v33 = vadd.f32 %v3012_v31, %v3011_v29 }
 0x479   :  { %v3009_v34 = vadd.f32 %v3008_v32, %v3007_v30  ;;  %v3014_v35 = vrot.slane %v3013_v33, 1 }
 0x47b   :  { %v3042_v36 = vmul.f32 0.125, %v3009_v34  ;;  %v3015_v37 = vadd.f32 %v3014_v35, %v3013_v33 }
 0x47d   :  { %v3050_v38 = vsub.f32 %v2822_v7, %v3042_v36  ;;  %v3043_v39 = vmul.f32 0.125, %v3015_v37  ;;  %v8878_v7 = vsub.s32 4, %v8779_v46 }
 0x47f   :  { %v3058_v42 = vmul.f32 %v3050_v38, %v3050_v38  ;;  %v3051_v43 = vsub.f32 %v2824_v44, %v3043_v39  ;;  %v1363_v24 = vrot.slane %v8771_v1, %v8878_v7 }
 0x481   :  { %v3076_v45 = vrot.slane %v3058_v42, 4  ;;  %v3059_v51 = vmul.f32 %v3051_v43, %v3051_v43 }
 0x483   :  { %v3077_v53 = vadd.f32 %v3076_v45, %v3058_v42  ;;  %v3082_v40 = vrot.slane %v3059_v51, 4 }
 0x485   :  { %v3078_v54 = vrot.slane %v3077_v53, 2  ;;  %v3083_v56 = vadd.f32 %v3082_v40, %v3059_v51 }
 0x487   :  { %v3079_v58 = vadd.f32 %v3078_v54, %v3077_v53  ;;  %v3084_v59 = vrot.slane %v3083_v56, 2 }
 0x489   :  { %v3080_v62 = vrot.slane %v3079_v58, 1  ;;  %v3085_v41 = vadd.f32 %v3084_v59, %v3083_v56 }
 0x48b   :  { %v3081_v60 = vadd.f32 %v3080_v62, %v3079_v58  ;;  %v3086_v63 = vrot.slane %v3085_v41, 1 }
 0x48d   :  { %v3114_v61 = vmul.f32 0.125, %v3081_v60  ;;  %v3087_v48 = vadd.f32 %v3086_v63, %v3085_v41 }
 0x48f   :  { %v3122_v50 = vadd.f32 1e-05, %v3114_v61  ;;  %v3115_v6 = vmul.f32 0.125, %v3087_v48 }
 0x491   :  { %7884 = vrsqrt.f32 %v3122_v50  ;;  %v3123_v0 = vadd.f32 1e-05, %v3115_v6 }
 0x493   :  { %7886 = vrsqrt.f32 %v3123_v0 }
 0x49e   :  { %v7885_v9 = vpop.eup %7884 }
 0x49f   :  { %v3138_v12 = vmul.f32 %v7885_v9, %v3050_v38 }
 0x4a0   :  { %v7887_v14 = vpop.eup %7886 }
 0x4a1   :  { %v3187_v16 = vmul.f32 %v3156_v8, %v3138_v12  ;;  %v3139_v17 = vmul.f32 %v7887_v14, %v3051_v43 }
 0x4a3   :  { %v3236_v5 = vadd.f32 %v3205_v10, %v3187_v16  ;;  %v3188_v19 = vmul.f32 %v3160_v13, %v3139_v17 }
 0x4a5   :  { %vm3244_vm12 = vcmp.gt.f32.partialorder %v3236_v5, 0.0  ;;  %v3252_v20 = vmul.f32 0.2, %v3236_v5  ;;  %v3237_v21 = vadd.f32 %v3209_v18, %v3188_v19 }
 0x4a7   :  { %v8883_v23 = vsel %vm3244_vm12, %v3236_v5, %v3252_v20  ;;  %vm3245_vm13 = vcmp.gt.f32.partialorder %v3237_v21, 0.0  ;;  %v3253_v44 = vmul.f32 0.2, %v3237_v21 }
 0x4a9   :  { %v8887_v25 = vsel %vm3245_vm13, %v3237_v21, %v3253_v44  ;;  %v3164_v44 = vrot.slane %v8773_v2, %v8878_v7 }
 0x4aa   :  { %v2862_v52 = vpop.f32.mrf.mxu0 }
 0x4ab   :  { %v2863_v27 = vadd.f32 %v2862_v52, %v1363_v24 }
 0x4ac   :  { %v2903_v28 = vpop.f32.mrf.mxu1  ;;  %v2864_v29 = vpop.f32.mrf.mxu0 }
 0x4ad   :  { %v2904_v30 = vadd.f32 %v2903_v28, %v2863_v27  ;;  %v2865_v31 = vadd.f32 %v2864_v29, %v1367_v26  ;;  %v3213_v26 = vrot.slane %v8775_v3, %v8878_v7  ;;  %v3168_v27 = vrot.slane %v8773_v2, %v8881_v22 }
 0x4ae   :  { %v2905_v32 = vpop.f32.mrf.mxu1  ;;  %v2866_v33 = vpop.f32.mrf.mxu0 }
 0x4af   :  { %v3016_v34 = vrot.slane %v2904_v30, 4  ;;  %v2906_v35 = vadd.f32 %v2905_v32, %v2865_v31 }
 0x4b0   :  { %v2907_v36 = vpop.f32.mrf.mxu1  ;;  %v2867_v37 = vpop.f32.mrf.mxu0 }
 0x4b1   :  { %v3017_v38 = vadd.f32 %v3016_v34, %v2904_v30  ;;  %v3022_v39 = vrot.slane %v2906_v35, 4  ;;  %v8900_v34 = vsub.s32 6, %v8779_v46  ;;  %v8903_v37 = vsub.s32 7, %v8779_v46 }
 0x4b2   :  { %v2908_v42 = vpop.f32.mrf.mxu1 }
 0x4b3   :  { %v3018_v43 = vrot.slane %v3017_v38, 2  ;;  %v3023_v45 = vadd.f32 %v3022_v39, %v2906_v35  ;;  %v1371_v42 = vrot.slane %v8771_v1, %v8900_v34 }
 0x4b5   :  { %v3019_v51 = vadd.f32 %v3018_v43, %v3017_v38  ;;  %v3024_v53 = vrot.slane %v3023_v45, 2 }
 0x4b7   :  { %v3020_v40 = vrot.slane %v3019_v51, 1  ;;  %v3025_v54 = vadd.f32 %v3024_v53, %v3023_v45  ;;  %v1375_v45 = vrot.slane %v8771_v1, %v8903_v37 }
 0x4b9   :  { %v3021_v56 = vadd.f32 %v3020_v40, %v3019_v51  ;;  %v3026_v58 = vrot.slane %v3025_v54, 1 }
 0x4bb   :  { %v3044_v59 = vmul.f32 0.125, %v3021_v56  ;;  %v3027_v62 = vadd.f32 %v3026_v58, %v3025_v54 }
 0x4bd   :  { %v3052_v41 = vsub.f32 %v2904_v30, %v3044_v59  ;;  %v3045_v60 = vmul.f32 0.125, %v3027_v62  ;;  %v3217_v30 = vrot.slane %v8775_v3, %v8881_v22 }
 0x4bf   :  { %v3060_v63 = vmul.f32 %v3052_v41, %v3052_v41  ;;  %v3053_v61 = vsub.f32 %v2906_v35, %v3045_v60 }
 0x4c1   :  { %v3088_v48 = vrot.slane %v3060_v63, 4  ;;  %v3061_v50 = vmul.f32 %v3053_v61, %v3053_v61 }
 0x4c3   :  { %v3089_v6 = vadd.f32 %v3088_v48, %v3060_v63  ;;  %v3094_v0 = vrot.slane %v3061_v50, 4 }
 0x4c5   :  { %v3090_v8 = vrot.slane %v3089_v6, 2  ;;  %v3095_v9 = vadd.f32 %v3094_v0, %v3061_v50 }
 0x4c7   :  { %v3091_v12 = vadd.f32 %v3090_v8, %v3089_v6  ;;  %v3096_v10 = vrot.slane %v3095_v9, 2 }
 0x4c9   :  { %v3092_v13 = vrot.slane %v3091_v12, 1  ;;  %v3097_v14 = vadd.f32 %v3096_v10, %v3095_v9 }
 0x4cb   :  { %v3093_v16 = vadd.f32 %v3092_v13, %v3091_v12  ;;  %v3098_v17 = vrot.slane %v3097_v14, 1 }
 0x4cd   :  { %v3116_v18 = vmul.f32 0.125, %v3093_v16  ;;  %v3099_v5 = vadd.f32 %v3098_v17, %v3097_v14 }
 0x4cf   :  { %v3124_v19 = vadd.f32 1e-05, %v3116_v18  ;;  %v3117_v20 = vmul.f32 0.125, %v3099_v5 }
 0x4d1   :  { %7888 = vrsqrt.f32 %v3124_v19  ;;  %v3125_v21 = vadd.f32 1e-05, %v3117_v20 }
 0x4d3   :  { %7890 = vrsqrt.f32 %v3125_v21 }
 0x4de   :  { %v7889_v24 = vpop.eup %7888 }
 0x4df   :  { %v3140_v52 = vmul.f32 %v7889_v24, %v3052_v41 }
 0x4e0   :  { %v7891_v28 = vpop.eup %7890 }
 0x4e1   :  { %v3189_v29 = vmul.f32 %v3164_v44, %v3140_v52  ;;  %v3141_v31 = vmul.f32 %v7891_v28, %v3053_v61 }
 0x4e3   :  { %v3238_v32 = vadd.f32 %v3213_v26, %v3189_v29  ;;  %v3190_v33 = vmul.f32 %v3168_v27, %v3141_v31 }
 0x4e5   :  { %vm3246_vm14 = vcmp.gt.f32.partialorder %v3238_v32, 0.0  ;;  %v3254_v35 = vmul.f32 0.2, %v3238_v32  ;;  %v3239_v36 = vadd.f32 %v3217_v30, %v3190_v33 }
 0x4e7   :  { %v8905_v38 = vsel %vm3246_vm14, %v3238_v32, %v3254_v35  ;;  %vm3247_vm15 = vcmp.gt.f32.partialorder %v3239_v36, 0.0  ;;  %v3255_v39 = vmul.f32 0.2, %v3239_v36 }
 0x4e9   :  { %v8909_v43 = vsel %vm3247_vm15, %v3239_v36, %v3255_v39 }
 0x4ea   :  { %v2944_v51 = vpop.f32.mrf.mxu0 }
 0x4eb   :  { %v2945_v53 = vadd.f32 %v2944_v51, %v1371_v42 }
 0x4ec   :  { %v2985_v40 = vpop.f32.mrf.mxu1  ;;  %v2946_v54 = vpop.f32.mrf.mxu0 }
 0x4ed   :  { %v2986_v56 = vadd.f32 %v2985_v40, %v2945_v53  ;;  %v2947_v58 = vadd.f32 %v2946_v54, %v1375_v45  ;;  %v3172_v45 = vrot.slane %v8773_v2, %v8900_v34  ;;  %v3221_v53 = vrot.slane %v8775_v3, %v8900_v34 }
 0x4ee   :  { %v2987_v46 = vpop.f32.mrf.mxu1  ;;  %v2948_v59 = vpop.f32.mrf.mxu0  ;;  %v3176_v54 = vrot.slane %v8773_v2, %v8903_v37 }
 0x4ef   :  { %v3028_v62 = vrot.slane %v2986_v56, 4  ;;  %v2988_v41 = vadd.f32 %v2987_v46, %v2947_v58  ;;  %v3225_v46 = vrot.slane %v8775_v3, %v8903_v37 }
 0x4f0   :  { %v2989_v60 = vpop.f32.mrf.mxu1  ;;  %v2949_v63 = vpop.f32.mrf.mxu0 }
 0x4f1   :  { %v3029_v61 = vadd.f32 %v3028_v62, %v2986_v56  ;;  %v3034_v48 = vrot.slane %v2988_v41, 4 }
 0x4f2   :  { %v2990_v50 = vpop.f32.mrf.mxu1 }
 0x4f3   :  { %v3030_v6 = vrot.slane %v3029_v61, 2  ;;  %v3035_v0 = vadd.f32 %v3034_v48, %v2988_v41 }
 0x4f5   :  { %v3031_v8 = vadd.f32 %v3030_v6, %v3029_v61  ;;  %v3036_v9 = vrot.slane %v3035_v0, 2 }
 0x4f7   :  { %v3032_v1 = vrot.slane %v3031_v8, 1  ;;  %v3037_v12 = vadd.f32 %v3036_v9, %v3035_v0 }
 0x4f9   :  { %v3033_v10 = vadd.f32 %v3032_v1, %v3031_v8  ;;  %v3038_v13 = vrot.slane %v3037_v12, 1 }
 0x4fb   :  { %v3046_v14 = vmul.f32 0.125, %v3033_v10  ;;  %v3039_v16 = vadd.f32 %v3038_v13, %v3037_v12 }
 0x4fd   :  { %v3054_v17 = vsub.f32 %v2986_v56, %v3046_v14  ;;  %v3047_v18 = vmul.f32 0.125, %v3039_v16 }
 0x4ff   :  { %v3062_v5 = vmul.f32 %v3054_v17, %v3054_v17  ;;  %v3055_v19 = vsub.f32 %v2988_v41, %v3047_v18 }
 0x501   :  { %v3100_v20 = vrot.slane %v3062_v5, 4  ;;  %v3063_v21 = vmul.f32 %v3055_v19, %v3055_v19 }
 0x503   :  { %v3101_v44 = vadd.f32 %v3100_v20, %v3062_v5  ;;  %v3106_v24 = vrot.slane %v3063_v21, 4 }
 0x505   :  { %v3102_v26 = vrot.slane %v3101_v44, 2  ;;  %v3107_v52 = vadd.f32 %v3106_v24, %v3063_v21 }
 0x507   :  { %v3103_v27 = vadd.f32 %v3102_v26, %v3101_v44  ;;  %v3108_v28 = vrot.slane %v3107_v52, 2 }
 0x509   :  { %v3104_v29 = vrot.slane %v3103_v27, 1  ;;  %v3109_v30 = vadd.f32 %v3108_v28, %v3107_v52 }
 0x50b   :  { %v3105_v31 = vadd.f32 %v3104_v29, %v3103_v27  ;;  %v3110_v32 = vrot.slane %v3109_v30, 1 }
 0x50d   :  { %v3118_v33 = vmul.f32 0.125, %v3105_v31  ;;  %v3111_v35 = vadd.f32 %v3110_v32, %v3109_v30 }
 0x50f   :  { %v3126_v36 = vadd.f32 1e-05, %v3118_v33  ;;  %v3119_v39 = vmul.f32 0.125, %v3111_v35 }
 0x511   :  { %7892 = vrsqrt.f32 %v3126_v36  ;;  %v3127_v42 = vadd.f32 1e-05, %v3119_v39 }
 0x513   :  { %7894 = vrsqrt.f32 %v3127_v42 }
 0x51e   :  { %v7893_v51 = vpop.eup %7892 }
 0x51f   :  { %v3142_v40 = vmul.f32 %v7893_v51, %v3054_v17 }
 0x520   :  { %v7895_v56 = vpop.eup %7894 }
 0x521   :  { %v3191_v58 = vmul.f32 %v3172_v45, %v3142_v40  ;;  %v3143_v59 = vmul.f32 %v7895_v56, %v3055_v19 }
 0x523   :  { %v3240_v62 = vadd.f32 %v3221_v53, %v3191_v58  ;;  %v3192_v41 = vmul.f32 %v3176_v54, %v3143_v59 }
 0x525   :  { %vm3248_vm0 = vcmp.gt.f32.partialorder %v3240_v62, 0.0  ;;  %v3256_v60 = vmul.f32 0.2, %v3240_v62  ;;  %v3241_v63 = vadd.f32 %v3225_v46, %v3192_v41 }
 0x527   :  { %v8921_v61 = vsel %vm3248_vm0, %v3240_v62, %v3256_v60  ;;  %vm3249_vm1 = vcmp.gt.f32.partialorder %v3241_v63, 0.0  ;;  %v3257_v48 = vmul.f32 0.2, %v3241_v63 }
 0x529   :  { %v8923_v50 = vsel %vm3249_vm1, %v3241_v63, %v3257_v48 }
 0x52a   :  { %8698 = dma.done.wait [#allocation4 + $0x1], 57344 }
 0x52b   :  { %8699 = vsyncadd [#allocation4 + $0x1], 4294909952  ;;  %v8927_v2 = vpack.c.bf16 %v8865_v15, %v8865_v15  ;;  %v8931_v3 = vpack.c.bf16 %v8887_v25, %v8887_v25  ;;  %v7896_v37 = vld [vmem:[#allocation3 + $0x18c] ss:$28 sps:$4 sm:$0xff]   ;;  %v7902_v9 = vld [vmem:[#allocation3 + $0x154] ss:$28 sps:$4 sm:$0xff]  }
 0x52c   :  { %v7898_v6 = vld [vmem:[#allocation3 + $0x50c] ss:$28 sps:$4 sm:$0xff]   ;;  %6130 = vmatprep.subr.bf16.mxu0 %v7896_v37  ;;  %v7904_v1 = vld [vmem:[#allocation3 + $0x4d4] ss:$28 sps:$4 sm:$0xff]   ;;  %v7908_v25 = vld [vmem:[#allocation3 + $0x11c] ss:$28 sps:$4 sm:$0xff]  }
 0x52d   :  { %6162 = vmatprep.mubr.bf16.mxu0 %v8927_v2  ;;  %6203 = vmatprep.mubr.bf16.mxu1 %v8931_v3  ;;  %v7900_v0 = vld [vmem:[#allocation3 + $0x188] ss:$28 sps:$4 sm:$0xff]   ;;  %v7906_v15 = vld [vmem:[#allocation3 + $0x150] ss:$28 sps:$4 sm:$0xff]   ;;  %v7910_v10 = vld [vmem:[#allocation3 + $0x49c] ss:$28 sps:$4 sm:$0xff]  }
 0x52e   :  { %v7901_v8 = vld [vmem:[#allocation3 + $0x508] ss:$28 sps:$4 sm:$0xff]   ;;  %6171 = vmatprep.subr.bf16.mxu1 %v7898_v6  ;;  %6131 = vmatpush1.bf16.msra.mxu0 %v7900_v0  ;;  %v7907_v12 = vld [vmem:[#allocation3 + $0x4d0] ss:$28 sps:$4 sm:$0xff]   ;;  %v7912_v13 = vld [vmem:[#allocation3 + $0x118] ss:$28 sps:$4 sm:$0xff]  }
 0x52f   :  { %6172 = vmatpush1.bf16.msra.mxu1 %v7901_v8  ;;  %6132 = vmatprep.subr.bf16.mxu0 %v7902_v9  ;;  %v7913_v14 = vld [vmem:[#allocation3 + $0x498] ss:$28 sps:$4 sm:$0xff]   ;;  %v7914_v16 = vld [vmem:[#allocation3 + $0xe4] ss:$28 sps:$4 sm:$0xff]   ;;  %v7920_v19 = vld [vmem:[#allocation3 + $0xac] ss:$28 sps:$4 sm:$0xff]  }
 0x530   :  { %6173 = vmatprep.subr.bf16.mxu1 %v7904_v1  ;;  %v7916_v17 = vld [vmem:[#allocation3 + $0x464] ss:$28 sps:$4 sm:$0xff]   ;;  %v7922_v20 = vld [vmem:[#allocation3 + $0x42c] ss:$28 sps:$4 sm:$0xff]   ;;  %v7926_v24 = vld [vmem:[#allocation3 + $0x74] ss:$28 sps:$4 sm:$0xff]  }
 0x531   :  { %v7918_v18 = vld [vmem:[#allocation3 + $0xe0] ss:$28 sps:$4 sm:$0xff]   ;;  %v7924_v21 = vld [vmem:[#allocation3 + $0xa8] ss:$28 sps:$4 sm:$0xff]   ;;  %v7928_v26 = vld [vmem:[#allocation3 + $0x3f4] ss:$28 sps:$4 sm:$0xff]  }
 0x532   :  { %6133 = vmatpush1.bf16.msra.mxu0 %v7906_v15  ;;  %v7919_v5 = vld [vmem:[#allocation3 + $0x460] ss:$28 sps:$4 sm:$0xff]   ;;  %v7925_v44 = vld [vmem:[#allocation3 + $0x428] ss:$28 sps:$4 sm:$0xff]   ;;  %v7930_v52 = vld [vmem:[#allocation3 + $0x70] ss:$28 sps:$4 sm:$0xff]  }
 0x533   :  { %6174 = vmatpush1.bf16.msra.mxu1 %v7907_v12  ;;  %6134 = vmatprep.subr.bf16.mxu0 %v7908_v25  ;;  %v7931_v27 = vld [vmem:[#allocation3 + $0x3f0] ss:$28 sps:$4 sm:$0xff]   ;;  %v7932_v28 = vld [vmem:[#allocation3 + $0x3c] ss:$28 sps:$4 sm:$0xff]   ;;  %v7938_v32 = vld [vmem:[#allocation3 + $0x4] ss:$28 sps:$4 sm:$0xff]  }
 0x534   :  { %6175 = vmatprep.subr.bf16.mxu1 %v7910_v10  ;;  %v7934_v29 = vld [vmem:[#allocation3 + $0x3bc] ss:$28 sps:$4 sm:$0xff]   ;;  %v7940_v33 = vld [vmem:[#allocation3 + $0x384] ss:$28 sps:$4 sm:$0xff]   ;;  %v7944_v39 = vld [vmem:[#allocation3 + $0x34c] ss:$28 sps:$4 sm:$0xff]  }
 0x535   :  { %v7936_v30 = vld [vmem:[#allocation3 + $0x38] ss:$28 sps:$4 sm:$0xff]   ;;  %v7942_v35 = vld [vmem:[#allocation3] ss:$28 sps:$4 sm:$0xff]   ;;  %v7946_v42 = vld [vmem:[#allocation3 + $0x6cc] ss:$28 sps:$4 sm:$0xff]  }
 0x536   :  { %6135 = vmatpush1.bf16.msra.mxu0 %v7912_v13  ;;  %v7937_v31 = vld [vmem:[#allocation3 + $0x3b8] ss:$28 sps:$4 sm:$0xff]   ;;  %v7943_v36 = vld [vmem:[#allocation3 + $0x380] ss:$28 sps:$4 sm:$0xff]   ;;  %v7948_v45 = vld [vmem:[#allocation3 + $0x348] ss:$28 sps:$4 sm:$0xff]  }
 0x537   :  { %6176 = vmatpush1.bf16.msra.mxu1 %v7913_v14  ;;  %6136 = vmatprep.subr.bf16.mxu0 %v7914_v16  ;;  %v7949_v51 = vld [vmem:[#allocation3 + $0x6c8] ss:$28 sps:$4 sm:$0xff]   ;;  %v7950_v53 = vld [vmem:[#allocation3 + $0x314] ss:$28 sps:$4 sm:$0xff]   ;;  %v7956_v58 = vld [vmem:[#allocation3 + $0x2dc] ss:$28 sps:$4 sm:$0xff]  }
 0x538   :  { %6177 = vmatprep.subr.bf16.mxu1 %v7916_v17  ;;  %v7952_v40 = vld [vmem:[#allocation3 + $0x694] ss:$28 sps:$4 sm:$0xff]   ;;  %v7958_v46 = vld [vmem:[#allocation3 + $0x65c] ss:$28 sps:$4 sm:$0xff]   ;;  %v7962_v41 = vld [vmem:[#allocation3 + $0x2a4] ss:$28 sps:$4 sm:$0xff]  }
 0x539   :  { %v7954_v54 = vld [vmem:[#allocation3 + $0x310] ss:$28 sps:$4 sm:$0xff]   ;;  %v7960_v59 = vld [vmem:[#allocation3 + $0x2d8] ss:$28 sps:$4 sm:$0xff]   ;;  %v7964_v60 = vld [vmem:[#allocation3 + $0x624] ss:$28 sps:$4 sm:$0xff]  }
 0x53a   :  { %6137 = vmatpush1.bf16.msra.mxu0 %v7918_v18  ;;  %v7955_v56 = vld [vmem:[#allocation3 + $0x690] ss:$28 sps:$4 sm:$0xff]   ;;  %v7961_v62 = vld [vmem:[#allocation3 + $0x658] ss:$28 sps:$4 sm:$0xff]   ;;  %v7966_v63 = vld [vmem:[#allocation3 + $0x2a0] ss:$28 sps:$4 sm:$0xff]  }
 0x53b   :  { %6178 = vmatpush1.bf16.msra.mxu1 %v7919_v5  ;;  %6138 = vmatprep.subr.bf16.mxu0 %v7920_v19  ;;  %v7967_v48 = vld [vmem:[#allocation3 + $0x620] ss:$28 sps:$4 sm:$0xff]   ;;  %v7968_v37 = vld [vmem:[#allocation3 + $0x26c] ss:$28 sps:$4 sm:$0xff]   ;;  %v7974_v9 = vld [vmem:[#allocation3 + $0x234] ss:$28 sps:$4 sm:$0xff]  }
 0x53c   :  { %6179 = vmatprep.subr.bf16.mxu1 %v7922_v20  ;;  %v7970_v6 = vld [vmem:[#allocation3 + $0x5ec] ss:$28 sps:$4 sm:$0xff]   ;;  %v7976_v1 = vld [vmem:[#allocation3 + $0x5b4] ss:$28 sps:$4 sm:$0xff]   ;;  %v7980_v25 = vld [vmem:[#allocation3 + $0x1fc] ss:$28 sps:$4 sm:$0xff]  }
 0x53d   :  { %v7972_v0 = vld [vmem:[#allocation3 + $0x268] ss:$28 sps:$4 sm:$0xff]   ;;  %v7978_v15 = vld [vmem:[#allocation3 + $0x230] ss:$28 sps:$4 sm:$0xff]   ;;  %v7982_v10 = vld [vmem:[#allocation3 + $0x57c] ss:$28 sps:$4 sm:$0xff]  }
 0x53e   :  { %6139 = vmatpush1.bf16.msra.mxu0 %v7924_v21  ;;  %v7973_v8 = vld [vmem:[#allocation3 + $0x5e8] ss:$28 sps:$4 sm:$0xff]   ;;  %v7979_v12 = vld [vmem:[#allocation3 + $0x5b0] ss:$28 sps:$4 sm:$0xff]   ;;  %v7984_v13 = vld [vmem:[#allocation3 + $0x1f8] ss:$28 sps:$4 sm:$0xff]   ;;  %v8937_v21 = vpack.c.bf16 %v8861_v11, %v8861_v11  ;;  %v8949_v11 = vpack.c.bf16 %v8923_v50, %v8923_v50 }
 0x53f   :  { %6180 = vmatpush1.bf16.msra.mxu1 %v7925_v44  ;;  %6140 = vmatprep.subr.bf16.mxu0 %v7926_v24  ;;  %v7985_v14 = vld [vmem:[#allocation3 + $0x578] ss:$28 sps:$4 sm:$0xff]   ;;  %v7986_v16 = vld [vmem:[#allocation3 + $0x1c4] ss:$28 sps:$4 sm:$0xff]   ;;  %v7994_v19 = vld [vmem:[#allocation3 + $0x88c] ss:$28 sps:$4 sm:$0xff]   ;;  %v8941_v44 = vpack.c.bf16 %v8883_v23, %v8883_v23 }
 0x540   :  { %6181 = vmatprep.subr.bf16.mxu1 %v7928_v26  ;;  %v7988_v17 = vld [vmem:[#allocation3 + $0x544] ss:$28 sps:$4 sm:$0xff]   ;;  %v7997_v20 = vld [vmem:[#allocation3 + $0xc0c] ss:$28 sps:$4 sm:$0xff]  }
 0x541   :  { %v7990_v18 = vld [vmem:[#allocation3 + $0x1c0] ss:$28 sps:$4 sm:$0xff]   ;;  %v7992_v24 = vld [vmem:[#allocation3 + $0x888] ss:$28 sps:$4 sm:$0xff]   ;;  %v7998_v23 = vld [vmem:[#allocation3 + $0x850] ss:$28 sps:$4 sm:$0xff]  }
 0x542   :  { %6141 = vmatpush1.bf16.msra.mxu0 %v7930_v52  ;;  %v7991_v5 = vld [vmem:[#allocation3 + $0x540] ss:$28 sps:$4 sm:$0xff]   ;;  %v7995_v26 = vld [vmem:[#allocation3 + $0xc08] ss:$28 sps:$4 sm:$0xff]   ;;  %v8000_v52 = vld [vmem:[#allocation3 + $0x854] ss:$28 sps:$4 sm:$0xff]  }
 0x543   :  { %6182 = vmatpush1.bf16.msra.mxu1 %v7931_v27  ;;  %6142 = vmatprep.subr.bf16.mxu0 %v7932_v28  ;;  %v8003_v27 = vld [vmem:[#allocation3 + $0xbd4] ss:$28 sps:$4 sm:$0xff]   ;;  %v8945_v28 = vpack.c.bf16 %v8909_v43, %v8909_v43  ;;  %v8012_v50 = vld [vmem:[#allocation3 + $0x7e4] ss:$28 sps:$4 sm:$0xff]  }
 0x544   :  { %6183 = vmatprep.subr.bf16.mxu1 %v7934_v29  ;;  %v8001_v29 = vld [vmem:[#allocation3 + $0xbd0] ss:$28 sps:$4 sm:$0xff]   ;;  %v8004_v43 = vld [vmem:[#allocation3 + $0x818] ss:$28 sps:$4 sm:$0xff]  }
 0x546   :  { %6143 = vmatpush1.bf16.msra.mxu0 %v7936_v30  ;;  %v8006_v30 = vld [vmem:[#allocation3 + $0x81c] ss:$28 sps:$4 sm:$0xff]  }
 0x547   :  { %6184 = vmatpush1.bf16.msra.mxu1 %v7937_v31  ;;  %6144 = vmatprep.subr.bf16.mxu0 %v7938_v32  ;;  %v8009_v31 = vld [vmem:[#allocation3 + $0xb9c] ss:$28 sps:$4 sm:$0xff]  }
 0x548   :  { %6185 = vmatprep.subr.bf16.mxu1 %v7940_v33  ;;  %v8007_v32 = vld [vmem:[#allocation3 + $0xb98] ss:$28 sps:$4 sm:$0xff]   ;;  %v8015_v33 = vld [vmem:[#allocation3 + $0xb64] ss:$28 sps:$4 sm:$0xff]  }
 0x54a   :  { %6145 = vmatpush1.bf16.msra.mxu0 %v7942_v35  ;;  %v8010_v35 = vld [vmem:[#allocation3 + $0x7e0] ss:$28 sps:$4 sm:$0xff]  }
 0x54b   :  { %6186 = vmatpush1.bf16.msra.mxu1 %v7943_v36  ;;  %6146 = vmatprep.subr.bf16.mxu0 %v7944_v39  ;;  %v8013_v36 = vld [vmem:[#allocation3 + $0xb60] ss:$28 sps:$4 sm:$0xff]   ;;  %v8018_v39 = vld [vmem:[#allocation3 + $0x7ac] ss:$28 sps:$4 sm:$0xff]  }
 0x54c   :  { %6187 = vmatprep.subr.bf16.mxu1 %v7946_v42  ;;  %v8021_v42 = vld [vmem:[#allocation3 + $0xb2c] ss:$28 sps:$4 sm:$0xff]  }
 0x54e   :  { %6147 = vmatpush2.bf16.msra.mxu0 %v7948_v45  ;;  %v8016_v45 = vld [vmem:[#allocation3 + $0x7a8] ss:$28 sps:$4 sm:$0xff]  }
 0x54f   :  { %6188 = vmatpush2.bf16.msra.mxu1 %v7949_v51  ;;  %6148 = vmatprep.subr.bf16.mxu0 %v7950_v53  ;;  %v8019_v51 = vld [vmem:[#allocation3 + $0xb28] ss:$28 sps:$4 sm:$0xff]   ;;  %v8024_v53 = vld [vmem:[#allocation3 + $0x774] ss:$28 sps:$4 sm:$0xff]  }
 0x550   :  { %6189 = vmatprep.subr.bf16.mxu1 %v7952_v40  ;;  %v8027_v40 = vld [vmem:[#allocation3 + $0xaf4] ss:$28 sps:$4 sm:$0xff]  }
 0x552   :  { %6149 = vmatpush2.bf16.msra.mxu0 %v7954_v54  ;;  %v8022_v54 = vld [vmem:[#allocation3 + $0x770] ss:$28 sps:$4 sm:$0xff]  }
 0x553   :  { %6190 = vmatpush2.bf16.msra.mxu1 %v7955_v56  ;;  %6150 = vmatprep.subr.bf16.mxu0 %v7956_v58  ;;  %v8025_v56 = vld [vmem:[#allocation3 + $0xaf0] ss:$28 sps:$4 sm:$0xff]   ;;  %v8030_v58 = vld [vmem:[#allocation3 + $0x73c] ss:$28 sps:$4 sm:$0xff]  }
 0x554   :  { %6191 = vmatprep.subr.bf16.mxu1 %v7958_v46  ;;  %v8033_v46 = vld [vmem:[#allocation3 + $0xabc] ss:$28 sps:$4 sm:$0xff]  }
 0x556   :  { %6151 = vmatpush2.bf16.msra.mxu0 %v7960_v59  ;;  %v8028_v59 = vld [vmem:[#allocation3 + $0x738] ss:$28 sps:$4 sm:$0xff]  }
 0x557   :  { %6192 = vmatpush2.bf16.msra.mxu1 %v7961_v62  ;;  %6152 = vmatprep.subr.bf16.mxu0 %v7962_v41  ;;  %v8031_v62 = vld [vmem:[#allocation3 + $0xab8] ss:$28 sps:$4 sm:$0xff]   ;;  %v8036_v41 = vld [vmem:[#allocation3 + $0x704] ss:$28 sps:$4 sm:$0xff]  }
 0x558   :  { %6193 = vmatprep.subr.bf16.mxu1 %v7964_v60  ;;  %v8039_v60 = vld [vmem:[#allocation3 + $0xa84] ss:$28 sps:$4 sm:$0xff]  }
 0x55a   :  { %6153 = vmatpush2.bf16.msra.mxu0 %v7966_v63  ;;  %v8034_v63 = vld [vmem:[#allocation3 + $0x700] ss:$28 sps:$4 sm:$0xff]  }
 0x55b   :  { %6194 = vmatpush2.bf16.msra.mxu1 %v7967_v48  ;;  %6154 = vmatprep.subr.bf16.mxu0 %v7968_v37  ;;  %v8037_v48 = vld [vmem:[#allocation3 + $0xa80] ss:$28 sps:$4 sm:$0xff]   ;;  %v8042_v37 = vld [vmem:[#allocation3 + $0xa4c] ss:$28 sps:$4 sm:$0xff]  }
 0x55c   :  { %6195 = vmatprep.subr.bf16.mxu1 %v7970_v6  ;;  %v8045_v6 = vld [vmem:[#allocation3 + $0xdcc] ss:$28 sps:$4 sm:$0xff]  }
 0x55e   :  { %6155 = vmatpush2.bf16.msra.mxu0 %v7972_v0  ;;  %v8040_v0 = vld [vmem:[#allocation3 + $0xa48] ss:$28 sps:$4 sm:$0xff]  }
 0x55f   :  { %6196 = vmatpush2.bf16.msra.mxu1 %v7973_v8  ;;  %6156 = vmatprep.subr.bf16.mxu0 %v7974_v9  ;;  %v8043_v8 = vld [vmem:[#allocation3 + $0xdc8] ss:$28 sps:$4 sm:$0xff]   ;;  %v8048_v9 = vld [vmem:[#allocation3 + $0xa14] ss:$28 sps:$4 sm:$0xff]  }
 0x560   :  { %6197 = vmatprep.subr.bf16.mxu1 %v7976_v1  ;;  %v8051_v1 = vld [vmem:[#allocation3 + $0xd94] ss:$28 sps:$4 sm:$0xff]  }
 0x562   :  { %6157 = vmatpush2.bf16.msra.mxu0 %v7978_v15  ;;  %v8046_v15 = vld [vmem:[#allocation3 + $0xa10] ss:$28 sps:$4 sm:$0xff]  }
 0x563   :  { %6198 = vmatpush2.bf16.msra.mxu1 %v7979_v12  ;;  %6158 = vmatprep.subr.bf16.mxu0 %v7980_v25  ;;  %v8049_v12 = vld [vmem:[#allocation3 + $0xd90] ss:$28 sps:$4 sm:$0xff]   ;;  %v8054_v25 = vld [vmem:[#allocation3 + $0x9dc] ss:$28 sps:$4 sm:$0xff]  }
 0x564   :  { %6199 = vmatprep.subr.bf16.mxu1 %v7982_v10  ;;  %v8057_v10 = vld [vmem:[#allocation3 + $0xd5c] ss:$28 sps:$4 sm:$0xff]  }
 0x566   :  { %6159 = vmatpush2.bf16.msra.mxu0 %v7984_v13  ;;  %v8052_v13 = vld [vmem:[#allocation3 + $0x9d8] ss:$28 sps:$4 sm:$0xff]  }
 0x567   :  { %6200 = vmatpush2.bf16.msra.mxu1 %v7985_v14  ;;  %6160 = vmatprep.subr.bf16.mxu0 %v7986_v16  ;;  %v8055_v14 = vld [vmem:[#allocation3 + $0xd58] ss:$28 sps:$4 sm:$0xff]   ;;  %v8060_v16 = vld [vmem:[#allocation3 + $0x9a4] ss:$28 sps:$4 sm:$0xff]  }
 0x568   :  { %6201 = vmatprep.subr.bf16.mxu1 %v7988_v17  ;;  %v8063_v17 = vld [vmem:[#allocation3 + $0xd24] ss:$28 sps:$4 sm:$0xff]  }
 0x56a   :  { %6161 = vmatpush2.bf16.msra.mxu0 %v7990_v18  ;;  %v8058_v18 = vld [vmem:[#allocation3 + $0x9a0] ss:$28 sps:$4 sm:$0xff]  }
 0x56b   :  { %6202 = vmatpush2.bf16.msra.mxu1 %v7991_v5  ;;  %6212 = vmatprep.subr.bf16.mxu0 %v7994_v19  ;;  %v8061_v5 = vld [vmem:[#allocation3 + $0xd20] ss:$28 sps:$4 sm:$0xff]   ;;  %v8066_v19 = vld [vmem:[#allocation3 + $0x96c] ss:$28 sps:$4 sm:$0xff]  }
 0x56c   :  { %6253 = vmatprep.subr.bf16.mxu1 %v7997_v20  ;;  %v8069_v20 = vld [vmem:[#allocation3 + $0xcec] ss:$28 sps:$4 sm:$0xff]  }
 0x56d   :  { %6163 = vmatmul.mubr.bf16.vlgmr.msra.gmra.mxu0 %v8937_v21 }
 0x56e   :  { %6204 = vmatmul.mubr.bf16.vlgmr.msra.gmra.mxu1 %v8941_v44  ;;  %6213 = vmatpush1.bf16.msra.mxu0 %v7992_v24  ;;  %v8064_v24 = vld [vmem:[#allocation3 + $0x968] ss:$28 sps:$4 sm:$0xff]  }
 0x56f   :  { %6254 = vmatpush1.bf16.msra.mxu1 %v7995_v26  ;;  %6214 = vmatprep.subr.bf16.mxu0 %v8000_v52  ;;  %v8067_v26 = vld [vmem:[#allocation3 + $0xce8] ss:$28 sps:$4 sm:$0xff]   ;;  %v8072_v52 = vld [vmem:[#allocation3 + $0x934] ss:$28 sps:$4 sm:$0xff]  }
 0x570   :  { %6255 = vmatprep.subr.bf16.mxu1 %v8003_v27  ;;  %6244 = vmatprep.mubr.bf16.mxu0 %v8945_v28  ;;  %v8075_v27 = vld [vmem:[#allocation3 + $0xcb4] ss:$28 sps:$4 sm:$0xff]  }
 0x571   :  { %6285 = vmatprep.mubr.bf16.mxu1 %v8949_v11 }
 0x572   :  { %6215 = vmatpush1.bf16.msra.mxu0 %v7998_v23  ;;  %v8070_v23 = vld [vmem:[#allocation3 + $0x930] ss:$28 sps:$4 sm:$0xff]  }
 0x573   :  { %6256 = vmatpush1.bf16.msra.mxu1 %v8001_v29  ;;  %6216 = vmatprep.subr.bf16.mxu0 %v8006_v30  ;;  %v8073_v29 = vld [vmem:[#allocation3 + $0xcb0] ss:$28 sps:$4 sm:$0xff]   ;;  %v8078_v30 = vld [vmem:[#allocation3 + $0x8fc] ss:$28 sps:$4 sm:$0xff]  }
 0x574   :  { %6257 = vmatprep.subr.bf16.mxu1 %v8009_v31  ;;  %v8081_v31 = vld [vmem:[#allocation3 + $0xc7c] ss:$28 sps:$4 sm:$0xff]  }
 0x576   :  { %6217 = vmatpush1.bf16.msra.mxu0 %v8004_v43  ;;  %v8076_v43 = vld [vmem:[#allocation3 + $0x8f8] ss:$28 sps:$4 sm:$0xff]  }
 0x577   :  { %6258 = vmatpush1.bf16.msra.mxu1 %v8007_v32  ;;  %6218 = vmatprep.subr.bf16.mxu0 %v8012_v50  ;;  %v8079_v32 = vld [vmem:[#allocation3 + $0xc78] ss:$28 sps:$4 sm:$0xff]   ;;  %v8084_v50 = vld [vmem:[#allocation3 + $0x8c4] ss:$28 sps:$4 sm:$0xff]  }
 0x578   :  { %6259 = vmatprep.subr.bf16.mxu1 %v8015_v33  ;;  %v8087_v33 = vld [vmem:[#allocation3 + $0xc44] ss:$28 sps:$4 sm:$0xff]  }
 0x57a   :  { %6219 = vmatpush1.bf16.msra.mxu0 %v8010_v35  ;;  %v8082_v35 = vld [vmem:[#allocation3 + $0x8c0] ss:$28 sps:$4 sm:$0xff]  }
 0x57b   :  { %6260 = vmatpush1.bf16.msra.mxu1 %v8013_v36  ;;  %6220 = vmatprep.subr.bf16.mxu0 %v8018_v39  ;;  %v8085_v36 = vld [vmem:[#allocation3 + $0xc40] ss:$28 sps:$4 sm:$0xff]   ;;  %v8090_v39 = vld [vmem:[#allocation3 + $0x194] ss:$28 sps:$4 sm:$0xff]  }
 0x57c   :  { %6261 = vmatprep.subr.bf16.mxu1 %v8021_v42  ;;  %v8093_v42 = vld [vmem:[#allocation3 + $0x514] ss:$28 sps:$4 sm:$0xff]  }
 0x57e   :  { %6221 = vmatpush1.bf16.msra.mxu0 %v8016_v45  ;;  %v8957_v45 = vpack.c.bf16 %v8905_v38, %v8905_v38  ;;  %v8102_v38 = vld [vmem:[#allocation3 + $0x124] ss:$28 sps:$4 sm:$0xff]  }
 0x57f   :  { %6262 = vmatpush1.bf16.msra.mxu1 %v8019_v51  ;;  %6222 = vmatprep.subr.bf16.mxu0 %v8024_v53  ;;  %v8961_v51 = vpack.c.bf16 %v8921_v61, %v8921_v61  ;;  %v8088_v53 = vld [vmem:[#allocation3 + $0x190] ss:$28 sps:$4 sm:$0xff]   ;;  %v8105_v61 = vld [vmem:[#allocation3 + $0x4a4] ss:$28 sps:$4 sm:$0xff]  }
 0x580   :  { %6263 = vmatprep.subr.bf16.mxu1 %v8027_v40  ;;  %v8091_v40 = vld [vmem:[#allocation3 + $0x510] ss:$28 sps:$4 sm:$0xff]  }
 0x582   :  { %6223 = vmatpush1.bf16.msra.mxu0 %v8022_v54  ;;  %v8096_v54 = vld [vmem:[#allocation3 + $0x15c] ss:$28 sps:$4 sm:$0xff]  }
 0x583   :  { %6264 = vmatpush1.bf16.msra.mxu1 %v8025_v56  ;;  %6224 = vmatprep.subr.bf16.mxu0 %v8030_v58  ;;  %v8099_v56 = vld [vmem:[#allocation3 + $0x4dc] ss:$28 sps:$4 sm:$0xff]  }
 0x584   :  { %6265 = vmatprep.subr.bf16.mxu1 %v8033_v46  ;;  %v8094_v58 = vld [vmem:[#allocation3 + $0x158] ss:$28 sps:$4 sm:$0xff]  }
 0x585   :  { %v8097_v46 = vld [vmem:[#allocation3 + $0x4d8] ss:$28 sps:$4 sm:$0xff]  }
 0x586   :  { %6225 = vmatpush1.bf16.msra.mxu0 %v8028_v59  ;;  %v8100_v59 = vld [vmem:[#allocation3 + $0x120] ss:$28 sps:$4 sm:$0xff]  }
 0x587   :  { %6266 = vmatpush1.bf16.msra.mxu1 %v8031_v62  ;;  %6226 = vmatprep.subr.bf16.mxu0 %v8036_v41  ;;  %v8103_v62 = vld [vmem:[#allocation3 + $0x4a0] ss:$28 sps:$4 sm:$0xff]   ;;  %v8108_v41 = vld [vmem:[#allocation3 + $0xec] ss:$28 sps:$4 sm:$0xff]  }
 0x588   :  { %6267 = vmatprep.subr.bf16.mxu1 %v8039_v60  ;;  %v8111_v60 = vld [vmem:[#allocation3 + $0x46c] ss:$28 sps:$4 sm:$0xff]  }
 0x58a   :  { %6227 = vmatpush1.bf16.msra.mxu0 %v8034_v63  ;;  %v8106_v63 = vld [vmem:[#allocation3 + $0xe8] ss:$28 sps:$4 sm:$0xff]  }
 0x58b   :  { %6268 = vmatpush1.bf16.msra.mxu1 %v8037_v48  ;;  %6228 = vmatprep.subr.bf16.mxu0 %v8042_v37  ;;  %v8109_v48 = vld [vmem:[#allocation3 + $0x468] ss:$28 sps:$4 sm:$0xff]   ;;  %v8114_v37 = vld [vmem:[#allocation3 + $0xb4] ss:$28 sps:$4 sm:$0xff]  }
 0x58c   :  { %6269 = vmatprep.subr.bf16.mxu1 %v8045_v6  ;;  %v8117_v6 = vld [vmem:[#allocation3 + $0x434] ss:$28 sps:$4 sm:$0xff]  }
 0x58e   :  { %6229 = vmatpush2.bf16.msra.mxu0 %v8040_v0  ;;  %v8112_v0 = vld [vmem:[#allocation3 + $0xb0] ss:$28 sps:$4 sm:$0xff]  }
 0x58f   :  { %6270 = vmatpush2.bf16.msra.mxu1 %v8043_v8  ;;  %6230 = vmatprep.subr.bf16.mxu0 %v8048_v9  ;;  %v8115_v8 = vld [vmem:[#allocation3 + $0x430] ss:$28 sps:$4 sm:$0xff]   ;;  %v8120_v9 = vld [vmem:[#allocation3 + $0x7c] ss:$28 sps:$4 sm:$0xff]  }
 0x590   :  { %6271 = vmatprep.subr.bf16.mxu1 %v8051_v1  ;;  %v8123_v1 = vld [vmem:[#allocation3 + $0x3fc] ss:$28 sps:$4 sm:$0xff]  }
 0x592   :  { %6231 = vmatpush2.bf16.msra.mxu0 %v8046_v15  ;;  %v8118_v15 = vld [vmem:[#allocation3 + $0x78] ss:$28 sps:$4 sm:$0xff]  }
 0x593   :  { %6272 = vmatpush2.bf16.msra.mxu1 %v8049_v12  ;;  %6232 = vmatprep.subr.bf16.mxu0 %v8054_v25  ;;  %v8121_v12 = vld [vmem:[#allocation3 + $0x3f8] ss:$28 sps:$4 sm:$0xff]   ;;  %v8126_v25 = vld [vmem:[#allocation3 + $0x44] ss:$28 sps:$4 sm:$0xff]  }
 0x594   :  { %6273 = vmatprep.subr.bf16.mxu1 %v8057_v10  ;;  %v8129_v10 = vld [vmem:[#allocation3 + $0x3c4] ss:$28 sps:$4 sm:$0xff]  }
 0x596   :  { %6233 = vmatpush2.bf16.msra.mxu0 %v8052_v13  ;;  %v8124_v13 = vld [vmem:[#allocation3 + $0x40] ss:$28 sps:$4 sm:$0xff]  }
 0x597   :  { %6274 = vmatpush2.bf16.msra.mxu1 %v8055_v14  ;;  %6234 = vmatprep.subr.bf16.mxu0 %v8060_v16  ;;  %v8127_v14 = vld [vmem:[#allocation3 + $0x3c0] ss:$28 sps:$4 sm:$0xff]   ;;  %v8132_v16 = vld [vmem:[#allocation3 + $0xc] ss:$28 sps:$4 sm:$0xff]  }
 0x598   :  { %6275 = vmatprep.subr.bf16.mxu1 %v8063_v17  ;;  %v8135_v17 = vld [vmem:[#allocation3 + $0x38c] ss:$28 sps:$4 sm:$0xff]  }
 0x59a   :  { %6235 = vmatpush2.bf16.msra.mxu0 %v8058_v18  ;;  %v8130_v18 = vld [vmem:[#allocation3 + $0x8] ss:$28 sps:$4 sm:$0xff]  }
 0x59b   :  { %6276 = vmatpush2.bf16.msra.mxu1 %v8061_v5  ;;  %6236 = vmatprep.subr.bf16.mxu0 %v8066_v19  ;;  %v8133_v5 = vld [vmem:[#allocation3 + $0x388] ss:$28 sps:$4 sm:$0xff]   ;;  %v8138_v19 = vld [vmem:[#allocation3 + $0x354] ss:$28 sps:$4 sm:$0xff]  }
 0x59c   :  { %6277 = vmatprep.subr.bf16.mxu1 %v8069_v20  ;;  %v8141_v20 = vld [vmem:[#allocation3 + $0x6d4] ss:$28 sps:$4 sm:$0xff]  }
 0x59e   :  { %6237 = vmatpush2.bf16.msra.mxu0 %v8064_v24  ;;  %v8136_v24 = vld [vmem:[#allocation3 + $0x350] ss:$28 sps:$4 sm:$0xff]  }
 0x59f   :  { %6278 = vmatpush2.bf16.msra.mxu1 %v8067_v26  ;;  %6238 = vmatprep.subr.bf16.mxu0 %v8072_v52  ;;  %v8139_v26 = vld [vmem:[#allocation3 + $0x6d0] ss:$28 sps:$4 sm:$0xff]   ;;  %v8144_v52 = vld [vmem:[#allocation3 + $0x31c] ss:$28 sps:$4 sm:$0xff]  }
 0x5a0   :  { %6279 = vmatprep.subr.bf16.mxu1 %v8075_v27  ;;  %v8147_v27 = vld [vmem:[#allocation3 + $0x69c] ss:$28 sps:$4 sm:$0xff]  }
 0x5a2   :  { %6239 = vmatpush2.bf16.msra.mxu0 %v8070_v23  ;;  %v8142_v23 = vld [vmem:[#allocation3 + $0x318] ss:$28 sps:$4 sm:$0xff]  }
 0x5a3   :  { %6280 = vmatpush2.bf16.msra.mxu1 %v8073_v29  ;;  %6240 = vmatprep.subr.bf16.mxu0 %v8078_v30  ;;  %v8145_v29 = vld [vmem:[#allocation3 + $0x698] ss:$28 sps:$4 sm:$0xff]   ;;  %v8150_v30 = vld [vmem:[#allocation3 + $0x2e4] ss:$28 sps:$4 sm:$0xff]  }
 0x5a4   :  { %6281 = vmatprep.subr.bf16.mxu1 %v8081_v31  ;;  %v8153_v31 = vld [vmem:[#allocation3 + $0x664] ss:$28 sps:$4 sm:$0xff]  }
 0x5a6   :  { %6241 = vmatpush2.bf16.msra.mxu0 %v8076_v43  ;;  %v8148_v43 = vld [vmem:[#allocation3 + $0x2e0] ss:$28 sps:$4 sm:$0xff]  }
 0x5a7   :  { %6282 = vmatpush2.bf16.msra.mxu1 %v8079_v32  ;;  %6242 = vmatprep.subr.bf16.mxu0 %v8084_v50  ;;  %v8151_v32 = vld [vmem:[#allocation3 + $0x660] ss:$28 sps:$4 sm:$0xff]   ;;  %v8156_v50 = vld [vmem:[#allocation3 + $0x2ac] ss:$28 sps:$4 sm:$0xff]  }
 0x5a8   :  { %6283 = vmatprep.subr.bf16.mxu1 %v8087_v33  ;;  %v8159_v33 = vld [vmem:[#allocation3 + $0x62c] ss:$28 sps:$4 sm:$0xff]  }
 0x5aa   :  { %6243 = vmatpush2.bf16.msra.mxu0 %v8082_v35  ;;  %v8154_v35 = vld [vmem:[#allocation3 + $0x2a8] ss:$28 sps:$4 sm:$0xff]  }
 0x5ab   :  { %6284 = vmatpush2.bf16.msra.mxu1 %v8085_v36  ;;  %6294 = vmatprep.subr.bf16.mxu0 %v8090_v39  ;;  %v8157_v36 = vld [vmem:[#allocation3 + $0x628] ss:$28 sps:$4 sm:$0xff]   ;;  %v8162_v39 = vld [vmem:[#allocation3 + $0x274] ss:$28 sps:$4 sm:$0xff]  }
 0x5ac   :  { %6335 = vmatprep.subr.bf16.mxu1 %v8093_v42  ;;  %v8165_v42 = vld [vmem:[#allocation3 + $0x5f4] ss:$28 sps:$4 sm:$0xff]  }
 0x5ad   :  { %6245 = vmatmul.mubr.bf16.vlgmr.msra.gmra.mxu0 %v8957_v45 }
 0x5ae   :  { %6286 = vmatmul.mubr.bf16.vlgmr.msra.gmra.mxu1 %v8961_v51  ;;  %6295 = vmatpush1.bf16.msra.mxu0 %v8088_v53  ;;  %v8160_v53 = vld [vmem:[#allocation3 + $0x270] ss:$28 sps:$4 sm:$0xff]  }
 0x5af   :  { %6336 = vmatpush1.bf16.msra.mxu1 %v8091_v40  ;;  %6296 = vmatprep.subr.bf16.mxu0 %v8096_v54  ;;  %v8163_v40 = vld [vmem:[#allocation3 + $0x5f0] ss:$28 sps:$4 sm:$0xff]   ;;  %v8168_v54 = vld [vmem:[#allocation3 + $0x23c] ss:$28 sps:$4 sm:$0xff]  }
 0x5b0   :  { %6337 = vmatprep.subr.bf16.mxu1 %v8099_v56  ;;  %6326 = vmatprep.mubr.bf16.mxu0 %v8927_v2  ;;  %v8171_v56 = vld [vmem:[#allocation3 + $0x5bc] ss:$28 sps:$4 sm:$0xff]  }
 0x5b1   :  { %6367 = vmatprep.mubr.bf16.mxu1 %v8931_v3 }
 0x5b2   :  { %6297 = vmatpush1.bf16.msra.mxu0 %v8094_v58  ;;  %v8166_v58 = vld [vmem:[#allocation3 + $0x238] ss:$28 sps:$4 sm:$0xff]  }
 0x5b3   :  { %6338 = vmatpush1.bf16.msra.mxu1 %v8097_v46  ;;  %6298 = vmatprep.subr.bf16.mxu0 %v8102_v38  ;;  %v8169_v46 = vld [vmem:[#allocation3 + $0x5b8] ss:$28 sps:$4 sm:$0xff]   ;;  %v8174_v38 = vld [vmem:[#allocation3 + $0x204] ss:$28 sps:$4 sm:$0xff]  }
 0x5b4   :  { %6339 = vmatprep.subr.bf16.mxu1 %v8105_v61  ;;  %v8177_v61 = vld [vmem:[#allocation3 + $0x584] ss:$28 sps:$4 sm:$0xff]  }
 0x5b6   :  { %6299 = vmatpush1.bf16.msra.mxu0 %v8100_v59  ;;  %v8172_v59 = vld [vmem:[#allocation3 + $0x200] ss:$28 sps:$4 sm:$0xff]  }
 0x5b7   :  { %6340 = vmatpush1.bf16.msra.mxu1 %v8103_v62  ;;  %6300 = vmatprep.subr.bf16.mxu0 %v8108_v41  ;;  %v8175_v62 = vld [vmem:[#allocation3 + $0x580] ss:$28 sps:$4 sm:$0xff]   ;;  %v8180_v41 = vld [vmem:[#allocation3 + $0x1cc] ss:$28 sps:$4 sm:$0xff]  }
 0x5b8   :  { %6341 = vmatprep.subr.bf16.mxu1 %v8111_v60  ;;  %v8183_v60 = vld [vmem:[#allocation3 + $0x54c] ss:$28 sps:$4 sm:$0xff]  }
 0x5ba   :  { %6301 = vmatpush1.bf16.msra.mxu0 %v8106_v63  ;;  %v8178_v63 = vld [vmem:[#allocation3 + $0x1c8] ss:$28 sps:$4 sm:$0xff]  }
 0x5bb   :  { %6342 = vmatpush1.bf16.msra.mxu1 %v8109_v48  ;;  %6302 = vmatprep.subr.bf16.mxu0 %v8114_v37  ;;  %v8181_v48 = vld [vmem:[#allocation3 + $0x548] ss:$28 sps:$4 sm:$0xff]   ;;  %v8186_v37 = vld [vmem:[#allocation3 + $0x894] ss:$28 sps:$4 sm:$0xff]  }
 0x5bc   :  { %6343 = vmatprep.subr.bf16.mxu1 %v8117_v6  ;;  %v8189_v6 = vld [vmem:[#allocation3 + $0xc14] ss:$28 sps:$4 sm:$0xff]  }
 0x5be   :  { %6303 = vmatpush1.bf16.msra.mxu0 %v8112_v0  ;;  %v8184_v0 = vld [vmem:[#allocation3 + $0x890] ss:$28 sps:$4 sm:$0xff]  }
 0x5bf   :  { %6344 = vmatpush1.bf16.msra.mxu1 %v8115_v8  ;;  %6304 = vmatprep.subr.bf16.mxu0 %v8120_v9  ;;  %v8187_v8 = vld [vmem:[#allocation3 + $0xc10] ss:$28 sps:$4 sm:$0xff]   ;;  %v8192_v9 = vld [vmem:[#allocation3 + $0x85c] ss:$28 sps:$4 sm:$0xff]  }
 0x5c0   :  { %6345 = vmatprep.subr.bf16.mxu1 %v8123_v1  ;;  %v8195_v1 = vld [vmem:[#allocation3 + $0xbdc] ss:$28 sps:$4 sm:$0xff]  }
 0x5c2   :  { %6305 = vmatpush1.bf16.msra.mxu0 %v8118_v15  ;;  %v8190_v15 = vld [vmem:[#allocation3 + $0x858] ss:$28 sps:$4 sm:$0xff]  }
 0x5c3   :  { %6346 = vmatpush1.bf16.msra.mxu1 %v8121_v12  ;;  %6306 = vmatprep.subr.bf16.mxu0 %v8126_v25  ;;  %v8193_v12 = vld [vmem:[#allocation3 + $0xbd8] ss:$28 sps:$4 sm:$0xff]   ;;  %v8198_v25 = vld [vmem:[#allocation3 + $0x824] ss:$28 sps:$4 sm:$0xff]  }
 0x5c4   :  { %6347 = vmatprep.subr.bf16.mxu1 %v8129_v10  ;;  %v8201_v10 = vld [vmem:[#allocation3 + $0xba4] ss:$28 sps:$4 sm:$0xff]  }
 0x5c6   :  { %6307 = vmatpush1.bf16.msra.mxu0 %v8124_v13  ;;  %v8196_v13 = vld [vmem:[#allocation3 + $0x820] ss:$28 sps:$4 sm:$0xff]  }
 0x5c7   :  { %6348 = vmatpush1.bf16.msra.mxu1 %v8127_v14  ;;  %6308 = vmatprep.subr.bf16.mxu0 %v8132_v16  ;;  %v8199_v14 = vld [vmem:[#allocation3 + $0xba0] ss:$28 sps:$4 sm:$0xff]   ;;  %v8204_v16 = vld [vmem:[#allocation3 + $0x7ec] ss:$28 sps:$4 sm:$0xff]  }
 0x5c8   :  { %6349 = vmatprep.subr.bf16.mxu1 %v8135_v17  ;;  %v8207_v17 = vld [vmem:[#allocation3 + $0xb6c] ss:$28 sps:$4 sm:$0xff]  }
 0x5ca   :  { %6309 = vmatpush1.bf16.msra.mxu0 %v8130_v18  ;;  %v8202_v18 = vld [vmem:[#allocation3 + $0x7e8] ss:$28 sps:$4 sm:$0xff]  }
 0x5cb   :  { %6350 = vmatpush1.bf16.msra.mxu1 %v8133_v5  ;;  %6310 = vmatprep.subr.bf16.mxu0 %v8138_v19  ;;  %v8205_v5 = vld [vmem:[#allocation3 + $0xb68] ss:$28 sps:$4 sm:$0xff]   ;;  %v8210_v19 = vld [vmem:[#allocation3 + $0x7b4] ss:$28 sps:$4 sm:$0xff]  }
 0x5cc   :  { %6351 = vmatprep.subr.bf16.mxu1 %v8141_v20  ;;  %v8213_v20 = vld [vmem:[#allocation3 + $0xb34] ss:$28 sps:$4 sm:$0xff]  }
 0x5ce   :  { %6311 = vmatpush2.bf16.msra.mxu0 %v8136_v24  ;;  %v8208_v24 = vld [vmem:[#allocation3 + $0x7b0] ss:$28 sps:$4 sm:$0xff]  }
 0x5cf   :  { %6352 = vmatpush2.bf16.msra.mxu1 %v8139_v26  ;;  %6312 = vmatprep.subr.bf16.mxu0 %v8144_v52  ;;  %v8211_v26 = vld [vmem:[#allocation3 + $0xb30] ss:$28 sps:$4 sm:$0xff]   ;;  %v8216_v52 = vld [vmem:[#allocation3 + $0x77c] ss:$28 sps:$4 sm:$0xff]  }
 0x5d0   :  { %6353 = vmatprep.subr.bf16.mxu1 %v8147_v27  ;;  %v8219_v27 = vld [vmem:[#allocation3 + $0xafc] ss:$28 sps:$4 sm:$0xff]  }
 0x5d2   :  { %6313 = vmatpush2.bf16.msra.mxu0 %v8142_v23  ;;  %v8214_v23 = vld [vmem:[#allocation3 + $0x778] ss:$28 sps:$4 sm:$0xff]  }
 0x5d3   :  { %6354 = vmatpush2.bf16.msra.mxu1 %v8145_v29  ;;  %6314 = vmatprep.subr.bf16.mxu0 %v8150_v30  ;;  %v8217_v29 = vld [vmem:[#allocation3 + $0xaf8] ss:$28 sps:$4 sm:$0xff]   ;;  %v8222_v30 = vld [vmem:[#allocation3 + $0x744] ss:$28 sps:$4 sm:$0xff]  }
 0x5d4   :  { %6355 = vmatprep.subr.bf16.mxu1 %v8153_v31  ;;  %v8225_v31 = vld [vmem:[#allocation3 + $0xac4] ss:$28 sps:$4 sm:$0xff]  }
 0x5d6   :  { %6315 = vmatpush2.bf16.msra.mxu0 %v8148_v43  ;;  %v8220_v43 = vld [vmem:[#allocation3 + $0x740] ss:$28 sps:$4 sm:$0xff]  }
 0x5d7   :  { %6356 = vmatpush2.bf16.msra.mxu1 %v8151_v32  ;;  %6316 = vmatprep.subr.bf16.mxu0 %v8156_v50  ;;  %v8223_v32 = vld [vmem:[#allocation3 + $0xac0] ss:$28 sps:$4 sm:$0xff]   ;;  %v8228_v50 = vld [vmem:[#allocation3 + $0x70c] ss:$28 sps:$4 sm:$0xff]  }
 0x5d8   :  { %6357 = vmatprep.subr.bf16.mxu1 %v8159_v33  ;;  %v8231_v33 = vld [vmem:[#allocation3 + $0xa8c] ss:$28 sps:$4 sm:$0xff]  }
 0x5da   :  { %6317 = vmatpush2.bf16.msra.mxu0 %v8154_v35  ;;  %v8226_v35 = vld [vmem:[#allocation3 + $0x708] ss:$28 sps:$4 sm:$0xff]  }
 0x5db   :  { %6358 = vmatpush2.bf16.msra.mxu1 %v8157_v36  ;;  %6318 = vmatprep.subr.bf16.mxu0 %v8162_v39  ;;  %v8229_v36 = vld [vmem:[#allocation3 + $0xa88] ss:$28 sps:$4 sm:$0xff]   ;;  %v8234_v39 = vld [vmem:[#allocation3 + $0xa54] ss:$28 sps:$4 sm:$0xff]  }
 0x5dc   :  { %6359 = vmatprep.subr.bf16.mxu1 %v8165_v42  ;;  %v8237_v42 = vld [vmem:[#allocation3 + $0xdd4] ss:$28 sps:$4 sm:$0xff]  }
 0x5de   :  { %6319 = vmatpush2.bf16.msra.mxu0 %v8160_v53  ;;  %v8232_v53 = vld [vmem:[#allocation3 + $0xa50] ss:$28 sps:$4 sm:$0xff]  }
 0x5df   :  { %6360 = vmatpush2.bf16.msra.mxu1 %v8163_v40  ;;  %6320 = vmatprep.subr.bf16.mxu0 %v8168_v54  ;;  %v8235_v40 = vld [vmem:[#allocation3 + $0xdd0] ss:$28 sps:$4 sm:$0xff]   ;;  %v8240_v54 = vld [vmem:[#allocation3 + $0xa1c] ss:$28 sps:$4 sm:$0xff]  }
 0x5e0   :  { %6361 = vmatprep.subr.bf16.mxu1 %v8171_v56  ;;  %v8243_v56 = vld [vmem:[#allocation3 + $0xd9c] ss:$28 sps:$4 sm:$0xff]  }
 0x5e2   :  { %6321 = vmatpush2.bf16.msra.mxu0 %v8166_v58  ;;  %v8238_v58 = vld [vmem:[#allocation3 + $0xa18] ss:$28 sps:$4 sm:$0xff]  }
 0x5e3   :  { %6362 = vmatpush2.bf16.msra.mxu1 %v8169_v46  ;;  %6322 = vmatprep.subr.bf16.mxu0 %v8174_v38  ;;  %v8241_v46 = vld [vmem:[#allocation3 + $0xd98] ss:$28 sps:$4 sm:$0xff]   ;;  %v8246_v38 = vld [vmem:[#allocation3 + $0x9e4] ss:$28 sps:$4 sm:$0xff]  }
 0x5e4   :  { %6363 = vmatprep.subr.bf16.mxu1 %v8177_v61  ;;  %v8249_v61 = vld [vmem:[#allocation3 + $0xd64] ss:$28 sps:$4 sm:$0xff]  }
 0x5e6   :  { %6323 = vmatpush2.bf16.msra.mxu0 %v8172_v59  ;;  %v8244_v59 = vld [vmem:[#allocation3 + $0x9e0] ss:$28 sps:$4 sm:$0xff]  }
 0x5e7   :  { %6364 = vmatpush2.bf16.msra.mxu1 %v8175_v62  ;;  %6324 = vmatprep.subr.bf16.mxu0 %v8180_v41  ;;  %v8247_v62 = vld [vmem:[#allocation3 + $0xd60] ss:$28 sps:$4 sm:$0xff]   ;;  %v8252_v41 = vld [vmem:[#allocation3 + $0x9ac] ss:$28 sps:$4 sm:$0xff]  }
 0x5e8   :  { %6365 = vmatprep.subr.bf16.mxu1 %v8183_v60  ;;  %v8255_v60 = vld [vmem:[#allocation3 + $0xd2c] ss:$28 sps:$4 sm:$0xff]  }
 0x5ea   :  { %6325 = vmatpush2.bf16.msra.mxu0 %v8178_v63  ;;  %v8250_v63 = vld [vmem:[#allocation3 + $0x9a8] ss:$28 sps:$4 sm:$0xff]  }
 0x5eb   :  { %6366 = vmatpush2.bf16.msra.mxu1 %v8181_v48  ;;  %6376 = vmatprep.subr.bf16.mxu0 %v8186_v37  ;;  %v8253_v48 = vld [vmem:[#allocation3 + $0xd28] ss:$28 sps:$4 sm:$0xff]   ;;  %v8258_v37 = vld [vmem:[#allocation3 + $0x974] ss:$28 sps:$4 sm:$0xff]  }
 0x5ec   :  { %6417 = vmatprep.subr.bf16.mxu1 %v8189_v6  ;;  %v8261_v6 = vld [vmem:[#allocation3 + $0xcf4] ss:$28 sps:$4 sm:$0xff]  }
 0x5ed   :  { %6327 = vmatmul.mubr.bf16.vlgmr.msra.gmra.mxu0 %v8937_v21 }
 0x5ee   :  { %6368 = vmatmul.mubr.bf16.vlgmr.msra.gmra.mxu1 %v8941_v44  ;;  %6377 = vmatpush1.bf16.msra.mxu0 %v8184_v0  ;;  %v8256_v0 = vld [vmem:[#allocation3 + $0x970] ss:$28 sps:$4 sm:$0xff]  }
 0x5ef   :  { %6418 = vmatpush1.bf16.msra.mxu1 %v8187_v8  ;;  %6378 = vmatprep.subr.bf16.mxu0 %v8192_v9  ;;  %v8259_v8 = vld [vmem:[#allocation3 + $0xcf0] ss:$28 sps:$4 sm:$0xff]   ;;  %v8264_v9 = vld [vmem:[#allocation3 + $0x93c] ss:$28 sps:$4 sm:$0xff]  }
 0x5f0   :  { %6419 = vmatprep.subr.bf16.mxu1 %v8195_v1  ;;  %6408 = vmatprep.mubr.bf16.mxu0 %v8945_v28  ;;  %v8267_v1 = vld [vmem:[#allocation3 + $0xcbc] ss:$28 sps:$4 sm:$0xff]  }
 0x5f1   :  { %6449 = vmatprep.mubr.bf16.mxu1 %v8949_v11 }
 0x5f2   :  { %6379 = vmatpush1.bf16.msra.mxu0 %v8190_v15  ;;  %v8262_v15 = vld [vmem:[#allocation3 + $0x938] ss:$28 sps:$4 sm:$0xff]  }
 0x5f3   :  { %6420 = vmatpush1.bf16.msra.mxu1 %v8193_v12  ;;  %6380 = vmatprep.subr.bf16.mxu0 %v8198_v25  ;;  %v8265_v12 = vld [vmem:[#allocation3 + $0xcb8] ss:$28 sps:$4 sm:$0xff]   ;;  %v8270_v25 = vld [vmem:[#allocation3 + $0x904] ss:$28 sps:$4 sm:$0xff]  }
 0x5f4   :  { %6421 = vmatprep.subr.bf16.mxu1 %v8201_v10  ;;  %v8273_v10 = vld [vmem:[#allocation3 + $0xc84] ss:$28 sps:$4 sm:$0xff]  }
 0x5f6   :  { %6381 = vmatpush1.bf16.msra.mxu0 %v8196_v13  ;;  %v8268_v13 = vld [vmem:[#allocation3 + $0x900] ss:$28 sps:$4 sm:$0xff]  }
 0x5f7   :  { %6422 = vmatpush1.bf16.msra.mxu1 %v8199_v14  ;;  %6382 = vmatprep.subr.bf16.mxu0 %v8204_v16  ;;  %v8271_v14 = vld [vmem:[#allocation3 + $0xc80] ss:$28 sps:$4 sm:$0xff]   ;;  %v8276_v16 = vld [vmem:[#allocation3 + $0x8cc] ss:$28 sps:$4 sm:$0xff]  }
 0x5f8   :  { %6423 = vmatprep.subr.bf16.mxu1 %v8207_v17  ;;  %v8279_v17 = vld [vmem:[#allocation3 + $0xc4c] ss:$28 sps:$4 sm:$0xff]  }
 0x5fa   :  { %6383 = vmatpush1.bf16.msra.mxu0 %v8202_v18  ;;  %v8274_v18 = vld [vmem:[#allocation3 + $0x8c8] ss:$28 sps:$4 sm:$0xff]  }
 0x5fb   :  { %6424 = vmatpush1.bf16.msra.mxu1 %v8205_v5  ;;  %6384 = vmatprep.subr.bf16.mxu0 %v8210_v19  ;;  %v8277_v5 = vld [vmem:[#allocation3 + $0xc48] ss:$28 sps:$4 sm:$0xff]   ;;  %v8282_v19 = vld [vmem:[#allocation3 + $0x19c] ss:$28 sps:$4 sm:$0xff]  }
 0x5fc   :  { %6425 = vmatprep.subr.bf16.mxu1 %v8213_v20  ;;  %v8285_v20 = vld [vmem:[#allocation3 + $0x51c] ss:$28 sps:$4 sm:$0xff]  }
 0x5fe   :  { %6385 = vmatpush1.bf16.msra.mxu0 %v8208_v24  ;;  %v8280_v24 = vld [vmem:[#allocation3 + $0x198] ss:$28 sps:$4 sm:$0xff]  }
 0x5ff   :  { %6426 = vmatpush1.bf16.msra.mxu1 %v8211_v26  ;;  %6386 = vmatprep.subr.bf16.mxu0 %v8216_v52  ;;  %v8283_v26 = vld [vmem:[#allocation3 + $0x518] ss:$28 sps:$4 sm:$0xff]   ;;  %v8288_v52 = vld [vmem:[#allocation3 + $0x164] ss:$28 sps:$4 sm:$0xff]  }
 0x600   :  { %6427 = vmatprep.subr.bf16.mxu1 %v8219_v27  ;;  %v8291_v27 = vld [vmem:[#allocation3 + $0x4e4] ss:$28 sps:$4 sm:$0xff]  }
 0x602   :  { %6387 = vmatpush1.bf16.msra.mxu0 %v8214_v23  ;;  %v8286_v23 = vld [vmem:[#allocation3 + $0x160] ss:$28 sps:$4 sm:$0xff]  }
 0x603   :  { %6428 = vmatpush1.bf16.msra.mxu1 %v8217_v29  ;;  %6388 = vmatprep.subr.bf16.mxu0 %v8222_v30 }
 0x604   :  { %6429 = vmatprep.subr.bf16.mxu1 %v8225_v31  ;;  %v8289_v31 = vld [vmem:[#allocation3 + $0x4e0] ss:$28 sps:$4 sm:$0xff]  }
 0x606   :  { %6389 = vmatpush1.bf16.msra.mxu0 %v8220_v43 }
 0x607   :  { %6430 = vmatpush1.bf16.msra.mxu1 %v8223_v32  ;;  %6390 = vmatprep.subr.bf16.mxu0 %v8228_v50  ;;  %v8294_v50 = vld [vmem:[#allocation3 + $0x12c] ss:$28 sps:$4 sm:$0xff]  }
 0x608   :  { %6431 = vmatprep.subr.bf16.mxu1 %v8231_v33  ;;  %v8297_v33 = vld [vmem:[#allocation3 + $0x4ac] ss:$28 sps:$4 sm:$0xff]  }
 0x60a   :  { %6391 = vmatpush1.bf16.msra.mxu0 %v8226_v35  ;;  %v8292_v35 = vld [vmem:[#allocation3 + $0x128] ss:$28 sps:$4 sm:$0xff]  }
 0x60b   :  { %6432 = vmatpush1.bf16.msra.mxu1 %v8229_v36  ;;  %6392 = vmatprep.subr.bf16.mxu0 %v8234_v39 }
 0x60c   :  { %6433 = vmatprep.subr.bf16.mxu1 %v8237_v42  ;;  %v8295_v42 = vld [vmem:[#allocation3 + $0x4a8] ss:$28 sps:$4 sm:$0xff]  }
 0x60e   :  { %6393 = vmatpush2.bf16.msra.mxu0 %v8232_v53 }
 0x60f   :  { %6434 = vmatpush2.bf16.msra.mxu1 %v8235_v40  ;;  %6394 = vmatprep.subr.bf16.mxu0 %v8240_v54  ;;  %v8300_v54 = vld [vmem:[#allocation3 + $0xf4] ss:$28 sps:$4 sm:$0xff]  }
 0x610   :  { %6435 = vmatprep.subr.bf16.mxu1 %v8243_v56  ;;  %v8303_v56 = vld [vmem:[#allocation3 + $0x474] ss:$28 sps:$4 sm:$0xff]  }
 0x612   :  { %6395 = vmatpush2.bf16.msra.mxu0 %v8238_v58  ;;  %v8298_v58 = vld [vmem:[#allocation3 + $0xf0] ss:$28 sps:$4 sm:$0xff]  }
 0x613   :  { %6436 = vmatpush2.bf16.msra.mxu1 %v8241_v46  ;;  %6396 = vmatprep.subr.bf16.mxu0 %v8246_v38  ;;  %v8301_v46 = vld [vmem:[#allocation3 + $0x470] ss:$28 sps:$4 sm:$0xff]   ;;  %v8306_v38 = vld [vmem:[#allocation3 + $0xbc] ss:$28 sps:$4 sm:$0xff]  }
 0x614   :  { %6437 = vmatprep.subr.bf16.mxu1 %v8249_v61  ;;  %v8309_v61 = vld [vmem:[#allocation3 + $0x43c] ss:$28 sps:$4 sm:$0xff]  }
 0x616   :  { %6397 = vmatpush2.bf16.msra.mxu0 %v8244_v59  ;;  %v8304_v59 = vld [vmem:[#allocation3 + $0xb8] ss:$28 sps:$4 sm:$0xff]  }
 0x617   :  { %6438 = vmatpush2.bf16.msra.mxu1 %v8247_v62  ;;  %6398 = vmatprep.subr.bf16.mxu0 %v8252_v41  ;;  %v8307_v62 = vld [vmem:[#allocation3 + $0x438] ss:$28 sps:$4 sm:$0xff]   ;;  %v8312_v41 = vld [vmem:[#allocation3 + $0x84] ss:$28 sps:$4 sm:$0xff]  }
 0x618   :  { %6439 = vmatprep.subr.bf16.mxu1 %v8255_v60  ;;  %v8315_v60 = vld [vmem:[#allocation3 + $0x404] ss:$28 sps:$4 sm:$0xff]  }
 0x61a   :  { %6399 = vmatpush2.bf16.msra.mxu0 %v8250_v63  ;;  %v8310_v63 = vld [vmem:[#allocation3 + $0x80] ss:$28 sps:$4 sm:$0xff]  }
 0x61b   :  { %6440 = vmatpush2.bf16.msra.mxu1 %v8253_v48  ;;  %6400 = vmatprep.subr.bf16.mxu0 %v8258_v37  ;;  %v8313_v48 = vld [vmem:[#allocation3 + $0x400] ss:$28 sps:$4 sm:$0xff]   ;;  %v8318_v37 = vld [vmem:[#allocation3 + $0x4c] ss:$28 sps:$4 sm:$0xff]  }
 0x61c   :  { %6441 = vmatprep.subr.bf16.mxu1 %v8261_v6  ;;  %v8321_v6 = vld [vmem:[#allocation3 + $0x3cc] ss:$28 sps:$4 sm:$0xff]  }
 0x61e   :  { %6401 = vmatpush2.bf16.msra.mxu0 %v8256_v0  ;;  %v8316_v0 = vld [vmem:[#allocation3 + $0x48] ss:$28 sps:$4 sm:$0xff]  }
 0x61f   :  { %6442 = vmatpush2.bf16.msra.mxu1 %v8259_v8  ;;  %6402 = vmatprep.subr.bf16.mxu0 %v8264_v9  ;;  %v8319_v8 = vld [vmem:[#allocation3 + $0x3c8] ss:$28 sps:$4 sm:$0xff]   ;;  %v8324_v9 = vld [vmem:[#allocation3 + $0x14] ss:$28 sps:$4 sm:$0xff]  }
 0x620   :  { %6443 = vmatprep.subr.bf16.mxu1 %v8267_v1  ;;  %v8327_v1 = vld [vmem:[#allocation3 + $0x394] ss:$28 sps:$4 sm:$0xff]  }
 0x622   :  { %6403 = vmatpush2.bf16.msra.mxu0 %v8262_v15  ;;  %v8322_v15 = vld [vmem:[#allocation3 + $0x10] ss:$28 sps:$4 sm:$0xff]  }
 0x623   :  { %6444 = vmatpush2.bf16.msra.mxu1 %v8265_v12  ;;  %6404 = vmatprep.subr.bf16.mxu0 %v8270_v25  ;;  %v8325_v12 = vld [vmem:[#allocation3 + $0x390] ss:$28 sps:$4 sm:$0xff]   ;;  %v8330_v25 = vld [vmem:[#allocation3 + $0x35c] ss:$28 sps:$4 sm:$0xff]  }
 0x624   :  { %6445 = vmatprep.subr.bf16.mxu1 %v8273_v10  ;;  %v8333_v10 = vld [vmem:[#allocation3 + $0x6dc] ss:$28 sps:$4 sm:$0xff]  }
 0x626   :  { %6405 = vmatpush2.bf16.msra.mxu0 %v8268_v13  ;;  %v8328_v13 = vld [vmem:[#allocation3 + $0x358] ss:$28 sps:$4 sm:$0xff]  }
 0x627   :  { %6446 = vmatpush2.bf16.msra.mxu1 %v8271_v14  ;;  %6406 = vmatprep.subr.bf16.mxu0 %v8276_v16  ;;  %v8331_v14 = vld [vmem:[#allocation3 + $0x6d8] ss:$28 sps:$4 sm:$0xff]   ;;  %v8336_v16 = vld [vmem:[#allocation3 + $0x324] ss:$28 sps:$4 sm:$0xff]  }
 0x628   :  { %6447 = vmatprep.subr.bf16.mxu1 %v8279_v17  ;;  %v8339_v17 = vld [vmem:[#allocation3 + $0x6a4] ss:$28 sps:$4 sm:$0xff]  }
 0x62a   :  { %6407 = vmatpush2.bf16.msra.mxu0 %v8274_v18  ;;  %v8334_v18 = vld [vmem:[#allocation3 + $0x320] ss:$28 sps:$4 sm:$0xff]  }
 0x62b   :  { %6448 = vmatpush2.bf16.msra.mxu1 %v8277_v5  ;;  %6458 = vmatprep.subr.bf16.mxu0 %v8282_v19  ;;  %v8337_v5 = vld [vmem:[#allocation3 + $0x6a0] ss:$28 sps:$4 sm:$0xff]   ;;  %v8342_v19 = vld [vmem:[#allocation3 + $0x2ec] ss:$28 sps:$4 sm:$0xff]  }
 0x62c   :  { %6499 = vmatprep.subr.bf16.mxu1 %v8285_v20  ;;  %v8345_v20 = vld [vmem:[#allocation3 + $0x66c] ss:$28 sps:$4 sm:$0xff]  }
 0x62d   :  { %v8971_v29 = vpop.f32.mrf.mxu0  ;;  %6409 = vmatmul.mubr.bf16.vlgmr.msra.gmra.mxu0 %v8957_v45 }
 0x62e   :  { %v8973_v30 = vpop.f32.mrf.mxu1  ;;  %6450 = vmatmul.mubr.bf16.vlgmr.msra.gmra.mxu1 %v8961_v51  ;;  %6459 = vmatpush1.bf16.msra.mxu0 %v8280_v24  ;;  %v8340_v24 = vld [vmem:[#allocation3 + $0x2e8] ss:$28 sps:$4 sm:$0xff]  }
 0x62f   :  { %6500 = vmatpush1.bf16.msra.mxu1 %v8283_v26  ;;  %v8977_v43 = vpop.f32.mrf.mxu0  ;;  %6460 = vmatprep.subr.bf16.mxu0 %v8288_v52  ;;  %v8343_v26 = vld [vmem:[#allocation3 + $0x668] ss:$28 sps:$4 sm:$0xff]   ;;  %v8348_v52 = vld [vmem:[#allocation3 + $0x2b4] ss:$28 sps:$4 sm:$0xff]  }
 0x630   :  { %v8979_v32 = vpop.f32.mrf.mxu1  ;;  %6501 = vmatprep.subr.bf16.mxu1 %v8291_v27  ;;  %6490 = vmatprep.mubr.bf16.mxu0 %v8927_v2  ;;  %v8351_v27 = vld [vmem:[#allocation3 + $0x634] ss:$28 sps:$4 sm:$0xff]  }
 0x631   :  { %6531 = vmatprep.mubr.bf16.mxu1 %v8931_v3  ;;  %v6168_v36 = vpop.f32.mrf.mxu0 }
 0x632   :  { %v6209_v39 = vpop.f32.mrf.mxu1  ;;  %6461 = vmatpush1.bf16.msra.mxu0 %v8286_v23  ;;  %v8346_v23 = vld [vmem:[#allocation3 + $0x2b0] ss:$28 sps:$4 sm:$0xff]   ;;  %v8355_v36 = vld [vmem:[#allocation3 + $0x5f8] ss:$28 sps:$4 sm:$0xff]  }
 0x633   :  { %6502 = vmatpush1.bf16.msra.mxu1 %v8289_v31  ;;  %v6169_v53 = vpop.f32.mrf.mxu0  ;;  %6462 = vmatprep.subr.bf16.mxu0 %v8294_v50  ;;  %v8349_v31 = vld [vmem:[#allocation3 + $0x630] ss:$28 sps:$4 sm:$0xff]   ;;  %v8354_v50 = vld [vmem:[#allocation3 + $0x27c] ss:$28 sps:$4 sm:$0xff]   ;;  %v8360_v39 = vld [vmem:[#allocation3 + $0x244] ss:$28 sps:$4 sm:$0xff]  }
 0x634   :  { %v6210_v40 = vpop.f32.mrf.mxu1  ;;  %6503 = vmatprep.subr.bf16.mxu1 %v8297_v33  ;;  %v8357_v33 = vld [vmem:[#allocation3 + $0x5fc] ss:$28 sps:$4 sm:$0xff]  }
 0x635   :  { %v8358_v53 = vld [vmem:[#allocation3 + $0x240] ss:$28 sps:$4 sm:$0xff]  }
 0x636   :  { %6463 = vmatpush1.bf16.msra.mxu0 %v8292_v35  ;;  %v8352_v35 = vld [vmem:[#allocation3 + $0x278] ss:$28 sps:$4 sm:$0xff]   ;;  %v8361_v40 = vld [vmem:[#allocation3 + $0x5c0] ss:$28 sps:$4 sm:$0xff]  }
 0x637   :  { %6504 = vmatpush1.bf16.msra.mxu1 %v8295_v42  ;;  %6464 = vmatprep.subr.bf16.mxu0 %v8300_v54  ;;  %v8363_v42 = vld [vmem:[#allocation3 + $0x5c4] ss:$28 sps:$4 sm:$0xff]   ;;  %v8366_v54 = vld [vmem:[#allocation3 + $0x20c] ss:$28 sps:$4 sm:$0xff]  }
 0x638   :  { %6505 = vmatprep.subr.bf16.mxu1 %v8303_v56  ;;  %v8369_v56 = vld [vmem:[#allocation3 + $0x58c] ss:$28 sps:$4 sm:$0xff]  }
 0x63a   :  { %6465 = vmatpush1.bf16.msra.mxu0 %v8298_v58  ;;  %v8364_v58 = vld [vmem:[#allocation3 + $0x208] ss:$28 sps:$4 sm:$0xff]  }
 0x63b   :  { %6506 = vmatpush1.bf16.msra.mxu1 %v8301_v46  ;;  %6466 = vmatprep.subr.bf16.mxu0 %v8306_v38  ;;  %v8367_v46 = vld [vmem:[#allocation3 + $0x588] ss:$28 sps:$4 sm:$0xff]   ;;  %v8372_v38 = vld [vmem:[#allocation3 + $0x1d4] ss:$28 sps:$4 sm:$0xff]  }
 0x63c   :  { %6507 = vmatprep.subr.bf16.mxu1 %v8309_v61  ;;  %v8375_v61 = vld [vmem:[#allocation3 + $0x554] ss:$28 sps:$4 sm:$0xff]  }
 0x63e   :  { %6467 = vmatpush1.bf16.msra.mxu0 %v8304_v59  ;;  %v3794_v59 = vrot.slane %v8777_v4, %v8782_v47  ;;  %v8384_v47 = vld [vmem:[#allocation3 + $0x864] ss:$28 sps:$4 sm:$0xff]  }
 0x63f   :  { %6508 = vmatpush1.bf16.msra.mxu1 %v8307_v62  ;;  %6468 = vmatprep.subr.bf16.mxu0 %v8312_v41  ;;  %v8370_v62 = vld [vmem:[#allocation3 + $0x1d0] ss:$28 sps:$4 sm:$0xff]  }
 0x640   :  { %6509 = vmatprep.subr.bf16.mxu1 %v8315_v60  ;;  %v8373_v41 = vld [vmem:[#allocation3 + $0x550] ss:$28 sps:$4 sm:$0xff]   ;;  %v3798_v60 = vrot.slane %v8777_v4, %v8785_v49 }
 0x642   :  { %6469 = vmatpush1.bf16.msra.mxu0 %v8310_v63  ;;  %v8378_v63 = vld [vmem:[#allocation3 + $0x89c] ss:$28 sps:$4 sm:$0xff]  }
 0x643   :  { %6510 = vmatpush1.bf16.msra.mxu1 %v8313_v48  ;;  %6470 = vmatprep.subr.bf16.mxu0 %v8318_v37  ;;  %v8381_v48 = vld [vmem:[#allocation3 + $0xc1c] ss:$28 sps:$4 sm:$0xff]   ;;  %v6165_v37 = vadd.f32 %v8971_v29, %v3794_v59  ;;  %v8420_v59 = vld [vmem:[#allocation3 + $0x714] ss:$28 sps:$4 sm:$0xff]  }
 0x644   :  { %6511 = vmatprep.subr.bf16.mxu1 %v8321_v6  ;;  %v6167_v6 = vadd.f32 %v8977_v43, %v3798_v60  ;;  %v8382_v43 = vld [vmem:[#allocation3 + $0x860] ss:$28 sps:$4 sm:$0xff]   ;;  %v8421_v60 = vld [vmem:[#allocation3 + $0xa90] ss:$28 sps:$4 sm:$0xff]  }
 0x645   :  { %v6206_v49 = vadd.f32 %v8973_v30, %v6165_v37  ;;  %v8424_v37 = vld [vmem:[#allocation3 + $0xa58] ss:$28 sps:$4 sm:$0xff]  }
 0x646   :  { %6471 = vmatpush1.bf16.msra.mxu0 %v8316_v0  ;;  %v8376_v0 = vld [vmem:[#allocation3 + $0x898] ss:$28 sps:$4 sm:$0xff]   ;;  %v6208_v29 = vadd.f32 %v8979_v32, %v6167_v6 }
 0x647   :  { %6512 = vmatpush1.bf16.msra.mxu1 %v8319_v8  ;;  %6472 = vmatprep.subr.bf16.mxu0 %v8324_v9  ;;  %v8379_v8 = vld [vmem:[#allocation3 + $0xc18] ss:$28 sps:$4 sm:$0xff]   ;;  %v8387_v9 = vld [vmem:[#allocation3 + $0xbe4] ss:$28 sps:$4 sm:$0xff]  }
 0x648   :  { %6513 = vmatprep.subr.bf16.mxu1 %v8327_v1  ;;  %v8427_v6 = vld [vmem:[#allocation3 + $0xdd8] ss:$28 sps:$4 sm:$0xff]  }
 0x64a   :  { %6473 = vmatpush1.bf16.msra.mxu0 %v8322_v15 }
 0x64b   :  { %6514 = vmatpush1.bf16.msra.mxu1 %v8325_v12  ;;  %6474 = vmatprep.subr.bf16.mxu0 %v8330_v25  ;;  %v8385_v25 = vld [vmem:[#allocation3 + $0xbe0] ss:$28 sps:$4 sm:$0xff]  }
 0x64c   :  { %6515 = vmatprep.subr.bf16.mxu1 %v8333_v10 }
 0x64e   :  { %6475 = vmatpush2.bf16.msra.mxu0 %v8328_v13 }
 0x64f   :  { %6516 = vmatpush2.bf16.msra.mxu1 %v8331_v14  ;;  %6476 = vmatprep.subr.bf16.mxu0 %v8336_v16  ;;  %v8390_v14 = vld [vmem:[#allocation3 + $0x82c] ss:$28 sps:$4 sm:$0xff]  }
 0x650   :  { %6517 = vmatprep.subr.bf16.mxu1 %v8339_v17  ;;  %v8393_v16 = vld [vmem:[#allocation3 + $0xbac] ss:$28 sps:$4 sm:$0xff]  }
 0x652   :  { %6477 = vmatpush2.bf16.msra.mxu0 %v8334_v18 }
 0x653   :  { %6518 = vmatpush2.bf16.msra.mxu1 %v8337_v5  ;;  %6478 = vmatprep.subr.bf16.mxu0 %v8342_v19  ;;  %v8388_v19 = vld [vmem:[#allocation3 + $0x828] ss:$28 sps:$4 sm:$0xff]  }
 0x654   :  { %6519 = vmatprep.subr.bf16.mxu1 %v8345_v20  ;;  %v8391_v20 = vld [vmem:[#allocation3 + $0xba8] ss:$28 sps:$4 sm:$0xff]  }
 0x656   :  { %6479 = vmatpush2.bf16.msra.mxu0 %v8340_v24 }
 0x657   :  { %6520 = vmatpush2.bf16.msra.mxu1 %v8343_v26  ;;  %6480 = vmatprep.subr.bf16.mxu0 %v8348_v52  ;;  %v8396_v52 = vld [vmem:[#allocation3 + $0x7f4] ss:$28 sps:$4 sm:$0xff]  }
 0x658   :  { %6521 = vmatprep.subr.bf16.mxu1 %v8351_v27  ;;  %v8399_v27 = vld [vmem:[#allocation3 + $0xb74] ss:$28 sps:$4 sm:$0xff]  }
 0x65a   :  { %6481 = vmatpush2.bf16.msra.mxu0 %v8346_v23  ;;  %v8394_v23 = vld [vmem:[#allocation3 + $0x7f0] ss:$28 sps:$4 sm:$0xff]  }
 0x65b   :  { %6522 = vmatpush2.bf16.msra.mxu1 %v8349_v31  ;;  %6482 = vmatprep.subr.bf16.mxu0 %v8354_v50  ;;  %v8397_v31 = vld [vmem:[#allocation3 + $0xb70] ss:$28 sps:$4 sm:$0xff]   ;;  %v8402_v50 = vld [vmem:[#allocation3 + $0x7bc] ss:$28 sps:$4 sm:$0xff]  }
 0x65c   :  { %6523 = vmatprep.subr.bf16.mxu1 %v8357_v33  ;;  %v8405_v33 = vld [vmem:[#allocation3 + $0xb3c] ss:$28 sps:$4 sm:$0xff]  }
 0x65e   :  { %6483 = vmatpush2.bf16.msra.mxu0 %v8352_v35  ;;  %v8400_v35 = vld [vmem:[#allocation3 + $0x7b8] ss:$28 sps:$4 sm:$0xff]  }
 0x65f   :  { %6524 = vmatpush2.bf16.msra.mxu1 %v8355_v36  ;;  %6484 = vmatprep.subr.bf16.mxu0 %v8360_v39  ;;  %v8403_v36 = vld [vmem:[#allocation3 + $0xb38] ss:$28 sps:$4 sm:$0xff]   ;;  %v8408_v39 = vld [vmem:[#allocation3 + $0x784] ss:$28 sps:$4 sm:$0xff]  }
 0x660   :  { %6525 = vmatprep.subr.bf16.mxu1 %v8363_v42  ;;  %v8411_v42 = vld [vmem:[#allocation3 + $0xb04] ss:$28 sps:$4 sm:$0xff]  }
 0x662   :  { %6485 = vmatpush2.bf16.msra.mxu0 %v8358_v53  ;;  %v8406_v53 = vld [vmem:[#allocation3 + $0x780] ss:$28 sps:$4 sm:$0xff]  }
 0x663   :  { %6526 = vmatpush2.bf16.msra.mxu1 %v8361_v40  ;;  %6486 = vmatprep.subr.bf16.mxu0 %v8366_v54  ;;  %v8409_v40 = vld [vmem:[#allocation3 + $0xb00] ss:$28 sps:$4 sm:$0xff]  }
 0x664   :  { %6527 = vmatprep.subr.bf16.mxu1 %v8369_v56  ;;  %v8414_v56 = vld [vmem:[#allocation3 + $0x74c] ss:$28 sps:$4 sm:$0xff]  }
 0x666   :  { %6487 = vmatpush2.bf16.msra.mxu0 %v8364_v58  ;;  %v8417_v58 = vld [vmem:[#allocation3 + $0xacc] ss:$28 sps:$4 sm:$0xff]  }
 0x667   :  { %6528 = vmatpush2.bf16.msra.mxu1 %v8367_v46  ;;  %6488 = vmatprep.subr.bf16.mxu0 %v8372_v38  ;;  %v8412_v38 = vld [vmem:[#allocation3 + $0x748] ss:$28 sps:$4 sm:$0xff]  }
 0x668   :  { %6529 = vmatprep.subr.bf16.mxu1 %v8375_v61  ;;  %v8415_v61 = vld [vmem:[#allocation3 + $0xac8] ss:$28 sps:$4 sm:$0xff]  }
 0x66a   :  { %6489 = vmatpush2.bf16.msra.mxu0 %v8370_v62  ;;  %v8423_v62 = vld [vmem:[#allocation3 + $0xa94] ss:$28 sps:$4 sm:$0xff]  }
 0x66b   :  { %6530 = vmatpush2.bf16.msra.mxu1 %v8373_v41  ;;  %6540 = vmatprep.subr.bf16.mxu0 %v8378_v63  ;;  %v8418_v41 = vld [vmem:[#allocation3 + $0x710] ss:$28 sps:$4 sm:$0xff]   ;;  %v8426_v63 = vld [vmem:[#allocation3 + $0xa5c] ss:$28 sps:$4 sm:$0xff]  }
 0x66c   :  { %6581 = vmatprep.subr.bf16.mxu1 %v8381_v48  ;;  %v8429_v48 = vld [vmem:[#allocation3 + $0xddc] ss:$28 sps:$4 sm:$0xff]  }
 0x66d   :  { %v6246_v1 = vpop.f32.mrf.mxu0  ;;  %6491 = vmatmul.mubr.bf16.vlgmr.msra.gmra.mxu0 %v8937_v21 }
 0x66e   :  { %v6287_v15 = vpop.f32.mrf.mxu1  ;;  %6532 = vmatmul.mubr.bf16.vlgmr.msra.gmra.mxu1 %v8941_v44  ;;  %v6247_v12 = vadd.f32 %v6246_v1, %v6206_v49  ;;  %6541 = vmatpush1.bf16.msra.mxu0 %v8376_v0  ;;  %v8432_v0 = vld [vmem:[#allocation3 + $0xa24] ss:$28 sps:$4 sm:$0xff]   ;;  %v8438_v49 = vld [vmem:[#allocation3 + $0x9ec] ss:$28 sps:$4 sm:$0xff]  }
 0x66f   :  { %6582 = vmatpush1.bf16.msra.mxu1 %v8379_v8  ;;  %v6248_v10 = vpop.f32.mrf.mxu0  ;;  %6542 = vmatprep.subr.bf16.mxu0 %v8384_v47  ;;  %v8435_v8 = vld [vmem:[#allocation3 + $0xda4] ss:$28 sps:$4 sm:$0xff]   ;;  %v8441_v1 = vld [vmem:[#allocation3 + $0xd6c] ss:$28 sps:$4 sm:$0xff]  }
 0x670   :  { %v6289_v13 = vpop.f32.mrf.mxu1  ;;  %6583 = vmatprep.subr.bf16.mxu1 %v8387_v9  ;;  %v6288_v30 = vadd.f32 %v6287_v15, %v6247_v12  ;;  %v6249_v17 = vadd.f32 %v6248_v10, %v6208_v29  ;;  %6572 = vmatprep.mubr.bf16.mxu0 %v8945_v28  ;;  %v8430_v47 = vld [vmem:[#allocation3 + $0xa20] ss:$28 sps:$4 sm:$0xff]   ;;  %v8436_v15 = vld [vmem:[#allocation3 + $0x9e8] ss:$28 sps:$4 sm:$0xff]   ;;  %v8444_v12 = vld [vmem:[#allocation3 + $0x9b4] ss:$28 sps:$4 sm:$0xff]  }
 0x671   :  { %6613 = vmatprep.mubr.bf16.mxu1 %v8949_v11  ;;  %v6250_v18 = vpop.f32.mrf.mxu0  ;;  %v8433_v9 = vld [vmem:[#allocation3 + $0xda0] ss:$28 sps:$4 sm:$0xff]   ;;  %v8439_v29 = vld [vmem:[#allocation3 + $0xd68] ss:$28 sps:$4 sm:$0xff]   ;;  %v8445_v10 = vld [vmem:[#allocation3 + $0xd30] ss:$28 sps:$4 sm:$0xff]  }
 0x672   :  { %v6291_v5 = vpop.f32.mrf.mxu1  ;;  %8536 = vtanh.f32 %v6288_v30  ;;  %v6290_v32 = vadd.f32 %v6289_v13, %v6249_v17  ;;  %6543 = vmatpush1.bf16.msra.mxu0 %v8382_v43  ;;  %v8447_v43 = vld [vmem:[#allocation3 + $0xd34] ss:$28 sps:$4 sm:$0xff]   ;;  %v8450_v13 = vld [vmem:[#allocation3 + $0x97c] ss:$28 sps:$4 sm:$0xff]   ;;  %v8456_v17 = vld [vmem:[#allocation3 + $0x944] ss:$28 sps:$4 sm:$0xff]  }
 0x673   :  { %6584 = vmatpush1.bf16.msra.mxu1 %v8385_v25  ;;  %v6251_v24 = vpop.f32.mrf.mxu0  ;;  %6544 = vmatprep.subr.bf16.mxu0 %v8390_v14  ;;  %v8442_v25 = vld [vmem:[#allocation3 + $0x9b0] ss:$28 sps:$4 sm:$0xff]   ;;  %v8453_v14 = vld [vmem:[#allocation3 + $0xcfc] ss:$28 sps:$4 sm:$0xff]   ;;  %v8459_v18 = vld [vmem:[#allocation3 + $0xcc4] ss:$28 sps:$4 sm:$0xff]  }
 0x674   :  { %v6292_v26 = vpop.f32.mrf.mxu1  ;;  %6585 = vmatprep.subr.bf16.mxu1 %v8393_v16  ;;  %8538 = vtanh.f32 %v6290_v32  ;;  %v8448_v16 = vld [vmem:[#allocation3 + $0x978] ss:$28 sps:$4 sm:$0xff]   ;;  %v8454_v5 = vld [vmem:[#allocation3 + $0x940] ss:$28 sps:$4 sm:$0xff]   ;;  %v8460_v24 = vld [vmem:[#allocation3 + $0x908] ss:$28 sps:$4 sm:$0xff]  }
 0x675   :  { %v8451_v30 = vld [vmem:[#allocation3 + $0xcf8] ss:$28 sps:$4 sm:$0xff]   ;;  %v8457_v32 = vld [vmem:[#allocation3 + $0xcc0] ss:$28 sps:$4 sm:$0xff]   ;;  %v8463_v26 = vld [vmem:[#allocation3 + $0xc88] ss:$28 sps:$4 sm:$0xff]  }
 0x676   :  { %6545 = vmatpush1.bf16.msra.mxu0 %v8388_v19  ;;  %v8462_v19 = vld [vmem:[#allocation3 + $0x90c] ss:$28 sps:$4 sm:$0xff]  }
 0x677   :  { %6586 = vmatpush1.bf16.msra.mxu1 %v8391_v20  ;;  %6546 = vmatprep.subr.bf16.mxu0 %v8396_v52  ;;  %v8465_v20 = vld [vmem:[#allocation3 + $0xc8c] ss:$28 sps:$4 sm:$0xff]   ;;  %v8468_v52 = vld [vmem:[#allocation3 + $0x8d4] ss:$28 sps:$4 sm:$0xff]  }
 0x678   :  { %6587 = vmatprep.subr.bf16.mxu1 %v8399_v27  ;;  %v8471_v27 = vld [vmem:[#allocation3 + $0xc54] ss:$28 sps:$4 sm:$0xff]  }
 0x67a   :  { %6547 = vmatpush1.bf16.msra.mxu0 %v8394_v23  ;;  %v8466_v23 = vld [vmem:[#allocation3 + $0x8d0] ss:$28 sps:$4 sm:$0xff]  }
 0x67b   :  { %6588 = vmatpush1.bf16.msra.mxu1 %v8397_v31  ;;  %6548 = vmatprep.subr.bf16.mxu0 %v8402_v50  ;;  %v8469_v31 = vld [vmem:[#allocation3 + $0xc50] ss:$28 sps:$4 sm:$0xff]   ;;  %v8472_v50 = vld [vmem:[#allocation3 + $0x360] ss:$28 sps:$4 sm:$0xff]  }
 0x67c   :  { %6589 = vmatprep.subr.bf16.mxu1 %v8405_v33  ;;  %v8473_v33 = vld [vmem:[#allocation3 + $0x6e0] ss:$28 sps:$4 sm:$0xff]  }
 0x67e   :  { %6549 = vmatpush1.bf16.msra.mxu0 %v8400_v35  ;;  %v8474_v35 = vld [vmem:[#allocation3 + $0x1a0] ss:$28 sps:$4 sm:$0xff]  }
 0x67f   :  { %6590 = vmatpush1.bf16.msra.mxu1 %v8403_v36  ;;  %v8537_v54 = vpop.eup %8536  ;;  %6550 = vmatprep.subr.bf16.mxu0 %v8408_v39  ;;  %v8475_v36 = vld [vmem:[#allocation3 + $0x520] ss:$28 sps:$4 sm:$0xff]   ;;  %v8476_v39 = vld [vmem:[#allocation3 + $0x328] ss:$28 sps:$4 sm:$0xff]  }
 0x680   :  { %6591 = vmatprep.subr.bf16.mxu1 %v8411_v42  ;;  %6789 = vst [vmem:[%s9055_s7] sm:$0xff] %v8537_v54  ;;  %v8477_v42 = vld [vmem:[#allocation3 + $0x6a8] ss:$28 sps:$4 sm:$0xff]  }
 0x681   :  { %v8539_v46 = vpop.eup %8538  ;;  %v8478_v54 = vld [vmem:[#allocation3 + $0x168] ss:$28 sps:$4 sm:$0xff]  }
 0x682   :  { %6790 = vst [vmem:[%s9055_s7 + $0x8] sm:$0xff] %v8539_v46  ;;  %6551 = vmatpush1.bf16.msra.mxu0 %v8406_v53 }
 0x683   :  { %6592 = vmatpush1.bf16.msra.mxu1 %v8409_v40  ;;  %6552 = vmatprep.subr.bf16.mxu0 %v8414_v56  ;;  %v8479_v56 = vld [vmem:[#allocation3 + $0x4e8] ss:$28 sps:$4 sm:$0xff]  }
 0x684   :  { %6593 = vmatprep.subr.bf16.mxu1 %v8417_v58 }
 0x686   :  { %6553 = vmatpush1.bf16.msra.mxu0 %v8412_v38  ;;  %v8480_v38 = vld [vmem:[#allocation3 + $0x2f0] ss:$28 sps:$4 sm:$0xff]  }
 0x687   :  { %6594 = vmatpush1.bf16.msra.mxu1 %v8415_v61  ;;  %6554 = vmatprep.subr.bf16.mxu0 %v8420_v59  ;;  %v8481_v61 = vld [vmem:[#allocation3 + $0x670] ss:$28 sps:$4 sm:$0xff]  }
 0x688   :  { %6595 = vmatprep.subr.bf16.mxu1 %v8423_v62 }
 0x68a   :  { %6555 = vmatpush1.bf16.msra.mxu0 %v8418_v41  ;;  %v8482_v41 = vld [vmem:[#allocation3 + $0x130] ss:$28 sps:$4 sm:$0xff]  }
 0x68b   :  { %6596 = vmatpush1.bf16.msra.mxu1 %v8421_v60  ;;  %6556 = vmatprep.subr.bf16.mxu0 %v8426_v63  ;;  %v8483_v60 = vld [vmem:[#allocation3 + $0x4b0] ss:$28 sps:$4 sm:$0xff]  }
 0x68c   :  { %6597 = vmatprep.subr.bf16.mxu1 %v8429_v48 }
 0x68e   :  { %6557 = vmatpush2.bf16.msra.mxu0 %v8424_v37  ;;  %v8484_v37 = vld [vmem:[#allocation3 + $0x2b8] ss:$28 sps:$4 sm:$0xff]  }
 0x68f   :  { %6598 = vmatpush2.bf16.msra.mxu1 %v8427_v6  ;;  %6558 = vmatprep.subr.bf16.mxu0 %v8432_v0  ;;  %v8485_v6 = vld [vmem:[#allocation3 + $0x638] ss:$28 sps:$4 sm:$0xff]  }
 0x690   :  { %6599 = vmatprep.subr.bf16.mxu1 %v8435_v8  ;;  %v8486_v0 = vld [vmem:[#allocation3 + $0xf8] ss:$28 sps:$4 sm:$0xff]  }
 0x691   :  { %v8487_v8 = vld [vmem:[#allocation3 + $0x478] ss:$28 sps:$4 sm:$0xff]  }
 0x692   :  { %6559 = vmatpush2.bf16.msra.mxu0 %v8430_v47  ;;  %v8490_v47 = vld [vmem:[#allocation3 + $0xc0] ss:$28 sps:$4 sm:$0xff]  }
 0x693   :  { %6600 = vmatpush2.bf16.msra.mxu1 %v8433_v9  ;;  %6560 = vmatprep.subr.bf16.mxu0 %v8438_v49  ;;  %v8491_v9 = vld [vmem:[#allocation3 + $0x440] ss:$28 sps:$4 sm:$0xff]   ;;  %v8492_v49 = vld [vmem:[#allocation3 + $0x248] ss:$28 sps:$4 sm:$0xff]  }
 0x694   :  { %6601 = vmatprep.subr.bf16.mxu1 %v8441_v1  ;;  %v8493_v1 = vld [vmem:[#allocation3 + $0x5c8] ss:$28 sps:$4 sm:$0xff]  }
 0x696   :  { %6561 = vmatpush2.bf16.msra.mxu0 %v8436_v15  ;;  %v8494_v15 = vld [vmem:[#allocation3 + $0x88] ss:$28 sps:$4 sm:$0xff]  }
 0x697   :  { %6602 = vmatpush2.bf16.msra.mxu1 %v8439_v29  ;;  %6562 = vmatprep.subr.bf16.mxu0 %v8444_v12  ;;  %v8495_v29 = vld [vmem:[#allocation3 + $0x408] ss:$28 sps:$4 sm:$0xff]   ;;  %v8496_v12 = vld [vmem:[#allocation3 + $0x210] ss:$28 sps:$4 sm:$0xff]  }
 0x698   :  { %6603 = vmatprep.subr.bf16.mxu1 %v8447_v43  ;;  %v8497_v43 = vld [vmem:[#allocation3 + $0x590] ss:$28 sps:$4 sm:$0xff]  }
 0x69a   :  { %6563 = vmatpush2.bf16.msra.mxu0 %v8442_v25  ;;  %v8498_v25 = vld [vmem:[#allocation3 + $0x50] ss:$28 sps:$4 sm:$0xff]  }
 0x69b   :  { %6604 = vmatpush2.bf16.msra.mxu1 %v8445_v10  ;;  %6564 = vmatprep.subr.bf16.mxu0 %v8450_v13  ;;  %v8499_v10 = vld [vmem:[#allocation3 + $0x3d0] ss:$28 sps:$4 sm:$0xff]   ;;  %v8500_v13 = vld [vmem:[#allocation3 + $0x1d8] ss:$28 sps:$4 sm:$0xff]  }
 0x69c   :  { %6605 = vmatprep.subr.bf16.mxu1 %v8453_v14  ;;  %v8501_v14 = vld [vmem:[#allocation3 + $0x558] ss:$28 sps:$4 sm:$0xff]  }
 0x69e   :  { %6565 = vmatpush2.bf16.msra.mxu0 %v8448_v16  ;;  %v8502_v16 = vld [vmem:[#allocation3 + $0x18] ss:$28 sps:$4 sm:$0xff]  }
 0x69f   :  { %6606 = vmatpush2.bf16.msra.mxu1 %v8451_v30  ;;  %6566 = vmatprep.subr.bf16.mxu0 %v8456_v17  ;;  %v8503_v30 = vld [vmem:[#allocation3 + $0x398] ss:$28 sps:$4 sm:$0xff]   ;;  %v8504_v17 = vld [vmem:[#allocation3 + $0xa60] ss:$28 sps:$4 sm:$0xff]  }
 0x6a0   :  { %6607 = vmatprep.subr.bf16.mxu1 %v8459_v18  ;;  %v8505_v18 = vld [vmem:[#allocation3 + $0xde0] ss:$28 sps:$4 sm:$0xff]  }
 0x6a2   :  { %6567 = vmatpush2.bf16.msra.mxu0 %v8454_v5  ;;  %v8506_v5 = vld [vmem:[#allocation3 + $0x8a0] ss:$28 sps:$4 sm:$0xff]  }
 0x6a3   :  { %6608 = vmatpush2.bf16.msra.mxu1 %v8457_v32  ;;  %6568 = vmatprep.subr.bf16.mxu0 %v8462_v19  ;;  %v8507_v32 = vld [vmem:[#allocation3 + $0xc20] ss:$28 sps:$4 sm:$0xff]   ;;  %v8508_v19 = vld [vmem:[#allocation3 + $0xa28] ss:$28 sps:$4 sm:$0xff]  }
 0x6a4   :  { %6609 = vmatprep.subr.bf16.mxu1 %v8465_v20  ;;  %v8509_v20 = vld [vmem:[#allocation3 + $0xda8] ss:$28 sps:$4 sm:$0xff]  }
 0x6a6   :  { %6569 = vmatpush2.bf16.msra.mxu0 %v8460_v24  ;;  %v8510_v24 = vld [vmem:[#allocation3 + $0x868] ss:$28 sps:$4 sm:$0xff]  }
 0x6a7   :  { %6610 = vmatpush2.bf16.msra.mxu1 %v8463_v26  ;;  %6570 = vmatprep.subr.bf16.mxu0 %v8468_v52  ;;  %v8511_v26 = vld [vmem:[#allocation3 + $0xbe8] ss:$28 sps:$4 sm:$0xff]   ;;  %v8512_v52 = vld [vmem:[#allocation3 + $0x9f0] ss:$28 sps:$4 sm:$0xff]  }
 0x6a8   :  { %6611 = vmatprep.subr.bf16.mxu1 %v8471_v27  ;;  %v8513_v27 = vld [vmem:[#allocation3 + $0xd70] ss:$28 sps:$4 sm:$0xff]  }
 0x6aa   :  { %6571 = vmatpush2.bf16.msra.mxu0 %v8466_v23  ;;  %v8514_v23 = vld [vmem:[#allocation3 + $0x830] ss:$28 sps:$4 sm:$0xff]  }
 0x6ab   :  { %6612 = vmatpush2.bf16.msra.mxu1 %v8469_v31  ;;  %7619 = vmatprep.subr.bf16.mxu0 %v8472_v50  ;;  %v8515_v31 = vld [vmem:[#allocation3 + $0xbb0] ss:$28 sps:$4 sm:$0xff]   ;;  %v8518_v50 = vld [vmem:[#allocation3 + $0x7f8] ss:$28 sps:$4 sm:$0xff]  }
 0x6ac   :  { %7641 = vmatprep.subr.bf16.mxu1 %v8473_v33  ;;  %v8519_v33 = vld [vmem:[#allocation3 + $0xb78] ss:$28 sps:$4 sm:$0xff]  }
 0x6ad   :  { %v9001_v53 = vpop.f32.mrf.mxu0  ;;  %6573 = vmatmul.mubr.bf16.vlgmr.msra.gmra.mxu0 %v8957_v45 }
 0x6ae   :  { %v9003_v40 = vpop.f32.mrf.mxu1  ;;  %6614 = vmatmul.mubr.bf16.vlgmr.msra.gmra.mxu1 %v8961_v51  ;;  %7620 = vmatpush3.bf16.msra.mxu0 %v8474_v35  ;;  %v8520_v35 = vld [vmem:[#allocation3 + $0x980] ss:$28 sps:$4 sm:$0xff]  }
 0x6af   :  { %7642 = vmatpush3.bf16.msra.mxu1 %v8475_v36  ;;  %v9007_v58 = vpop.f32.mrf.mxu0  ;;  %7621 = vmatprep.subr.bf16.mxu0 %v8476_v39  ;;  %v8521_v36 = vld [vmem:[#allocation3 + $0xd00] ss:$28 sps:$4 sm:$0xff]   ;;  %v8524_v39 = vld [vmem:[#allocation3 + $0x948] ss:$28 sps:$4 sm:$0xff]  }
 0x6b0   :  { %v9009_v46 = vpop.f32.mrf.mxu1  ;;  %7643 = vmatprep.subr.bf16.mxu1 %v8477_v42  ;;  %6654 = vmatprep.mubr.bf16.mxu0 %v8927_v2  ;;  %v8488_v2 = vld [vmem:[#allocation3 + $0x280] ss:$28 sps:$4 sm:$0xff]   ;;  %v8525_v42 = vld [vmem:[#allocation3 + $0xcc8] ss:$28 sps:$4 sm:$0xff]  }
 0x6b1   :  { %6694 = vmatprep.mubr.bf16.mxu1 %v8931_v3  ;;  %v6332_v59 = vpop.f32.mrf.mxu0  ;;  %v8489_v3 = vld [vmem:[#allocation3 + $0x600] ss:$28 sps:$4 sm:$0xff]  }
 0x6b2   :  { %v6373_v62 = vpop.f32.mrf.mxu1  ;;  %7622 = vmatpush3.bf16.msra.mxu0 %v8478_v54  ;;  %v8526_v54 = vld [vmem:[#allocation3 + $0x788] ss:$28 sps:$4 sm:$0xff]   ;;  %v8530_v59 = vld [vmem:[#allocation3 + $0x750] ss:$28 sps:$4 sm:$0xff]  }
 0x6b3   :  { %7644 = vmatpush3.bf16.msra.mxu1 %v8479_v56  ;;  %v6333_v63 = vpop.f32.mrf.mxu0  ;;  %7623 = vmatprep.subr.bf16.mxu0 %v8480_v38  ;;  %v8527_v56 = vld [vmem:[#allocation3 + $0xb08] ss:$28 sps:$4 sm:$0xff]   ;;  %v8528_v38 = vld [vmem:[#allocation3 + $0x910] ss:$28 sps:$4 sm:$0xff]  }
 0x6b4   :  { %v6374_v48 = vpop.f32.mrf.mxu1  ;;  %7645 = vmatprep.subr.bf16.mxu1 %v8481_v61  ;;  %v8529_v61 = vld [vmem:[#allocation3 + $0xc90] ss:$28 sps:$4 sm:$0xff]   ;;  %v3802_v63 = vrot.slane %v8777_v4, %v8800_v55 }
 0x6b5   :  { %v8531_v62 = vld [vmem:[#allocation3 + $0xad0] ss:$28 sps:$4 sm:$0xff]   ;;  %v3806_v48 = vrot.slane %v8777_v4, %v8803_v57 }
 0x6b6   :  { %7624 = vmatpush3.bf16.msra.mxu0 %v8482_v41  ;;  %v8532_v41 = vld [vmem:[#allocation3 + $0x8d8] ss:$28 sps:$4 sm:$0xff]  }
 0x6b7   :  { %7646 = vmatpush3.bf16.msra.mxu1 %v8483_v60  ;;  %7625 = vmatprep.subr.bf16.mxu0 %v8484_v37  ;;  %v8533_v60 = vld [vmem:[#allocation3 + $0xc58] ss:$28 sps:$4 sm:$0xff]  }
 0x6b8   :  { %7647 = vmatprep.subr.bf16.mxu1 %v8485_v6  ;;  %v8534_v37 = vld [vmem:[#allocation3 + $0x718] ss:$28 sps:$4 sm:$0xff]  }
 0x6b9   :  { %v8535_v6 = vld [vmem:[#allocation3 + $0xa98] ss:$28 sps:$4 sm:$0xff]  }
 0x6ba   :  { %7626 = vmatpush3.bf16.msra.mxu0 %v8486_v0  ;;  %v6329_v0 = vadd.f32 %v9001_v53, %v3802_v63 }
 0x6bb   :  { %7648 = vmatpush3.bf16.msra.mxu1 %v8487_v8  ;;  %7627 = vmatprep.subr.bf16.mxu0 %v8488_v2  ;;  %v6331_v8 = vadd.f32 %v9007_v58, %v3806_v48 }
 0x6bc   :  { %7649 = vmatprep.subr.bf16.mxu1 %v8489_v3  ;;  %v6370_v2 = vadd.f32 %v9003_v40, %v6329_v0 }
 0x6bd   :  { %v6372_v55 = vadd.f32 %v9009_v46, %v6331_v8 }
 0x6be   :  { %7628 = vmatpush3.bf16.msra.mxu0 %v8490_v47 }
 0x6bf   :  { %7650 = vmatpush3.bf16.msra.mxu1 %v8491_v9  ;;  %7629 = vmatprep.subr.bf16.mxu0 %v8492_v49 }
 0x6c0   :  { %7651 = vmatprep.subr.bf16.mxu1 %v8493_v1 }
 0x6c2   :  { %7630 = vmatpush3.bf16.msra.mxu0 %v8494_v15 }
 0x6c3   :  { %7652 = vmatpush3.bf16.msra.mxu1 %v8495_v29  ;;  %7631 = vmatprep.subr.bf16.mxu0 %v8496_v12 }
 0x6c4   :  { %7653 = vmatprep.subr.bf16.mxu1 %v8497_v43 }
 0x6c6   :  { %7632 = vmatpush3.bf16.msra.mxu0 %v8498_v25 }
 0x6c7   :  { %7654 = vmatpush3.bf16.msra.mxu1 %v8499_v10  ;;  %7633 = vmatprep.subr.bf16.mxu0 %v8500_v13 }
 0x6c8   :  { %7655 = vmatprep.subr.bf16.mxu1 %v8501_v14 }
 0x6ca   :  { %7634 = vmatpush3.bf16.msra.mxu0 %v8502_v16 }
 0x6cb   :  { %7656 = vmatpush3.bf16.msra.mxu1 %v8503_v30  ;;  %7663 = vmatprep.subr.bf16.mxu0 %v8504_v17  ;;  %v3810_v17 = vrot.slane %v8777_v4, %v8878_v7 }
 0x6cc   :  { %7685 = vmatprep.subr.bf16.mxu1 %v8505_v18  ;;  %v3814_v18 = vrot.slane %v8777_v4, %v8881_v22 }
 0x6cd   :  { %6655 = vmatmul.mubr.bf16.vlgmr.msra.gmra.mxu0 %v8937_v21  ;;  %v8516_v21 = vld [vmem:[#allocation3 + $0x9b8] ss:$28 sps:$4 sm:$0xff]  }
 0x6ce   :  { %6695 = vmatmul.mubr.bf16.vlgmr.msra.gmra.mxu1 %v8941_v44  ;;  %7664 = vmatpush3.bf16.msra.mxu0 %v8506_v5  ;;  %v8517_v44 = vld [vmem:[#allocation3 + $0xd38] ss:$28 sps:$4 sm:$0xff]  }
 0x6cf   :  { %7686 = vmatpush3.bf16.msra.mxu1 %v8507_v32  ;;  %7665 = vmatprep.subr.bf16.mxu0 %v8508_v19 }
 0x6d0   :  { %7687 = vmatprep.subr.bf16.mxu1 %v8509_v20  ;;  %6734 = vmatprep.mubr.bf16.mxu0 %v8945_v28  ;;  %v8522_v28 = vld [vmem:[#allocation3 + $0x7c0] ss:$28 sps:$4 sm:$0xff]  }
 0x6d1   :  { %6774 = vmatprep.mubr.bf16.mxu1 %v8949_v11  ;;  %v8523_v11 = vld [vmem:[#allocation3 + $0xb40] ss:$28 sps:$4 sm:$0xff]  }
 0x6d2   :  { %7666 = vmatpush3.bf16.msra.mxu0 %v8510_v24 }
 0x6d3   :  { %7688 = vmatpush3.bf16.msra.mxu1 %v8511_v26  ;;  %7667 = vmatprep.subr.bf16.mxu0 %v8512_v52 }
 0x6d4   :  { %7689 = vmatprep.subr.bf16.mxu1 %v8513_v27 }
 0x6d6   :  { %7668 = vmatpush3.bf16.msra.mxu0 %v8514_v23 }
 0x6d7   :  { %7690 = vmatpush3.bf16.msra.mxu1 %v8515_v31  ;;  %7669 = vmatprep.subr.bf16.mxu0 %v8516_v21 }
 0x6d8   :  { %7691 = vmatprep.subr.bf16.mxu1 %v8517_v44 }
 0x6da   :  { %7670 = vmatpush3.bf16.msra.mxu0 %v8518_v50 }
 0x6db   :  { %7692 = vmatpush3.bf16.msra.mxu1 %v8519_v33  ;;  %7671 = vmatprep.subr.bf16.mxu0 %v8520_v35 }
 0x6dc   :  { %7693 = vmatprep.subr.bf16.mxu1 %v8521_v36 }
 0x6de   :  { %7672 = vmatpush3.bf16.msra.mxu0 %v8522_v28 }
 0x6df   :  { %7694 = vmatpush3.bf16.msra.mxu1 %v8523_v11  ;;  %7673 = vmatprep.subr.bf16.mxu0 %v8524_v39 }
 0x6e0   :  { %7695 = vmatprep.subr.bf16.mxu1 %v8525_v42 }
 0x6e2   :  { %7674 = vmatpush3.bf16.msra.mxu0 %v8526_v54 }
 0x6e3   :  { %7696 = vmatpush3.bf16.msra.mxu1 %v8527_v56  ;;  %7675 = vmatprep.subr.bf16.mxu0 %v8528_v38 }
 0x6e4   :  { %7697 = vmatprep.subr.bf16.mxu1 %v8529_v61 }
 0x6e6   :  { %7676 = vmatpush3.bf16.msra.mxu0 %v8530_v59  ;;  %v3818_v59 = vrot.slane %v8777_v4, %v8900_v34 }
 0x6e7   :  { %7698 = vmatpush3.bf16.msra.mxu1 %v8531_v62  ;;  %7677 = vmatprep.subr.bf16.mxu0 %v8532_v41 }
 0x6e8   :  { %7699 = vmatprep.subr.bf16.mxu1 %v8533_v60 }
 0x6ea   :  { %7678 = vmatpush3.bf16.msra.mxu0 %v8534_v37 }
 0x6eb   :  { %7700 = vmatpush3.bf16.msra.mxu1 %v8535_v6 }
 0x6ed   :  { %v6410_v3 = vpop.f32.mrf.mxu0  ;;  %6735 = vmatmul.mubr.bf16.vlgmr.msra.gmra.mxu0 %v8957_v45 }
 0x6ee   :  { %v6451_v47 = vpop.f32.mrf.mxu1  ;;  %6775 = vmatmul.mubr.bf16.vlgmr.msra.gmra.mxu1 %v8961_v51  ;;  %v6411_v57 = vadd.f32 %v6410_v3, %v6370_v2 }
 0x6ef   :  { %v6412_v9 = vpop.f32.mrf.mxu0 }
 0x6f0   :  { %v6453_v49 = vpop.f32.mrf.mxu1  ;;  %v6452_v1 = vadd.f32 %v6451_v47, %v6411_v57  ;;  %v6413_v15 = vadd.f32 %v6412_v9, %v6372_v55 }
 0x6f1   :  { %v6414_v53 = vpop.f32.mrf.mxu0 }
 0x6f2   :  { %v6455_v29 = vpop.f32.mrf.mxu1  ;;  %8540 = vtanh.f32 %v6452_v1  ;;  %v6454_v58 = vadd.f32 %v6453_v49, %v6413_v15 }
 0x6f3   :  { %v6415_v12 = vpop.f32.mrf.mxu0 }
 0x6f4   :  { %v6456_v43 = vpop.f32.mrf.mxu1  ;;  %8542 = vtanh.f32 %v6454_v58 }
 0x6ff   :  { %v8541_v40 = vpop.eup %8540 }
 0x700   :  { %6791 = vst [vmem:[%s9055_s7 + $0x10] sm:$0xff] %v8541_v40 }
 0x701   :  { %v8543_v45 = vpop.eup %8542 }
 0x702   :  { %6792 = vst [vmem:[%s9055_s7 + $0x18] sm:$0xff] %v8543_v45 }
 0x72d   :  { %v6492_v51 = vpop.f32.mrf.mxu0 }
 0x72e   :  { %v6533_v46 = vpop.f32.mrf.mxu1  ;;  %v6493_v5 = vadd.f32 %v6492_v51, %v3810_v17 }
 0x72f   :  { %v6494_v25 = vpop.f32.mrf.mxu0 }
 0x730   :  { %v6535_v10 = vpop.f32.mrf.mxu1  ;;  %v6495_v32 = vadd.f32 %v6494_v25, %v3814_v18  ;;  %v6534_v19 = vadd.f32 %v6533_v46, %v6493_v5 }
 0x731   :  { %v6496_v13 = vpop.f32.mrf.mxu0 }
 0x732   :  { %v6537_v14 = vpop.f32.mrf.mxu1  ;;  %v6536_v26 = vadd.f32 %v6535_v10, %v6495_v32 }
 0x733   :  { %v6497_v16 = vpop.f32.mrf.mxu0 }
 0x734   :  { %v6538_v30 = vpop.f32.mrf.mxu1 }
 0x76d   :  { %v6574_v20 = vpop.f32.mrf.mxu0 }
 0x76e   :  { %v6615_v24 = vpop.f32.mrf.mxu1  ;;  %v6575_v52 = vadd.f32 %v6574_v20, %v6534_v19 }
 0x76f   :  { %v6576_v27 = vpop.f32.mrf.mxu0 }
 0x770   :  { %v6617_v23 = vpop.f32.mrf.mxu1  ;;  %v6616_v31 = vadd.f32 %v6615_v24, %v6575_v52  ;;  %v6577_v21 = vadd.f32 %v6576_v27, %v6536_v26 }
 0x771   :  { %v6578_v44 = vpop.f32.mrf.mxu0 }
 0x772   :  { %v6619_v50 = vpop.f32.mrf.mxu1  ;;  %8544 = vtanh.f32 %v6616_v31  ;;  %v6618_v33 = vadd.f32 %v6617_v23, %v6577_v21 }
 0x773   :  { %v6579_v35 = vpop.f32.mrf.mxu0 }
 0x774   :  { %v6620_v7 = vpop.f32.mrf.mxu1  ;;  %8546 = vtanh.f32 %v6618_v33 }
 0x77f   :  { %v8545_v36 = vpop.eup %8544 }
 0x780   :  { %6793 = vst [vmem:[%s9055_s7 + $0x20] sm:$0xff] %v8545_v36 }
 0x781   :  { %v8547_v22 = vpop.eup %8546 }
 0x782   :  { %6794 = vst [vmem:[%s9055_s7 + $0x28] sm:$0xff] %v8547_v22 }
 0x78d   :  { %v7635_v28 = vpop.f32.mrf.mxu0 }
 0x78e   :  { %v7657_v11 = vpop.f32.mrf.mxu1 }
 0x78f   :  { %v7636_v39 = vpop.f32.mrf.mxu0 }
 0x790   :  { %v7658_v42 = vpop.f32.mrf.mxu1  ;;  %v7637_v62 = vadd.f32 %v7636_v39, %v7635_v28 }
 0x791   :  { %v7638_v54 = vpop.f32.mrf.mxu0  ;;  %v7659_v60 = vadd.f32 %v7658_v42, %v7657_v11 }
 0x792   :  { %v7660_v56 = vpop.f32.mrf.mxu1  ;;  %v6657_v41 = vadd.f32 %v7637_v62, %v3818_v59 }
 0x793   :  { %v7639_v38 = vpop.f32.mrf.mxu0 }
 0x794   :  { %v7661_v61 = vpop.f32.mrf.mxu1  ;;  %v6697_v0 = vadd.f32 %v7659_v60, %v6657_v41 }
 0x7ad   :  { %v7679_v63 = vpop.f32.mrf.mxu0 }
 0x7ae   :  { %v7701_v48 = vpop.f32.mrf.mxu1 }
 0x7af   :  { %v7680_v37 = vpop.f32.mrf.mxu0 }
 0x7b0   :  { %v7702_v6 = vpop.f32.mrf.mxu1  ;;  %v7681_v8 = vadd.f32 %v7680_v37, %v7679_v63 }
 0x7b1   :  { %v7682_v2 = vpop.f32.mrf.mxu0  ;;  %v7703_v55 = vadd.f32 %v7702_v6, %v7701_v48 }
 0x7b2   :  { %v7704_v3 = vpop.f32.mrf.mxu1  ;;  %v6737_v47 = vadd.f32 %v7681_v8, %v6697_v0 }
 0x7b3   :  { %v7683_v57 = vpop.f32.mrf.mxu0 }
 0x7b4   :  { %v7705_v9 = vpop.f32.mrf.mxu1  ;;  %v6777_v49 = vadd.f32 %v7703_v55, %v6737_v47 }
 0x7b6   :  { %8548 = vtanh.f32 %v6777_v49 }
 0x7c3   :  { %v8549_v1 = vpop.eup %8548 }
 0x7c4   :  { %6795 = vst [vmem:[%s9055_s7 + $0x30] sm:$0xff] %v8549_v1 }
 0x7c5   :  { %6800 = vsyncpa [#allocation6], 1 }
 0x7c6   :  { %6801 = vsyncpa [#allocation8], 1 }
 0x7c7   :  { %6802 = vsyncpa [#allocation11], 1 }
 0x7c8   :  { %6803 = vsyncmov [#allocation4] }
 0x7cb   :  { %s6804_s24 = vpop.sfrf %6803 }
 0x7cc   :  { %p7609_p7 = scmp.ne.s32.totalorder %s6804_s24, 0 }
 0x7ce   :  { %6808 = shalt.err (%p7609_p7)  }
 0x7cf   :  { %6810 = vsyncmov [#allocation4 + $0x1] }
 0x7d2   :  { %s6811_s25 = vpop.sfrf %6810 }
 0x7d3   :  { %p7610_p8 = scmp.ne.s32.totalorder %s6811_s25, 0 }
 0x7d5   :  { %6815 = shalt.err (%p7610_p8)  }

</bundles_post_ra>
